<compile_context>
chip_gen: v6e
topology: v6e:2x2x1
jax: 0.10.0
libtpu: 0.0.40
codegen_flags: <defaults>
</compile_context>

<pallas_src>
import jax
import jax.numpy as jnp
import numpy as np
from jax.experimental import pallas as pl
from jax.experimental.pallas import tpu as pltpu

EPS = 1e-5      # nn.BatchNorm2d default eps
KH = KW = 3     # nn.Conv2d(.., 3) kernel size
LANE = 128


def _round_up(n, m):
    return ((n + m - 1) // m) * m


def make_conv_conv_kernel(W, M1, M2, W2, Cp):
    """conv1(3x3,valid)+bias+ReLU -> conv2(3x3,valid)+bias on W-strided flattened rows,
    plus per-batch-element partial BatchNorm statistics (sum, sum of squares)."""

    def kernel(x_ref, w1_ref, b1_ref, w2_ref, b2_ref,
               y2_ref, ssum_ref, ssq_ref, y1_ref):
        # ---- conv1: 9 tap matmuls on the MXU (f32 accumulate) + bias + ReLU ----
        acc1 = None
        for t in range(KH * KW):
            ky, kx = divmod(t, KW)
            off = ky * W + kx
            d = jnp.dot(x_ref[0, off:off + M1, :], w1_ref[t],
                        preferred_element_type=jnp.float32)       # (M1, Cp)
            acc1 = d if acc1 is None else acc1 + d
        y1_ref[...] = jnp.maximum(acc1 + b1_ref[0], 0.0)           # (M1, Cp)

        # ---- conv2: 9 tap matmuls, lane-dense K = Cp, whole-width y1 windows ----
        acc2 = None
        for t in range(KH * KW):
            ky, kx = divmod(t, KW)
            off = ky * W + kx
            d = jnp.dot(y1_ref[off:off + M2, :], w2_ref[t],
                        preferred_element_type=jnp.float32)       # (M2, Cp)
            acc2 = d if acc2 is None else acc2 + d
        y2 = acc2 + b2_ref[0]                                      # (M2, Cp), pre-BN

        # ---- zero the W2..W-1 wrap-around garbage columns, store, partial stats ----
        col = jax.lax.broadcasted_iota(jnp.int32, (M2, 1), 0) % W
        y2m = jnp.where(col < W2, y2, 0.0)
        y2_ref[0] = y2m
        ssum_ref[0] = jnp.sum(y2m, axis=0, keepdims=True)          # (1, Cp)
        ssq_ref[0] = jnp.sum(y2m * y2m, axis=0, keepdims=True)     # (1, Cp)

    return kernel


def bn_relu_kernel(y_ref, scale_ref, shift_ref, out_ref):
    # y * scale + shift, then ReLU (scale/shift fold gamma, beta, mean, var).
    out_ref[...] = jnp.maximum(y_ref[...] * scale_ref[...] + shift_ref[...], 0.0)


def two_conv_block(x_nchw, w1_pt, b1, w2_pt, b2, gamma, beta):
    """x_nchw: (B, Cin, H, W); conv weights in PyTorch OIHW layout."""
    x_nchw = x_nchw.astype(jnp.float32)
    B, Cin, H, W = x_nchw.shape
    C1 = w1_pt.shape[0]
    Cp = _round_up(C1, LANE)                 # lane-dense (padded) channel count
    H1, W1 = H - KH + 1, W - KW + 1          # conv1 output spatial ("valid", stride 1)
    H2, W2 = H1 - KH + 1, W1 - KW + 1        # conv2 output spatial

    # W-strided flattened layout: row r <-> pixel (r // W, r % W).
    M2 = H2 * W                              # conv2 rows kept (valid cols are 0..W2-1)
    M1 = _round_up(H1 * W + (KW - 1), 8)     # conv1 rows incl. slack for conv2's last tap
    need_x = (KH - 1) * W + (KW - 1) + M1    # number of x rows conv1 may touch
    pad_rows = max(0, -(-(need_x - H * W) // W))
    Nx = (H + pad_rows) * W                  # zero-padded input rows

    # input: NCHW -> NHWC -> (B, Nx, Cin)
    x_flat = jnp.transpose(x_nchw, (0, 2, 3, 1)).reshape(B, H * W, Cin)
    x_flat = jnp.pad(x_flat, ((0, 0), (0, Nx - H * W), (0, 0)))

    # weights: OIHW -> (tap, Cin, Cout); pad output (and conv2 input) channels to Cp.
    w1_k = jnp.transpose(w1_pt.astype(jnp.float32), (2, 3, 1, 0)).reshape(KH * KW, Cin, C1)
    w1_k = jnp.pad(w1_k, ((0, 0), (0, 0), (0, Cp - C1)))
    w2_k = jnp.transpose(w2_pt.astype(jnp.float32), (2, 3, 1, 0)).reshape(KH * KW, C1, C1)
    w2_k = jnp.pad(w2_k, ((0, 0), (0, Cp - C1), (0, Cp - C1)))

    b1p = jnp.pad(b1.astype(jnp.float32), (0, Cp - C1)).reshape(1, Cp)
    b2p = jnp.pad(b2.astype(jnp.float32), (0, Cp - C1)).reshape(1, Cp)
    gamma_p = jnp.pad(gamma.astype(jnp.float32), (0, Cp - C1))
    beta_p = jnp.pad(beta.astype(jnp.float32), (0, Cp - C1))

    kernel1 = make_conv_conv_kernel(W, M1, M2, W2, Cp)

    y2, ssum, ssq = pl.pallas_call(
        kernel1,
        grid=(B,),
        in_specs=[
            pl.BlockSpec((1, Nx, Cin), lambda b: (b, 0, 0)),
            pl.BlockSpec((KH * KW, Cin, Cp), lambda b: (0, 0, 0)),
            pl.BlockSpec((1, Cp), lambda b: (0, 0)),
            pl.BlockSpec((KH * KW, Cp, Cp), lambda b: (0, 0, 0)),
            pl.BlockSpec((1, Cp), lambda b: (0, 0)),
        ],
        out_specs=[
            pl.BlockSpec((1, M2, Cp), lambda b: (b, 0, 0)),
            pl.BlockSpec((1, 1, Cp), lambda b: (b, 0, 0)),
            pl.BlockSpec((1, 1, Cp), lambda b: (b, 0, 0)),
        ],
        out_shape=[
            jax.ShapeDtypeStruct((B, M2, Cp), jnp.float32),   # conv2 + bias (pre-BN)
            jax.ShapeDtypeStruct((B, 1, Cp), jnp.float32),    # per-batch sum
            jax.ShapeDtypeStruct((B, 1, Cp), jnp.float32),    # per-batch sum of squares
        ],
        scratch_shapes=[pltpu.VMEM((M1, Cp), jnp.float32)],   # conv1+ReLU slab
        compiler_params=pltpu.CompilerParams(
            dimension_semantics=("parallel",)),
    )(x_flat, w1_k, b1p, w2_k, b2p)

    # Global (whole-batch) BatchNorm statistics from the per-tile partial sums; fold
    # gamma/beta/mean/var into a single per-channel scale & shift (O(C) wrapper work).
    n = float(B * H2 * W2)
    total = jnp.sum(ssum, axis=(0, 1))                              # (Cp,)
    total_sq = jnp.sum(ssq, axis=(0, 1))
    mean = total / n
    var = jnp.maximum(total_sq / n - mean * mean, 0.0)              # biased variance
    scale = gamma_p * jax.lax.rsqrt(var + EPS)
    shift = beta_p - mean * scale

    # ---- pass 2: normalize + ReLU over a flattened (rows, Cp) slab, big row tiles ----
    R = B * M2
    TILE_R = min(_round_up(R, 8), 1024)
    Rp = _round_up(R, TILE_R)
    y2_flat = y2.reshape(R, Cp)
    if Rp != R:
        y2_flat = jnp.pad(y2_flat, ((0, Rp - R), (0, 0)))

    out_flat = pl.pallas_call(
        bn_relu_kernel,
        grid=(Rp // TILE_R,),
        in_specs=[
            pl.BlockSpec((TILE_R, Cp), lambda i: (i, 0)),
            pl.BlockSpec((1, Cp), lambda i: (0, 0)),
            pl.BlockSpec((1, Cp), lambda i: (0, 0)),
        ],
        out_specs=pl.BlockSpec((TILE_R, Cp), lambda i: (i, 0)),
        out_shape=jax.ShapeDtypeStruct((Rp, Cp), jnp.float32),
        compiler_params=pltpu.CompilerParams(
            dimension_semantics=("parallel",)),
    )(y2_flat, scale.reshape(1, Cp), shift.reshape(1, Cp))

    # (Rp, Cp) -> drop row padding, garbage columns, channel padding -> NCHW
    out = out_flat[:R].reshape(B, H2, W, Cp)[:, :, :W2, :C1]
    return jnp.transpose(out, (0, 3, 1, 2))


def reference(x, w1_oihw, b1, w2_oihw, b2, gamma, beta):
    dn = ('NCHW', 'OIHW', 'NCHW')
    y = jax.lax.conv_general_dilated(x, w1_oihw, (1, 1), 'VALID', dimension_numbers=dn)
    y = jnp.maximum(y + b1[None, :, None, None], 0.0)
    y = jax.lax.conv_general_dilated(y, w2_oihw, (1, 1), 'VALID', dimension_numbers=dn)
    y = y + b2[None, :, None, None]
    mean = jnp.mean(y, axis=(0, 2, 3), keepdims=True)
    var = jnp.mean((y - mean) ** 2, axis=(0, 2, 3), keepdims=True)
    y = (y - mean) * jax.lax.rsqrt(var + EPS)
    y = y * gamma[None, :, None, None] + beta[None, :, None, None]
    return jnp.maximum(y, 0.0)


if __name__ == "__main__":
    B, Cin, Cout, H, W = 2, 4, 8, 16, 16
    key = jax.random.PRNGKey(0)
    k1, k2, k3, k4, k5 = jax.random.split(key, 5)

    x = jax.random.normal(k1, (B, Cin, H, W), jnp.float32)
    # Deterministic synthetic parameters (shapes from nn.Conv2d / nn.BatchNorm2d __init__).
    w1 = jax.random.normal(k2, (Cout, Cin, KH, KW), jnp.float32) * 0.1
    b1 = jax.random.normal(k3, (Cout,), jnp.float32) * 0.1
    w2 = jax.random.normal(k4, (Cout, Cout, KH, KW), jnp.float32) * 0.1
    b2 = jax.random.normal(k5, (Cout,), jnp.float32) * 0.1
    gamma = jnp.ones((Cout,), jnp.float32)   # BatchNorm2d weight init
    beta = jnp.zeros((Cout,), jnp.float32)   # BatchNorm2d bias init

    out = two_conv_block(x, w1, b1, w2, b2, gamma, beta)
    out = jax.block_until_ready(out)

    assert out.shape == (B, Cout, H - 4, W - 4)
    ref = reference(x, w1, b1, w2, b2, gamma, beta)
    np.testing.assert_allclose(np.asarray(out), np.asarray(ref), rtol=1e-3, atol=1e-4)

    print("KERNEL_OK")
</pallas_src>

<mosaic_0001>
module attributes {stable_mosaic.version = 11 : i64} {
  func.func @kernel(%arg0: i32, %arg1: memref<1x272x4xf32, #tpu.memory_space<vmem>>, %arg2: memref<9x4x128xf32, #tpu.memory_space<vmem>>, %arg3: memref<1x128xf32, #tpu.memory_space<vmem>>, %arg4: memref<9x128x128xf32, #tpu.memory_space<vmem>>, %arg5: memref<1x128xf32, #tpu.memory_space<vmem>>, %arg6: memref<1x192x128xf32, #tpu.memory_space<vmem>>, %arg7: memref<1x1x128xf32, #tpu.memory_space<vmem>>, %arg8: memref<1x1x128xf32, #tpu.memory_space<vmem>>, %arg9: memref<232x128xf32, #tpu.memory_space<vmem>>) attributes {dimension_semantics = [#tpu.dimension_semantics<parallel>], iteration_bounds = array<i64: 2>, scalar_prefetch = 0 : i64, scratch_operands = 1 : i64, tpu.core_type = #tpu.core_type<tc>, window_params = [{transform_indices = @transform_0, window_bounds = array<i64: 1, 272, 4>}, {pipeline_mode = #tpu.pipeline_mode<synchronous>, transform_indices = @transform_1, window_bounds = array<i64: 9, 4, 128>}, {pipeline_mode = #tpu.pipeline_mode<synchronous>, transform_indices = @transform_2, window_bounds = array<i64: 1, 128>}, {pipeline_mode = #tpu.pipeline_mode<synchronous>, transform_indices = @transform_3, window_bounds = array<i64: 9, 128, 128>}, {pipeline_mode = #tpu.pipeline_mode<synchronous>, transform_indices = @transform_4, window_bounds = array<i64: 1, 128>}, {transform_indices = @transform_5, window_bounds = array<i64: 1, 192, 128>}, {transform_indices = @transform_6, window_bounds = array<i64: 1, 1, 128>}, {transform_indices = @transform_7, window_bounds = array<i64: 1, 1, 128>}]} {
    %c0 = arith.constant 0 : index
    %c0_0 = arith.constant 0 : index
    %c0_1 = arith.constant 0 : index
    %0 = vector.load %arg1[%c0, %c0_0, %c0_1] : memref<1x272x4xf32, #tpu.memory_space<vmem>>, vector<1x232x4xf32>
    %1 = vector.shape_cast %0 : vector<1x232x4xf32> to vector<232x4xf32>
    %c0_2 = arith.constant 0 : index
    %c0_3 = arith.constant 0 : index
    %c0_4 = arith.constant 0 : index
    %2 = vector.load %arg2[%c0_2, %c0_3, %c0_4] : memref<9x4x128xf32, #tpu.memory_space<vmem>>, vector<1x4x128xf32>
    %3 = vector.shape_cast %2 : vector<1x4x128xf32> to vector<4x128xf32>
    %cst = arith.constant dense<0.000000e+00> : vector<232x128xf32>
    %4 = tpu.matmul %1, %3, %cst {dimension_numbers = #tpu.dot_dimension_numbers<[1], [0], [0], [1], [0, 0, 1, 1], [], []>} : vector<232x4xf32>, vector<4x128xf32>, vector<232x128xf32> -> vector<232x128xf32>
    %c0_5 = arith.constant 0 : index
    %c1 = arith.constant 1 : index
    %c0_6 = arith.constant 0 : index
    %5 = vector.load %arg1[%c0_5, %c1, %c0_6] : memref<1x272x4xf32, #tpu.memory_space<vmem>>, vector<1x232x4xf32>
    %6 = vector.shape_cast %5 : vector<1x232x4xf32> to vector<232x4xf32>
    %c1_7 = arith.constant 1 : index
    %c0_8 = arith.constant 0 : index
    %c0_9 = arith.constant 0 : index
    %7 = vector.load %arg2[%c1_7, %c0_8, %c0_9] : memref<9x4x128xf32, #tpu.memory_space<vmem>>, vector<1x4x128xf32>
    %8 = vector.shape_cast %7 : vector<1x4x128xf32> to vector<4x128xf32>
    %cst_10 = arith.constant dense<0.000000e+00> : vector<232x128xf32>
    %9 = tpu.matmul %6, %8, %cst_10 {dimension_numbers = #tpu.dot_dimension_numbers<[1], [0], [0], [1], [0, 0, 1, 1], [], []>} : vector<232x4xf32>, vector<4x128xf32>, vector<232x128xf32> -> vector<232x128xf32>
    %10 = arith.addf %4, %9 : vector<232x128xf32>
    %c0_11 = arith.constant 0 : index
    %c2 = arith.constant 2 : index
    %c0_12 = arith.constant 0 : index
    %11 = vector.load %arg1[%c0_11, %c2, %c0_12] : memref<1x272x4xf32, #tpu.memory_space<vmem>>, vector<1x232x4xf32>
    %12 = vector.shape_cast %11 : vector<1x232x4xf32> to vector<232x4xf32>
    %c2_13 = arith.constant 2 : index
    %c0_14 = arith.constant 0 : index
    %c0_15 = arith.constant 0 : index
    %13 = vector.load %arg2[%c2_13, %c0_14, %c0_15] : memref<9x4x128xf32, #tpu.memory_space<vmem>>, vector<1x4x128xf32>
    %14 = vector.shape_cast %13 : vector<1x4x128xf32> to vector<4x128xf32>
    %cst_16 = arith.constant dense<0.000000e+00> : vector<232x128xf32>
    %15 = tpu.matmul %12, %14, %cst_16 {dimension_numbers = #tpu.dot_dimension_numbers<[1], [0], [0], [1], [0, 0, 1, 1], [], []>} : vector<232x4xf32>, vector<4x128xf32>, vector<232x128xf32> -> vector<232x128xf32>
    %16 = arith.addf %10, %15 : vector<232x128xf32>
    %c0_17 = arith.constant 0 : index
    %c16 = arith.constant 16 : index
    %c0_18 = arith.constant 0 : index
    %17 = vector.load %arg1[%c0_17, %c16, %c0_18] : memref<1x272x4xf32, #tpu.memory_space<vmem>>, vector<1x232x4xf32>
    %18 = vector.shape_cast %17 : vector<1x232x4xf32> to vector<232x4xf32>
    %c3 = arith.constant 3 : index
    %c0_19 = arith.constant 0 : index
    %c0_20 = arith.constant 0 : index
    %19 = vector.load %arg2[%c3, %c0_19, %c0_20] : memref<9x4x128xf32, #tpu.memory_space<vmem>>, vector<1x4x128xf32>
    %20 = vector.shape_cast %19 : vector<1x4x128xf32> to vector<4x128xf32>
    %cst_21 = arith.constant dense<0.000000e+00> : vector<232x128xf32>
    %21 = tpu.matmul %18, %20, %cst_21 {dimension_numbers = #tpu.dot_dimension_numbers<[1], [0], [0], [1], [0, 0, 1, 1], [], []>} : vector<232x4xf32>, vector<4x128xf32>, vector<232x128xf32> -> vector<232x128xf32>
    %22 = arith.addf %16, %21 : vector<232x128xf32>
    %c0_22 = arith.constant 0 : index
    %c17 = arith.constant 17 : index
    %c0_23 = arith.constant 0 : index
    %23 = vector.load %arg1[%c0_22, %c17, %c0_23] : memref<1x272x4xf32, #tpu.memory_space<vmem>>, vector<1x232x4xf32>
    %24 = vector.shape_cast %23 : vector<1x232x4xf32> to vector<232x4xf32>
    %c4 = arith.constant 4 : index
    %c0_24 = arith.constant 0 : index
    %c0_25 = arith.constant 0 : index
    %25 = vector.load %arg2[%c4, %c0_24, %c0_25] : memref<9x4x128xf32, #tpu.memory_space<vmem>>, vector<1x4x128xf32>
    %26 = vector.shape_cast %25 : vector<1x4x128xf32> to vector<4x128xf32>
    %cst_26 = arith.constant dense<0.000000e+00> : vector<232x128xf32>
    %27 = tpu.matmul %24, %26, %cst_26 {dimension_numbers = #tpu.dot_dimension_numbers<[1], [0], [0], [1], [0, 0, 1, 1], [], []>} : vector<232x4xf32>, vector<4x128xf32>, vector<232x128xf32> -> vector<232x128xf32>
    %28 = arith.addf %22, %27 : vector<232x128xf32>
    %c0_27 = arith.constant 0 : index
    %c18 = arith.constant 18 : index
    %c0_28 = arith.constant 0 : index
    %29 = vector.load %arg1[%c0_27, %c18, %c0_28] : memref<1x272x4xf32, #tpu.memory_space<vmem>>, vector<1x232x4xf32>
    %30 = vector.shape_cast %29 : vector<1x232x4xf32> to vector<232x4xf32>
    %c5 = arith.constant 5 : index
    %c0_29 = arith.constant 0 : index
    %c0_30 = arith.constant 0 : index
    %31 = vector.load %arg2[%c5, %c0_29, %c0_30] : memref<9x4x128xf32, #tpu.memory_space<vmem>>, vector<1x4x128xf32>
    %32 = vector.shape_cast %31 : vector<1x4x128xf32> to vector<4x128xf32>
    %cst_31 = arith.constant dense<0.000000e+00> : vector<232x128xf32>
    %33 = tpu.matmul %30, %32, %cst_31 {dimension_numbers = #tpu.dot_dimension_numbers<[1], [0], [0], [1], [0, 0, 1, 1], [], []>} : vector<232x4xf32>, vector<4x128xf32>, vector<232x128xf32> -> vector<232x128xf32>
    %34 = arith.addf %28, %33 : vector<232x128xf32>
    %c0_32 = arith.constant 0 : index
    %c32 = arith.constant 32 : index
    %c0_33 = arith.constant 0 : index
    %35 = vector.load %arg1[%c0_32, %c32, %c0_33] : memref<1x272x4xf32, #tpu.memory_space<vmem>>, vector<1x232x4xf32>
    %36 = vector.shape_cast %35 : vector<1x232x4xf32> to vector<232x4xf32>
    %c6 = arith.constant 6 : index
    %c0_34 = arith.constant 0 : index
    %c0_35 = arith.constant 0 : index
    %37 = vector.load %arg2[%c6, %c0_34, %c0_35] : memref<9x4x128xf32, #tpu.memory_space<vmem>>, vector<1x4x128xf32>
    %38 = vector.shape_cast %37 : vector<1x4x128xf32> to vector<4x128xf32>
    %cst_36 = arith.constant dense<0.000000e+00> : vector<232x128xf32>
    %39 = tpu.matmul %36, %38, %cst_36 {dimension_numbers = #tpu.dot_dimension_numbers<[1], [0], [0], [1], [0, 0, 1, 1], [], []>} : vector<232x4xf32>, vector<4x128xf32>, vector<232x128xf32> -> vector<232x128xf32>
    %40 = arith.addf %34, %39 : vector<232x128xf32>
    %c0_37 = arith.constant 0 : index
    %c33 = arith.constant 33 : index
    %c0_38 = arith.constant 0 : index
    %41 = vector.load %arg1[%c0_37, %c33, %c0_38] : memref<1x272x4xf32, #tpu.memory_space<vmem>>, vector<1x232x4xf32>
    %42 = vector.shape_cast %41 : vector<1x232x4xf32> to vector<232x4xf32>
    %c7 = arith.constant 7 : index
    %c0_39 = arith.constant 0 : index
    %c0_40 = arith.constant 0 : index
    %43 = vector.load %arg2[%c7, %c0_39, %c0_40] : memref<9x4x128xf32, #tpu.memory_space<vmem>>, vector<1x4x128xf32>
    %44 = vector.shape_cast %43 : vector<1x4x128xf32> to vector<4x128xf32>
    %cst_41 = arith.constant dense<0.000000e+00> : vector<232x128xf32>
    %45 = tpu.matmul %42, %44, %cst_41 {dimension_numbers = #tpu.dot_dimension_numbers<[1], [0], [0], [1], [0, 0, 1, 1], [], []>} : vector<232x4xf32>, vector<4x128xf32>, vector<232x128xf32> -> vector<232x128xf32>
    %46 = arith.addf %40, %45 : vector<232x128xf32>
    %c0_42 = arith.constant 0 : index
    %c34 = arith.constant 34 : index
    %c0_43 = arith.constant 0 : index
    %47 = vector.load %arg1[%c0_42, %c34, %c0_43] : memref<1x272x4xf32, #tpu.memory_space<vmem>>, vector<1x232x4xf32>
    %48 = vector.shape_cast %47 : vector<1x232x4xf32> to vector<232x4xf32>
    %c8 = arith.constant 8 : index
    %c0_44 = arith.constant 0 : index
    %c0_45 = arith.constant 0 : index
    %49 = vector.load %arg2[%c8, %c0_44, %c0_45] : memref<9x4x128xf32, #tpu.memory_space<vmem>>, vector<1x4x128xf32>
    %50 = vector.shape_cast %49 : vector<1x4x128xf32> to vector<4x128xf32>
    %cst_46 = arith.constant dense<0.000000e+00> : vector<232x128xf32>
    %51 = tpu.matmul %48, %50, %cst_46 {dimension_numbers = #tpu.dot_dimension_numbers<[1], [0], [0], [1], [0, 0, 1, 1], [], []>} : vector<232x4xf32>, vector<4x128xf32>, vector<232x128xf32> -> vector<232x128xf32>
    %52 = arith.addf %46, %51 : vector<232x128xf32>
    %c0_47 = arith.constant 0 : index
    %c0_48 = arith.constant 0 : index
    %53 = vector.load %arg3[%c0_47, %c0_48] : memref<1x128xf32, #tpu.memory_space<vmem>>, vector<1x128xf32>
    %54 = vector.shape_cast %53 : vector<1x128xf32> to vector<128xf32>
    %55 = vector.shape_cast %54 : vector<128xf32> to vector<1x128xf32>
    %56 = vector.broadcast %55 : vector<1x128xf32> to vector<232x128xf32>
    %57 = arith.addf %52, %56 : vector<232x128xf32>
    %cst_49 = arith.constant 0.000000e+00 : f32
    %58 = vector.broadcast %cst_49 : f32 to vector<232x128xf32>
    %59 = arith.maximumf %57, %58 : vector<232x128xf32>
    %c0_50 = arith.constant 0 : index
    %c0_51 = arith.constant 0 : index
    %60 = vector.load %arg9[%c0_50, %c0_51] : memref<232x128xf32, #tpu.memory_space<vmem>>, vector<232x128xf32>
    tpu.vector_store %arg9[%c0_50, %c0_51], %59 {strides = array<i32>} : memref<232x128xf32, #tpu.memory_space<vmem>>, vector<232x128xf32>,
    %c0_52 = arith.constant 0 : index
    %c0_53 = arith.constant 0 : index
    %61 = vector.load %arg9[%c0_52, %c0_53] : memref<232x128xf32, #tpu.memory_space<vmem>>, vector<192x128xf32>
    %c0_54 = arith.constant 0 : index
    %c0_55 = arith.constant 0 : index
    %c0_56 = arith.constant 0 : index
    %62 = vector.load %arg4[%c0_54, %c0_55, %c0_56] : memref<9x128x128xf32, #tpu.memory_space<vmem>>, vector<1x128x128xf32>
    %63 = vector.shape_cast %62 : vector<1x128x128xf32> to vector<128x128xf32>
    %cst_57 = arith.constant dense<0.000000e+00> : vector<192x128xf32>
    %64 = tpu.matmul %61, %63, %cst_57 {dimension_numbers = #tpu.dot_dimension_numbers<[1], [0], [0], [1], [0, 0, 1, 1], [], []>} : vector<192x128xf32>, vector<128x128xf32>, vector<192x128xf32> -> vector<192x128xf32>
    %c1_58 = arith.constant 1 : index
    %c0_59 = arith.constant 0 : index
    %65 = vector.load %arg9[%c1_58, %c0_59] : memref<232x128xf32, #tpu.memory_space<vmem>>, vector<192x128xf32>
    %c1_60 = arith.constant 1 : index
    %c0_61 = arith.constant 0 : index
    %c0_62 = arith.constant 0 : index
    %66 = vector.load %arg4[%c1_60, %c0_61, %c0_62] : memref<9x128x128xf32, #tpu.memory_space<vmem>>, vector<1x128x128xf32>
    %67 = vector.shape_cast %66 : vector<1x128x128xf32> to vector<128x128xf32>
    %cst_63 = arith.constant dense<0.000000e+00> : vector<192x128xf32>
    %68 = tpu.matmul %65, %67, %cst_63 {dimension_numbers = #tpu.dot_dimension_numbers<[1], [0], [0], [1], [0, 0, 1, 1], [], []>} : vector<192x128xf32>, vector<128x128xf32>, vector<192x128xf32> -> vector<192x128xf32>
    %69 = arith.addf %64, %68 : vector<192x128xf32>
    %c2_64 = arith.constant 2 : index
    %c0_65 = arith.constant 0 : index
    %70 = vector.load %arg9[%c2_64, %c0_65] : memref<232x128xf32, #tpu.memory_space<vmem>>, vector<192x128xf32>
    %c2_66 = arith.constant 2 : index
    %c0_67 = arith.constant 0 : index
    %c0_68 = arith.constant 0 : index
    %71 = vector.load %arg4[%c2_66, %c0_67, %c0_68] : memref<9x128x128xf32, #tpu.memory_space<vmem>>, vector<1x128x128xf32>
    %72 = vector.shape_cast %71 : vector<1x128x128xf32> to vector<128x128xf32>
    %cst_69 = arith.constant dense<0.000000e+00> : vector<192x128xf32>
    %73 = tpu.matmul %70, %72, %cst_69 {dimension_numbers = #tpu.dot_dimension_numbers<[1], [0], [0], [1], [0, 0, 1, 1], [], []>} : vector<192x128xf32>, vector<128x128xf32>, vector<192x128xf32> -> vector<192x128xf32>
    %74 = arith.addf %69, %73 : vector<192x128xf32>
    %c16_70 = arith.constant 16 : index
    %c0_71 = arith.constant 0 : index
    %75 = vector.load %arg9[%c16_70, %c0_71] : memref<232x128xf32, #tpu.memory_space<vmem>>, vector<192x128xf32>
    %c3_72 = arith.constant 3 : index
    %c0_73 = arith.constant 0 : index
    %c0_74 = arith.constant 0 : index
    %76 = vector.load %arg4[%c3_72, %c0_73, %c0_74] : memref<9x128x128xf32, #tpu.memory_space<vmem>>, vector<1x128x128xf32>
    %77 = vector.shape_cast %76 : vector<1x128x128xf32> to vector<128x128xf32>
    %cst_75 = arith.constant dense<0.000000e+00> : vector<192x128xf32>
    %78 = tpu.matmul %75, %77, %cst_75 {dimension_numbers = #tpu.dot_dimension_numbers<[1], [0], [0], [1], [0, 0, 1, 1], [], []>} : vector<192x128xf32>, vector<128x128xf32>, vector<192x128xf32> -> vector<192x128xf32>
    %79 = arith.addf %74, %78 : vector<192x128xf32>
    %c17_76 = arith.constant 17 : index
    %c0_77 = arith.constant 0 : index
    %80 = vector.load %arg9[%c17_76, %c0_77] : memref<232x128xf32, #tpu.memory_space<vmem>>, vector<192x128xf32>
    %c4_78 = arith.constant 4 : index
    %c0_79 = arith.constant 0 : index
    %c0_80 = arith.constant 0 : index
    %81 = vector.load %arg4[%c4_78, %c0_79, %c0_80] : memref<9x128x128xf32, #tpu.memory_space<vmem>>, vector<1x128x128xf32>
    %82 = vector.shape_cast %81 : vector<1x128x128xf32> to vector<128x128xf32>
    %cst_81 = arith.constant dense<0.000000e+00> : vector<192x128xf32>
    %83 = tpu.matmul %80, %82, %cst_81 {dimension_numbers = #tpu.dot_dimension_numbers<[1], [0], [0], [1], [0, 0, 1, 1], [], []>} : vector<192x128xf32>, vector<128x128xf32>, vector<192x128xf32> -> vector<192x128xf32>
    %84 = arith.addf %79, %83 : vector<192x128xf32>
    %c18_82 = arith.constant 18 : index
    %c0_83 = arith.constant 0 : index
    %85 = vector.load %arg9[%c18_82, %c0_83] : memref<232x128xf32, #tpu.memory_space<vmem>>, vector<192x128xf32>
    %c5_84 = arith.constant 5 : index
    %c0_85 = arith.constant 0 : index
    %c0_86 = arith.constant 0 : index
    %86 = vector.load %arg4[%c5_84, %c0_85, %c0_86] : memref<9x128x128xf32, #tpu.memory_space<vmem>>, vector<1x128x128xf32>
    %87 = vector.shape_cast %86 : vector<1x128x128xf32> to vector<128x128xf32>
    %cst_87 = arith.constant dense<0.000000e+00> : vector<192x128xf32>
    %88 = tpu.matmul %85, %87, %cst_87 {dimension_numbers = #tpu.dot_dimension_numbers<[1], [0], [0], [1], [0, 0, 1, 1], [], []>} : vector<192x128xf32>, vector<128x128xf32>, vector<192x128xf32> -> vector<192x128xf32>
    %89 = arith.addf %84, %88 : vector<192x128xf32>
    %c32_88 = arith.constant 32 : index
    %c0_89 = arith.constant 0 : index
    %90 = vector.load %arg9[%c32_88, %c0_89] : memref<232x128xf32, #tpu.memory_space<vmem>>, vector<192x128xf32>
    %c6_90 = arith.constant 6 : index
    %c0_91 = arith.constant 0 : index
    %c0_92 = arith.constant 0 : index
    %91 = vector.load %arg4[%c6_90, %c0_91, %c0_92] : memref<9x128x128xf32, #tpu.memory_space<vmem>>, vector<1x128x128xf32>
    %92 = vector.shape_cast %91 : vector<1x128x128xf32> to vector<128x128xf32>
    %cst_93 = arith.constant dense<0.000000e+00> : vector<192x128xf32>
    %93 = tpu.matmul %90, %92, %cst_93 {dimension_numbers = #tpu.dot_dimension_numbers<[1], [0], [0], [1], [0, 0, 1, 1], [], []>} : vector<192x128xf32>, vector<128x128xf32>, vector<192x128xf32> -> vector<192x128xf32>
    %94 = arith.addf %89, %93 : vector<192x128xf32>
    %c33_94 = arith.constant 33 : index
    %c0_95 = arith.constant 0 : index
    %95 = vector.load %arg9[%c33_94, %c0_95] : memref<232x128xf32, #tpu.memory_space<vmem>>, vector<192x128xf32>
    %c7_96 = arith.constant 7 : index
    %c0_97 = arith.constant 0 : index
    %c0_98 = arith.constant 0 : index
    %96 = vector.load %arg4[%c7_96, %c0_97, %c0_98] : memref<9x128x128xf32, #tpu.memory_space<vmem>>, vector<1x128x128xf32>
    %97 = vector.shape_cast %96 : vector<1x128x128xf32> to vector<128x128xf32>
    %cst_99 = arith.constant dense<0.000000e+00> : vector<192x128xf32>
    %98 = tpu.matmul %95, %97, %cst_99 {dimension_numbers = #tpu.dot_dimension_numbers<[1], [0], [0], [1], [0, 0, 1, 1], [], []>} : vector<192x128xf32>, vector<128x128xf32>, vector<192x128xf32> -> vector<192x128xf32>
    %99 = arith.addf %94, %98 : vector<192x128xf32>
    %c34_100 = arith.constant 34 : index
    %c0_101 = arith.constant 0 : index
    %100 = vector.load %arg9[%c34_100, %c0_101] : memref<232x128xf32, #tpu.memory_space<vmem>>, vector<192x128xf32>
    %c8_102 = arith.constant 8 : index
    %c0_103 = arith.constant 0 : index
    %c0_104 = arith.constant 0 : index
    %101 = vector.load %arg4[%c8_102, %c0_103, %c0_104] : memref<9x128x128xf32, #tpu.memory_space<vmem>>, vector<1x128x128xf32>
    %102 = vector.shape_cast %101 : vector<1x128x128xf32> to vector<128x128xf32>
    %cst_105 = arith.constant dense<0.000000e+00> : vector<192x128xf32>
    %103 = tpu.matmul %100, %102, %cst_105 {dimension_numbers = #tpu.dot_dimension_numbers<[1], [0], [0], [1], [0, 0, 1, 1], [], []>} : vector<192x128xf32>, vector<128x128xf32>, vector<192x128xf32> -> vector<192x128xf32>
    %104 = arith.addf %99, %103 : vector<192x128xf32>
    %c0_106 = arith.constant 0 : index
    %c0_107 = arith.constant 0 : index
    %105 = vector.load %arg5[%c0_106, %c0_107] : memref<1x128xf32, #tpu.memory_space<vmem>>, vector<1x128xf32>
    %106 = vector.shape_cast %105 : vector<1x128xf32> to vector<128xf32>
    %107 = vector.shape_cast %106 : vector<128xf32> to vector<1x128xf32>
    %108 = vector.broadcast %107 : vector<1x128xf32> to vector<192x128xf32>
    %109 = arith.addf %104, %108 : vector<192x128xf32>
    %110 = tpu.iota {dimensions = array<i32: 0>} : vector<192x1xi32>
    %c16_i32 = arith.constant 16 : i32
    %c0_i32 = arith.constant 0 : i32
    %111 = arith.cmpi eq, %c16_i32, %c0_i32 : i32
    %c1_i32 = arith.constant 1 : i32
    %112 = arith.select %111, %c1_i32, %c16_i32 : i32
    %113 = vector.broadcast %112 : i32 to vector<192x1xi32>
    %114 = arith.remsi %110, %113 : vector<192x1xi32>
    %c0_i32_108 = arith.constant 0 : i32
    %115 = vector.broadcast %c0_i32_108 : i32 to vector<192x1xi32>
    %116 = arith.cmpi ne, %114, %115 : vector<192x1xi32>
    %c0_i32_109 = arith.constant 0 : i32
    %117 = vector.broadcast %c0_i32_109 : i32 to vector<192x1xi32>
    %118 = arith.cmpi slt, %114, %117 : vector<192x1xi32>
    %c0_i32_110 = arith.constant 0 : i32
    %119 = arith.cmpi slt, %112, %c0_i32_110 : i32
    %120 = vector.broadcast %119 : i1 to vector<192x1xi1>
    %121 = vector.broadcast %120 : vector<192x1xi1> to vector<192x1xi1>
    %122 = arith.xori %118, %121 : vector<192x1xi1>
    %123 = arith.andi %122, %116 : vector<192x1xi1>
    %124 = vector.broadcast %112 : i32 to vector<192x1xi32>
    %125 = arith.addi %114, %124 : vector<192x1xi32>
    %126 = arith.select %123, %125, %114 : vector<192x1xi1>, vector<192x1xi32>
    %c12_i32 = arith.constant 12 : i32
    %127 = vector.broadcast %c12_i32 : i32 to vector<192x1xi32>
    %128 = arith.cmpi slt, %126, %127 : vector<192x1xi32>
    %cst_111 = arith.constant 0.000000e+00 : f32
    %129 = vector.shape_cast %128 : vector<192x1xi1> to vector<192x1xi1>
    %130 = vector.broadcast %129 : vector<192x1xi1> to vector<192x128xi1>
    %131 = vector.broadcast %cst_111 : f32 to vector<192x128xf32>
    %132 = arith.select %130, %109, %131 : vector<192x128xi1>, vector<192x128xf32>
    %c0_112 = arith.constant 0 : index
    %c0_113 = arith.constant 0 : index
    %c0_114 = arith.constant 0 : index
    %133 = vector.load %arg6[%c0_112, %c0_113, %c0_114] : memref<1x192x128xf32, #tpu.memory_space<vmem>>, vector<1x192x128xf32>
    %134 = vector.shape_cast %133 : vector<1x192x128xf32> to vector<192x128xf32>
    %135 = vector.shape_cast %132 : vector<192x128xf32> to vector<1x192x128xf32>
    tpu.vector_store %arg6[%c0_112, %c0_113, %c0_114], %135 {strides = array<i32>} : memref<1x192x128xf32, #tpu.memory_space<vmem>>, vector<1x192x128xf32>,
    %cst_115 = arith.constant dense<0.000000e+00> : vector<128xf32>
    %136 = vector.multi_reduction <add>, %132, %cst_115 [0] : vector<192x128xf32> to vector<128xf32>
    %137 = vector.shape_cast %136 : vector<128xf32> to vector<1x128xf32>
    %c0_116 = arith.constant 0 : index
    %c0_117 = arith.constant 0 : index
    %c0_118 = arith.constant 0 : index
    %138 = vector.load %arg7[%c0_116, %c0_117, %c0_118] : memref<1x1x128xf32, #tpu.memory_space<vmem>>, vector<1x1x128xf32>
    %139 = vector.shape_cast %138 : vector<1x1x128xf32> to vector<1x128xf32>
    %140 = vector.shape_cast %137 : vector<1x128xf32> to vector<1x1x128xf32>
    tpu.vector_store %arg7[%c0_116, %c0_117, %c0_118], %140 {strides = array<i32>} : memref<1x1x128xf32, #tpu.memory_space<vmem>>, vector<1x1x128xf32>,
    %141 = arith.mulf %132, %132 : vector<192x128xf32>
    %cst_119 = arith.constant dense<0.000000e+00> : vector<128xf32>
    %142 = vector.multi_reduction <add>, %141, %cst_119 [0] : vector<192x128xf32> to vector<128xf32>
    %143 = vector.shape_cast %142 : vector<128xf32> to vector<1x128xf32>
    %c0_120 = arith.constant 0 : index
    %c0_121 = arith.constant 0 : index
    %c0_122 = arith.constant 0 : index
    %144 = vector.load %arg8[%c0_120, %c0_121, %c0_122] : memref<1x1x128xf32, #tpu.memory_space<vmem>>, vector<1x1x128xf32>
    %145 = vector.shape_cast %144 : vector<1x1x128xf32> to vector<1x128xf32>
    %146 = vector.shape_cast %143 : vector<1x128xf32> to vector<1x1x128xf32>
    tpu.vector_store %arg8[%c0_120, %c0_121, %c0_122], %146 {strides = array<i32>} : memref<1x1x128xf32, #tpu.memory_space<vmem>>, vector<1x1x128xf32>,
    return
  }
  func.func @transform_0(%arg0: i32) -> (i32, i32, i32) {
    %c0_i32 = arith.constant 0 : i32
    %c0_i32_0 = arith.constant 0 : i32
    %c0_i32_1 = arith.constant 0 : i32
    return %arg0, %c0_i32, %c0_i32_0 : i32, i32, i32
  }
  func.func @transform_1(%arg0: i32) -> (i32, i32, i32) {
    %c0_i32 = arith.constant 0 : i32
    %c0_i32_0 = arith.constant 0 : i32
    %c0_i32_1 = arith.constant 0 : i32
    %c0_i32_2 = arith.constant 0 : i32
    return %c0_i32, %c0_i32_0, %c0_i32_1 : i32, i32, i32
  }
  func.func @transform_2(%arg0: i32) -> (i32, i32) {
    %c0_i32 = arith.constant 0 : i32
    %c0_i32_0 = arith.constant 0 : i32
    %c0_i32_1 = arith.constant 0 : i32
    return %c0_i32, %c0_i32_0 : i32, i32
  }
  func.func @transform_3(%arg0: i32) -> (i32, i32, i32) {
    %c0_i32 = arith.constant 0 : i32
    %c0_i32_0 = arith.constant 0 : i32
    %c0_i32_1 = arith.constant 0 : i32
    %c0_i32_2 = arith.constant 0 : i32
    return %c0_i32, %c0_i32_0, %c0_i32_1 : i32, i32, i32
  }
  func.func @transform_4(%arg0: i32) -> (i32, i32) {
    %c0_i32 = arith.constant 0 : i32
    %c0_i32_0 = arith.constant 0 : i32
    %c0_i32_1 = arith.constant 0 : i32
    return %c0_i32, %c0_i32_0 : i32, i32
  }
  func.func @transform_5(%arg0: i32) -> (i32, i32, i32) {
    %c0_i32 = arith.constant 0 : i32
    %c0_i32_0 = arith.constant 0 : i32
    %c0_i32_1 = arith.constant 0 : i32
    return %arg0, %c0_i32, %c0_i32_0 : i32, i32, i32
  }
  func.func @transform_6(%arg0: i32) -> (i32, i32, i32) {
    %c0_i32 = arith.constant 0 : i32
    %c0_i32_0 = arith.constant 0 : i32
    %c0_i32_1 = arith.constant 0 : i32
    return %arg0, %c0_i32, %c0_i32_0 : i32, i32, i32
  }
  func.func @transform_7(%arg0: i32) -> (i32, i32, i32) {
    %c0_i32 = arith.constant 0 : i32
    %c0_i32_0 = arith.constant 0 : i32
    %c0_i32_1 = arith.constant 0 : i32
    return %arg0, %c0_i32, %c0_i32_0 : i32, i32, i32
  }
}

</mosaic_0001>

<bundles_post_ra>
// kernel: tpu_custom_call.1
= control target key start
LH: loop header
LB: loop body
LE: loop exit
PB: predicated region body
PF: predicated region fallthrough
CT: control target
= control target key end

     0   :  { %13 = vsyncpa [#allocation4], 0  ;;  %s12263_s0 = inlined_call_operand.vmem [shape: f32[2,272,4], index: 0, kind: input, shape index: {}]   ;;  %s12264_s1 = inlined_call_operand.vmem [shape: f32[9,4,128], index: 1, kind: input, shape index: {}]   ;;  %s12265_s2 = inlined_call_operand.vmem [shape: f32[1,128], index: 2, kind: input, shape index: {}]   ;;  %s12266_s3 = inlined_call_operand.hbm [shape: f32[9,128,128], index: 3, kind: input, shape index: {}]   ;;  %s12267_s4 = inlined_call_operand.vmem [shape: f32[1,128], index: 4, kind: input, shape index: {}]   ;;  %s12268_s5 = inlined_call_operand.hbm [shape: f32[2,192,128], index: 5, kind: output, shape index: {0}]   ;;  %s12269_s6 = inlined_call_operand.hbm [shape: f32[2,1,128], index: 6, kind: output, shape index: {1}]   ;;  %s12270_s7 = inlined_call_operand.hbm [shape: f32[2,1,128], index: 7, kind: output, shape index: {2}]  }
   0x1   :  { %14 = vsyncpa [#allocation5], 0 }
   0x2   :  { %16 = vsyncpa [#allocation5 + $0x1], 0 }
   0x3   :  { %17 = vsyncpa [#allocation8], 0 }
   0x4   :  { %19 = vsyncpa [#allocation8 + $0x1], 0  ;;  %s9113_s24 = smov 0   ;;  %s9115_s25 = smov 0  }
   0x5   :  { %s9117_s26 = smov 0   ;;  %s9119_s27 = smov 0  }
   0x6 LB: > { %s9134_s28 = sadd.s32 4294967295, %s9061_s27   ;;  %s12271_s29 = sadd.s32 4294967294, %s9061_s27   ;;  %s9061_s27 = sphi %s9119_s27, %s12398_s27   ;;  %s9057_s26 = sphi %s9117_s26, %s12397_s26   ;;  %s9053_s25 = sphi %s9115_s25, %s12396_s25   ;;  %s9049_s24 = sphi %s9113_s24, %s12395_s24  }
   0x7   : > { %s9138_s30 = sadd.s32 1, %s9061_s27   ;;  %s142_s8 = sadd.s32 1, %s9057_s26 }
   0x8   : > { %s139_s9 = ssub.s32 %s9061_s27, %s9138_s30  ;;  %p152_p0 = scmp.ne.s32.totalorder %s9057_s26, %s9053_s25 }
   0x9   : > { %p140_p1 = scmp.eq.s32.totalorder %s139_s9, 0  ;;  %p153_p2 = scmp.eq.s32.totalorder %s9134_s28, 1 }
   0xa   : > { %p158_p3 = scmp.ne.s32.totalorder %s9053_s25, %s9049_s24  ;;  %p159_p4 = scmp.eq.s32.totalorder %s12271_s29, 1 }
   0xb   : > { %s9151_s10 = scalar_select %p140_p1, %s9057_s26, %s142_s8  }
   0xc   : > { %p9153_p5 = por %p153_p2, %p152_p0  ;;  %p9157_p6 = por %p159_p4, %p158_p3 }
   0xd   : > { %p6510_p7 = scmp.ge.s32.totalorder %s9061_s27, 1  ;;  %p218_p8 = scmp.lt.s32.totalorder %s9061_s27, 3 }
   0xe   : > { %s12274_s12 = scalar_select %p9157_p6, 1, 0 }
   0xf   : > { %p8873_p9 = scmp.eq.s32.totalorder %s9134_s28, 0  ;;  %p9164_p10 = pnand %p6510_p7, %p218_p8 }
  0x10   : > { %s9063_s14 = smov [#allocation3]  }
  0x11   : > { %s236_s15 = sshll.u32 %s9063_s14, 4  ;;  %p8859_p11 = pneg %p9164_p10  ;;  %s237_s15 = int_to_ptr.vmem [resolvable:$true] %s236_s15 }
  0x12   : > { %s8926_s16 = scalar_lea.vmem %s237_s15, 18432  ;;  %p8934_p3 = scmp.lt.s32.totalorder %s237_s15, %s237_s15 }
  0x13   : > { %p8860_p12 = pnand %p8873_p9, %p8859_p11  ;;  %p8927_p0 = scmp.ne.s32.totalorder %s237_s15, %s8926_s16 }
  0x14   : > { %p8935_p4 = scmp.lt.s32.totalorder %s8926_s16, %s8926_s16 }
  0x15   : > { %p8917_p13 = pneg %p8860_p12 }
  0x16   : > { %p8936_p6 = por %p8935_p4, %p8934_p3 }
  0x17   : > { %p8929_p1 = pnand %p8927_p0, %p8917_p13 }
  0x19   : > { %p8930_p2 = pneg %p8929_p1 }
  0x1b   : > { %p8937_p7 = pnand %p8936_p6, %p8930_p2 }
  0x1d   : > { %8940 = shalt.err (!%p8937_p7)
}
  0x1e   : > { %s9064_s17 = smov 128   ;;  %s9065_s18 = smov 8  }
  0x1f   : > { %8862 = dma.hbm_to_vmem [thread:$0]  (!%p8860_p12), %s12266_s3, 18432, %s237_s15, [#allocation4], %s9064_s17, %s9064_s17, %s9065_s18  }
  0x20   : > { %263 = sbr.rel (%p9164_p10) target bundleno = 1331 (0x533), region = 40 }
  0x25   : > { %9036 = dma.done.wait (%p8873_p9), [#allocation4], 18432  }
  0x26   : > { %9038 = vsyncadd (%p8873_p9), [#allocation4], 4294948864  ;;  %p303_p8 = scmp.lt.s32.totalorder %s9134_s28, 1  ;;  %v9066_v0 = vmov 0.0   ;;  %vm9067_vm0 = vmmov 0   ;;  %vm457_vm1 = vcmask 1043456  }
  0x27   : > { %7431 = vmatprep.subr.mxu0 %v9066_v0  ;;  %7433 = vmatprep.mubr.msk.f32.mxu0 %vm9067_vm0, %v9066_v0  ;;  %vm369_vm2 = vcmask 31744   ;;  %v6516_v1 = vld [vmem:[%s12264_s1 + $0x4] sm:$0xf]  ;;  %v337_v3 = vld [vmem:[%s12264_s1] sm:$0xf]  ;;  %s11864_s20 = sand.u32 1, %s9053_s25  }
  0x28   : > { %s304_s21 = scalar_select %p303_p8, %s9134_s28, 1  ;;  %8844 = vmatprep.subr.mxu1 %v9066_v0  ;;  %7531 = vmatprep.mubr.msk.f32.mxu1 %vm9067_vm0, %v9066_v0  ;;  %v6608_v14 = vld [vmem:[%s12264_s1 + $0xc] sm:$0xf]  ;;  %v6577_v61 = vld [vmem:[%s12264_s1 + $0x8] sm:$0xf] }
  0x29   : > { %7432 = vmatpush3.msk.msra.mxu0 %vm457_vm1, %v6516_v1  ;;  %8845 = vmatpush3.msk.msra.mxu1 %vm457_vm1, %v337_v3  ;;  %v6670_v62 = vld [vmem:[%s12264_s1 + $0x14] sm:$0xf]  ;;  %s8848_s13 = smul.u32 3072, %s9134_s28  ;;  %s6335_s18 = scalar_lea.sflag [#allocation5], %s11864_s20 }
  0x2a   : > { %s8847_s22 = smul.u32 272, %s304_s21  ;;  %7520 = vmatprep.subr.mxu0 %v9066_v0  ;;  %7698 = vmatprep.subr.mxu1 %v9066_v0  ;;  %s9068_s19 = smov [#allocation6]  }
  0x2b   : > { %s8846_s21 = smul.u32 192, %s11864_s20  ;;  %s12148_s17 = scalar_lea.hbm %s12268_s5, %s8848_s13 }
  0x2c   : > { %s9192_s9 = scalar_lea.vmem %s12263_s0, %s8847_s22 }
  0x2d   : > { %v338_v2 = vld [vmem:[%s9192_s9 + $0x1] sm:$0xff]  ;;  %v9206_v4 = vld [vmem:[%s9192_s9 + $0x18] sm:$0xff]  ;;  %v339_v5 = vld [vmem:[%s9192_s9 + $0x9] sm:$0xff]  ;;  %s11949_s8 = scalar_lea.vmem [#allocation6], %s8846_s21  ;;  %s8945_s21 = sshll.u32 %s9068_s19, 4  ;;  %s8946_s21 = int_to_ptr.vmem [resolvable:$false] %s8945_s21 }
  0x2e   : > { %7434 = vmatmul.mubr.msk.f32.vlgmr.msra.gmra.mxu0 %vm369_vm2, %v338_v2  ;;  %7532 = vmatmul.mubr.msk.f32.vlgmr.msra.gmra.mxu1 %vm369_vm2, %v9206_v4  ;;  %v9218_v6 = vld [vmem:[%s9192_s9 + $0x20] sm:$0xff]  ;;  %v9225_v7 = vld [vmem:[%s9192_s9 + $0x11] sm:$0xff]  ;;  %v9232_v8 = vld [vmem:[%s9192_s9 + $0x28] sm:$0xff]  ;;  %s6356_s14 = sshll.u32 %s11949_s8, 4  ;;  %s8947_s22 = scalar_lea.vmem %s8946_s21, 6144  ;;  %s12151_s14 = int_to_ptr.vmem [resolvable:$true] %s6356_s14 }
  0x2f   : > { %7521 = vmatpush3.msk.msra.mxu0 %vm457_vm1, %v337_v3  ;;  %7436 = vmatprep.mubr.msk.f32.mxu0 %vm9067_vm0, %v9066_v0  ;;  %v9239_v9 = vld [vmem:[%s9192_s9 + $0x19] sm:$0xff]  ;;  %v9246_v10 = vld [vmem:[%s9192_s9 + $0x30] sm:$0xff]  ;;  %v9253_v11 = vld [vmem:[%s9192_s9 + $0x21] sm:$0xff]  ;;  %p8948_p11 = scmp.lt.s32.totalorder %s12151_s14, %s8946_s21 }
  0x30   : > { %7609 = vmatprep.subr.mxu0 %v9066_v0  ;;  %7534 = vmatprep.mubr.msk.f32.mxu1 %vm9067_vm0, %v9066_v0  ;;  %v9260_v12 = vld [vmem:[%s9192_s9 + $0x38] sm:$0xff]  ;;  %v9267_v13 = vld [vmem:[%s9192_s9 + $0x29] sm:$0xff]  ;;  %v9277_v15 = vld [vmem:[%s9192_s9 + $0x40] sm:$0xff] }
  0x31   : > { %7699 = vmatpush3.msk.msra.mxu1 %vm457_vm1, %v6608_v14  ;;  %v9286_v16 = vld [vmem:[%s9192_s9 + $0x31] sm:$0xff]  ;;  %v9293_v17 = vld [vmem:[%s9192_s9 + $0x48] sm:$0xff]  ;;  %v9300_v18 = vld [vmem:[%s9192_s9 + $0x39] sm:$0xff] }
  0x32   : > { %7437 = vmatmul.mubr.msk.f32.gmra.mxu0 %vm369_vm2, %v339_v5  ;;  %7535 = vmatmul.mubr.msk.f32.gmra.mxu1 %vm369_vm2, %v9218_v6  ;;  %v9307_v19 = vld [vmem:[%s9192_s9 + $0x50] sm:$0xff]  ;;  %v9314_v20 = vld [vmem:[%s9192_s9 + $0x41] sm:$0xff]  ;;  %v9321_v21 = vld [vmem:[%s9192_s9 + $0x58] sm:$0xff] }
  0x33   : > { %7439 = vmatprep.mubr.msk.f32.mxu0 %vm9067_vm0, %v9066_v0  ;;  %7537 = vmatprep.mubr.msk.f32.mxu1 %vm9067_vm0, %v9066_v0  ;;  %v9328_v22 = vld [vmem:[%s9192_s9 + $0x49] sm:$0xff]  ;;  %v9335_v23 = vld [vmem:[%s9192_s9 + $0x60] sm:$0xff]  ;;  %v9342_v24 = vld [vmem:[%s9192_s9 + $0x51] sm:$0xff] }
  0x34   : > { %7876 = vmatprep.subr.mxu1 %v9066_v0  ;;  %v9349_v25 = vld [vmem:[%s9192_s9 + $0x68] sm:$0xff]  ;;  %v9356_v26 = vld [vmem:[%s9192_s9 + $0x59] sm:$0xff]  ;;  %v9363_v27 = vld [vmem:[%s9192_s9 + $0x70] sm:$0xff] }
  0x35   : > { %v9370_v28 = vld [vmem:[%s9192_s9 + $0x61] sm:$0xff]  ;;  %v9377_v29 = vld [vmem:[%s9192_s9 + $0x78] sm:$0xff]  ;;  %v9384_v30 = vld [vmem:[%s9192_s9 + $0x69] sm:$0xff] }
  0x36   : > { %7440 = vmatmul.mubr.msk.f32.gmra.mxu0 %vm369_vm2, %v9225_v7  ;;  %7538 = vmatmul.mubr.msk.f32.gmra.mxu1 %vm369_vm2, %v9232_v8  ;;  %v9391_v31 = vld [vmem:[%s9192_s9 + $0x80] sm:$0xff]  ;;  %v9398_v32 = vld [vmem:[%s9192_s9 + $0x71] sm:$0xff]  ;;  %v9405_v33 = vld [vmem:[%s9192_s9 + $0x88] sm:$0xff] }
  0x37   : > { %7442 = vmatprep.mubr.msk.f32.mxu0 %vm9067_vm0, %v9066_v0  ;;  %7540 = vmatprep.mubr.msk.f32.mxu1 %vm9067_vm0, %v9066_v0  ;;  %v9412_v34 = vld [vmem:[%s9192_s9 + $0x79] sm:$0xff]  ;;  %v9419_v35 = vld [vmem:[%s9192_s9 + $0x90] sm:$0xff]  ;;  %v9426_v36 = vld [vmem:[%s9192_s9 + $0x81] sm:$0xff] }
  0x38   : > { %v9433_v37 = vld [vmem:[%s9192_s9 + $0x98] sm:$0xff]  ;;  %v9440_v38 = vld [vmem:[%s9192_s9 + $0x89] sm:$0xff]  ;;  %v9447_v39 = vld [vmem:[%s9192_s9 + $0xa0] sm:$0xff] }
  0x39   : > { %v9454_v40 = vld [vmem:[%s9192_s9 + $0x91] sm:$0xff]  ;;  %v9461_v41 = vld [vmem:[%s9192_s9 + $0xa8] sm:$0xff]  ;;  %v9468_v42 = vld [vmem:[%s9192_s9 + $0x99] sm:$0xff] }
  0x3a   : > { %7443 = vmatmul.mubr.msk.f32.gmra.mxu0 %vm369_vm2, %v9239_v9  ;;  %7541 = vmatmul.mubr.msk.f32.gmra.mxu1 %vm369_vm2, %v9246_v10  ;;  %v9475_v43 = vld [vmem:[%s9192_s9 + $0xb0] sm:$0xff]  ;;  %v9482_v44 = vld [vmem:[%s9192_s9 + $0xa1] sm:$0xff]  ;;  %v9489_v45 = vld [vmem:[%s9192_s9 + $0xb8] sm:$0xff] }
  0x3b   : > { %7445 = vmatprep.mubr.msk.f32.mxu0 %vm9067_vm0, %v9066_v0  ;;  %7543 = vmatprep.mubr.msk.f32.mxu1 %vm9067_vm0, %v9066_v0  ;;  %v9496_v46 = vld [vmem:[%s9192_s9 + $0xa9] sm:$0xff]  ;;  %v9503_v47 = vld [vmem:[%s9192_s9 + $0xc0] sm:$0xff]  ;;  %v360_v48 = vld [vmem:[%s9192_s9 + $0xb1] sm:$0xff] }
  0x3c   : > { %v9515_v49 = vld [vmem:[%s9192_s9 + $0xc8] sm:$0xff]  ;;  %v361_v50 = vld [vmem:[%s9192_s9 + $0xb9] sm:$0xff]  ;;  %v9526_v51 = vld [vmem:[%s9192_s9 + $0xd0] sm:$0xff] }
  0x3d   : > { %v362_v52 = vld [vmem:[%s9192_s9 + $0xc1] sm:$0xff]  ;;  %v9537_v53 = vld [vmem:[%s9192_s9 + $0xd8] sm:$0xff]  ;;  %v363_v54 = vld [vmem:[%s9192_s9 + $0xc9] sm:$0xff] }
  0x3e   : > { %7446 = vmatmul.mubr.msk.f32.gmra.mxu0 %vm369_vm2, %v9253_v11  ;;  %7544 = vmatmul.mubr.msk.f32.gmra.mxu1 %vm369_vm2, %v9260_v12  ;;  %v9548_v55 = vld [vmem:[%s9192_s9 + $0xe0] sm:$0xff]  ;;  %v364_v56 = vld [vmem:[%s9192_s9 + $0xd1] sm:$0xff]  ;;  %v309_v63 = vld [vmem:[%s9192_s9 + $0x8] sm:$0xff] }
  0x3f   : > { %7448 = vmatprep.mubr.msk.f32.mxu0 %vm9067_vm0, %v9066_v0  ;;  %7546 = vmatprep.mubr.msk.f32.mxu1 %vm9067_vm0, %v9066_v0  ;;  %v365_v57 = vld [vmem:[%s9192_s9 + $0xd9] sm:$0xff]  ;;  %v310_v58 = vld [vmem:[%s9192_s9 + $0x10] sm:$0xff]  ;;  %v366_v59 = vld [vmem:[%s9192_s9 + $0xe1] sm:$0xff] }
  0x40   : > { %v308_v60 = vld [vmem:[%s9192_s9] sm:$0xff]  ;;  %v6639_v2 = vld [vmem:[%s12264_s1 + $0x10] sm:$0xf] }
  0x41   : > { %v971_v1 = vld [vmem:[%s9192_s9 + $0x2] sm:$0xff]  ;;  %v972_v3 = vld [vmem:[%s9192_s9 + $0xa] sm:$0xff]  ;;  %v9643_v5 = vld [vmem:[%s9192_s9 + $0x1a] sm:$0xff] }
  0x42   : > { %7449 = vmatmul.mubr.msk.f32.gmra.mxu0 %vm369_vm2, %v9267_v13  ;;  %7547 = vmatmul.mubr.msk.f32.gmra.mxu1 %vm369_vm2, %v9277_v15  ;;  %v9698_v14 = vld [vmem:[%s9192_s9 + $0x42] sm:$0xff] }
  0x43   : > { %7451 = vmatprep.mubr.msk.f32.mxu0 %vm9067_vm0, %v9066_v0  ;;  %7549 = vmatprep.mubr.msk.f32.mxu1 %vm9067_vm0, %v9066_v0 }
  0x46   : > { %7452 = vmatmul.mubr.msk.f32.gmra.mxu0 %vm369_vm2, %v9286_v16  ;;  %7550 = vmatmul.mubr.msk.f32.gmra.mxu1 %vm369_vm2, %v9293_v17 }
  0x47   : > { %7454 = vmatprep.mubr.msk.f32.mxu0 %vm9067_vm0, %v9066_v0  ;;  %7552 = vmatprep.mubr.msk.f32.mxu1 %vm9067_vm0, %v9066_v0 }
  0x4a   : > { %7455 = vmatmul.mubr.msk.f32.gmra.mxu0 %vm369_vm2, %v9300_v18  ;;  %7553 = vmatmul.mubr.msk.f32.gmra.mxu1 %vm369_vm2, %v9307_v19 }
  0x4b   : > { %7457 = vmatprep.mubr.msk.f32.mxu0 %vm9067_vm0, %v9066_v0  ;;  %7555 = vmatprep.mubr.msk.f32.mxu1 %vm9067_vm0, %v9066_v0 }
  0x4e   : > { %7458 = vmatmul.mubr.msk.f32.gmra.mxu0 %vm369_vm2, %v9314_v20  ;;  %7556 = vmatmul.mubr.msk.f32.gmra.mxu1 %vm369_vm2, %v9321_v21 }
  0x4f   : > { %7460 = vmatprep.mubr.msk.f32.mxu0 %vm9067_vm0, %v9066_v0  ;;  %7558 = vmatprep.mubr.msk.f32.mxu1 %vm9067_vm0, %v9066_v0 }
  0x52   : > { %7461 = vmatmul.mubr.msk.f32.gmra.mxu0 %vm369_vm2, %v9328_v22  ;;  %7559 = vmatmul.mubr.msk.f32.gmra.mxu1 %vm369_vm2, %v9335_v23 }
  0x53   : > { %7463 = vmatprep.mubr.msk.f32.mxu0 %vm9067_vm0, %v9066_v0  ;;  %7561 = vmatprep.mubr.msk.f32.mxu1 %vm9067_vm0, %v9066_v0 }
  0x56   : > { %7464 = vmatmul.mubr.msk.f32.gmra.mxu0 %vm369_vm2, %v9342_v24  ;;  %7562 = vmatmul.mubr.msk.f32.gmra.mxu1 %vm369_vm2, %v9349_v25 }
  0x57   : > { %7466 = vmatprep.mubr.msk.f32.mxu0 %vm9067_vm0, %v9066_v0  ;;  %7564 = vmatprep.mubr.msk.f32.mxu1 %vm9067_vm0, %v9066_v0 }
  0x5a   : > { %7467 = vmatmul.mubr.msk.f32.gmra.mxu0 %vm369_vm2, %v9356_v26  ;;  %7565 = vmatmul.mubr.msk.f32.gmra.mxu1 %vm369_vm2, %v9363_v27 }
  0x5b   : > { %7469 = vmatprep.mubr.msk.f32.mxu0 %vm9067_vm0, %v9066_v0  ;;  %7567 = vmatprep.mubr.msk.f32.mxu1 %vm9067_vm0, %v9066_v0 }
  0x5e   : > { %7470 = vmatmul.mubr.msk.f32.gmra.mxu0 %vm369_vm2, %v9370_v28  ;;  %7568 = vmatmul.mubr.msk.f32.gmra.mxu1 %vm369_vm2, %v9377_v29 }
  0x5f   : > { %7472 = vmatprep.mubr.msk.f32.mxu0 %vm9067_vm0, %v9066_v0  ;;  %7570 = vmatprep.mubr.msk.f32.mxu1 %vm9067_vm0, %v9066_v0 }
  0x62   : > { %7473 = vmatmul.mubr.msk.f32.gmra.mxu0 %vm369_vm2, %v9384_v30  ;;  %7571 = vmatmul.mubr.msk.f32.gmra.mxu1 %vm369_vm2, %v9391_v31 }
  0x63   : > { %7475 = vmatprep.mubr.msk.f32.mxu0 %vm9067_vm0, %v9066_v0  ;;  %7573 = vmatprep.mubr.msk.f32.mxu1 %vm9067_vm0, %v9066_v0 }
  0x66   : > { %7476 = vmatmul.mubr.msk.f32.gmra.mxu0 %vm369_vm2, %v9398_v32  ;;  %7574 = vmatmul.mubr.msk.f32.gmra.mxu1 %vm369_vm2, %v9405_v33 }
  0x67   : > { %7478 = vmatprep.mubr.msk.f32.mxu0 %vm9067_vm0, %v9066_v0  ;;  %7576 = vmatprep.mubr.msk.f32.mxu1 %vm9067_vm0, %v9066_v0 }
  0x6a   : > { %7479 = vmatmul.mubr.msk.f32.gmra.mxu0 %vm369_vm2, %v9412_v34  ;;  %7577 = vmatmul.mubr.msk.f32.gmra.mxu1 %vm369_vm2, %v9419_v35 }
  0x6b   : > { %7481 = vmatprep.mubr.msk.f32.mxu0 %vm9067_vm0, %v9066_v0  ;;  %7579 = vmatprep.mubr.msk.f32.mxu1 %vm9067_vm0, %v9066_v0 }
  0x6e   : > { %7482 = vmatmul.mubr.msk.f32.gmra.mxu0 %vm369_vm2, %v9426_v36  ;;  %7580 = vmatmul.mubr.msk.f32.gmra.mxu1 %vm369_vm2, %v9433_v37 }
  0x6f   : > { %7484 = vmatprep.mubr.msk.f32.mxu0 %vm9067_vm0, %v9066_v0  ;;  %7582 = vmatprep.mubr.msk.f32.mxu1 %vm9067_vm0, %v9066_v0 }
  0x72   : > { %7485 = vmatmul.mubr.msk.f32.gmra.mxu0 %vm369_vm2, %v9440_v38  ;;  %7583 = vmatmul.mubr.msk.f32.gmra.mxu1 %vm369_vm2, %v9447_v39 }
  0x73   : > { %7487 = vmatprep.mubr.msk.f32.mxu0 %vm9067_vm0, %v9066_v0  ;;  %7585 = vmatprep.mubr.msk.f32.mxu1 %vm9067_vm0, %v9066_v0 }
  0x76   : > { %7488 = vmatmul.mubr.msk.f32.gmra.mxu0 %vm369_vm2, %v9454_v40  ;;  %7586 = vmatmul.mubr.msk.f32.gmra.mxu1 %vm369_vm2, %v9461_v41 }
  0x77   : > { %7490 = vmatprep.mubr.msk.f32.mxu0 %vm9067_vm0, %v9066_v0  ;;  %7588 = vmatprep.mubr.msk.f32.mxu1 %vm9067_vm0, %v9066_v0 }
  0x7a   : > { %7491 = vmatmul.mubr.msk.f32.gmra.mxu0 %vm369_vm2, %v9468_v42  ;;  %7589 = vmatmul.mubr.msk.f32.gmra.mxu1 %vm369_vm2, %v9475_v43 }
  0x7b   : > { %7493 = vmatprep.mubr.msk.f32.mxu0 %vm9067_vm0, %v9066_v0  ;;  %7591 = vmatprep.mubr.msk.f32.mxu1 %vm9067_vm0, %v9066_v0 }
  0x7e   : > { %7494 = vmatmul.mubr.msk.f32.gmra.mxu0 %vm369_vm2, %v9482_v44  ;;  %7592 = vmatmul.mubr.msk.f32.gmra.mxu1 %vm369_vm2, %v9489_v45 }
  0x7f   : > { %7496 = vmatprep.mubr.msk.f32.mxu0 %vm9067_vm0, %v9066_v0  ;;  %7594 = vmatprep.mubr.msk.f32.mxu1 %vm9067_vm0, %v9066_v0 }
  0x82   : > { %7497 = vmatmul.mubr.msk.f32.gmra.mxu0 %vm369_vm2, %v9496_v46  ;;  %7595 = vmatmul.mubr.msk.f32.gmra.mxu1 %vm369_vm2, %v9503_v47 }
  0x83   : > { %7499 = vmatprep.mubr.msk.f32.mxu0 %vm9067_vm0, %v9066_v0  ;;  %7597 = vmatprep.mubr.msk.f32.mxu1 %vm9067_vm0, %v9066_v0 }
  0x86   : > { %7500 = vmatmul.mubr.msk.f32.gmra.mxu0 %vm369_vm2, %v360_v48  ;;  %7598 = vmatmul.mubr.msk.f32.gmra.mxu1 %vm369_vm2, %v9515_v49 }
  0x87   : > { %7502 = vmatprep.mubr.msk.f32.mxu0 %vm9067_vm0, %v9066_v0  ;;  %7600 = vmatprep.mubr.msk.f32.mxu1 %vm9067_vm0, %v9066_v0 }
  0x8a   : > { %7503 = vmatmul.mubr.msk.f32.gmra.mxu0 %vm369_vm2, %v361_v50  ;;  %7601 = vmatmul.mubr.msk.f32.gmra.mxu1 %vm369_vm2, %v9526_v51 }
  0x8b   : > { %7505 = vmatprep.mubr.msk.f32.mxu0 %vm9067_vm0, %v9066_v0  ;;  %7603 = vmatprep.mubr.msk.f32.mxu1 %vm9067_vm0, %v9066_v0 }
  0x8e   : > { %7506 = vmatmul.mubr.msk.f32.gmra.mxu0 %vm369_vm2, %v362_v52  ;;  %7604 = vmatmul.mubr.msk.f32.gmra.mxu1 %vm369_vm2, %v9537_v53  ;;  %v9825_v52 = vld [vmem:[%s9192_s9 + $0x9a] sm:$0xff] }
  0x8f   : > { %7508 = vmatprep.mubr.msk.f32.mxu0 %vm9067_vm0, %v9066_v0  ;;  %7606 = vmatprep.mubr.msk.f32.mxu1 %vm9067_vm0, %v9066_v0 }
  0x92   : > { %7509 = vmatmul.mubr.msk.f32.gmra.mxu0 %vm369_vm2, %v363_v54  ;;  %7607 = vmatmul.mubr.msk.f32.gmra.mxu1 %vm369_vm2, %v9548_v55 }
  0x93   : > { %7511 = vmatprep.mubr.msk.f32.mxu0 %vm9067_vm0, %v9066_v0  ;;  %7700 = vmatprep.mubr.msk.f32.mxu1 %vm9067_vm0, %v9066_v0 }
  0x96   : > { %7512 = vmatmul.mubr.msk.f32.gmra.mxu0 %vm369_vm2, %v364_v56  ;;  %7701 = vmatmul.mubr.msk.f32.vlgmr.msra.gmra.mxu1 %vm369_vm2, %v310_v58 }
  0x97   : > { %7514 = vmatprep.mubr.msk.f32.mxu0 %vm9067_vm0, %v9066_v0  ;;  %7703 = vmatprep.mubr.msk.f32.mxu1 %vm9067_vm0, %v9066_v0 }
  0x98   : > { %7877 = vmatpush3.msk.msra.mxu1 %vm457_vm1, %v6670_v62 }
  0x99   : > { %8054 = vmatprep.subr.mxu1 %v9066_v0 }
  0x9a   : > { %7515 = vmatmul.mubr.msk.f32.gmra.mxu0 %vm369_vm2, %v365_v57  ;;  %7704 = vmatmul.mubr.msk.f32.gmra.mxu1 %vm369_vm2, %v9206_v4  ;;  %v9632_v4 = vld [vmem:[%s9192_s9 + $0x12] sm:$0xff] }
  0x9b   : > { %7517 = vmatprep.mubr.msk.f32.mxu0 %vm9067_vm0, %v9066_v0  ;;  %7706 = vmatprep.mubr.msk.f32.mxu1 %vm9067_vm0, %v9066_v0 }
  0x9e   : > { %7518 = vmatmul.mubr.msk.f32.gmra.mxu0 %vm369_vm2, %v366_v59  ;;  %7707 = vmatmul.mubr.msk.f32.gmra.mxu1 %vm369_vm2, %v9218_v6  ;;  %v9654_v6 = vld [vmem:[%s9192_s9 + $0x22] sm:$0xff] }
  0x9f   : > { %7522 = vmatprep.mubr.msk.f32.mxu0 %vm9067_vm0, %v9066_v0  ;;  %7709 = vmatprep.mubr.msk.f32.mxu1 %vm9067_vm0, %v9066_v0  ;;  %v9838_v59 = vld [vmem:[%s9192_s9 + $0xa2] sm:$0xff] }
  0xa2   : > { %7523 = vmatmul.mubr.msk.f32.vlgmr.msra.gmra.mxu0 %vm369_vm2, %v308_v60  ;;  %7710 = vmatmul.mubr.msk.f32.gmra.mxu1 %vm369_vm2, %v9232_v8  ;;  %v9665_v8 = vld [vmem:[%s9192_s9 + $0x2a] sm:$0xff] }
  0xa3   : > { %7610 = vmatpush3.msk.msra.mxu0 %vm457_vm1, %v6577_v61  ;;  %7525 = vmatprep.mubr.msk.f32.mxu0 %vm9067_vm0, %v9066_v0 }
  0xa4   : > { %7787 = vmatprep.subr.mxu0 %v9066_v0  ;;  %7712 = vmatprep.mubr.msk.f32.mxu1 %vm9067_vm0, %v9066_v0 }
  0xa6   : > { %7526 = vmatmul.mubr.msk.f32.gmra.mxu0 %vm369_vm2, %v309_v63  ;;  %7713 = vmatmul.mubr.msk.f32.gmra.mxu1 %vm369_vm2, %v9246_v10  ;;  %v9676_v10 = vld [vmem:[%s9192_s9 + $0x32] sm:$0xff] }
  0xa7   : > { %7528 = vmatprep.mubr.msk.f32.mxu0 %vm9067_vm0, %v9066_v0  ;;  %7715 = vmatprep.mubr.msk.f32.mxu1 %vm9067_vm0, %v9066_v0 }
  0xaa   : > { %7529 = vmatmul.mubr.msk.f32.gmra.mxu0 %vm369_vm2, %v310_v58  ;;  %7716 = vmatmul.mubr.msk.f32.gmra.mxu1 %vm369_vm2, %v9260_v12  ;;  %v9687_v12 = vld [vmem:[%s9192_s9 + $0x3a] sm:$0xff] }
  0xab   : > { %7611 = vmatprep.mubr.msk.f32.mxu0 %vm9067_vm0, %v9066_v0  ;;  %7718 = vmatprep.mubr.msk.f32.mxu1 %vm9067_vm0, %v9066_v0 }
  0xae   : > { %7612 = vmatmul.mubr.msk.f32.vlgmr.msra.gmra.mxu0 %vm369_vm2, %v971_v1  ;;  %7719 = vmatmul.mubr.msk.f32.gmra.mxu1 %vm369_vm2, %v9277_v15  ;;  %v9709_v15 = vld [vmem:[%s9192_s9 + $0x4a] sm:$0xff] }
  0xaf   : > { %7788 = vmatpush3.msk.msra.mxu0 %vm457_vm1, %v6639_v2  ;;  %7614 = vmatprep.mubr.msk.f32.mxu0 %vm9067_vm0, %v9066_v0  ;;  %v9851_v1 = vld [vmem:[%s9192_s9 + $0xaa] sm:$0xff] }
  0xb0   : > { %7965 = vmatprep.subr.mxu0 %v9066_v0  ;;  %7721 = vmatprep.mubr.msk.f32.mxu1 %vm9067_vm0, %v9066_v0 }
  0xb2   : > { %7615 = vmatmul.mubr.msk.f32.gmra.mxu0 %vm369_vm2, %v972_v3  ;;  %7722 = vmatmul.mubr.msk.f32.gmra.mxu1 %vm369_vm2, %v9293_v17  ;;  %v9720_v17 = vld [vmem:[%s9192_s9 + $0x52] sm:$0xff] }
  0xb3   : > { %7617 = vmatprep.mubr.msk.f32.mxu0 %vm9067_vm0, %v9066_v0  ;;  %7724 = vmatprep.mubr.msk.f32.mxu1 %vm9067_vm0, %v9066_v0 }
  0xb6   : > { %7618 = vmatmul.mubr.msk.f32.gmra.mxu0 %vm369_vm2, %v9632_v4  ;;  %7725 = vmatmul.mubr.msk.f32.gmra.mxu1 %vm369_vm2, %v9307_v19  ;;  %v9731_v19 = vld [vmem:[%s9192_s9 + $0x5a] sm:$0xff] }
  0xb7   : > { %7620 = vmatprep.mubr.msk.f32.mxu0 %vm9067_vm0, %v9066_v0  ;;  %7727 = vmatprep.mubr.msk.f32.mxu1 %vm9067_vm0, %v9066_v0 }
  0xba   : > { %7621 = vmatmul.mubr.msk.f32.gmra.mxu0 %vm369_vm2, %v9643_v5  ;;  %7728 = vmatmul.mubr.msk.f32.gmra.mxu1 %vm369_vm2, %v9321_v21  ;;  %v9742_v21 = vld [vmem:[%s9192_s9 + $0x62] sm:$0xff] }
  0xbb   : > { %7623 = vmatprep.mubr.msk.f32.mxu0 %vm9067_vm0, %v9066_v0  ;;  %7730 = vmatprep.mubr.msk.f32.mxu1 %vm9067_vm0, %v9066_v0 }
  0xbe   : > { %7624 = vmatmul.mubr.msk.f32.gmra.mxu0 %vm369_vm2, %v9654_v6  ;;  %7731 = vmatmul.mubr.msk.f32.gmra.mxu1 %vm369_vm2, %v9335_v23  ;;  %v9753_v23 = vld [vmem:[%s9192_s9 + $0x6a] sm:$0xff] }
  0xbf   : > { %7626 = vmatprep.mubr.msk.f32.mxu0 %vm9067_vm0, %v9066_v0  ;;  %7733 = vmatprep.mubr.msk.f32.mxu1 %vm9067_vm0, %v9066_v0 }
  0xc2   : > { %7627 = vmatmul.mubr.msk.f32.gmra.mxu0 %vm369_vm2, %v9665_v8  ;;  %7734 = vmatmul.mubr.msk.f32.gmra.mxu1 %vm369_vm2, %v9349_v25  ;;  %v9764_v25 = vld [vmem:[%s9192_s9 + $0x72] sm:$0xff] }
  0xc3   : > { %7629 = vmatprep.mubr.msk.f32.mxu0 %vm9067_vm0, %v9066_v0  ;;  %7736 = vmatprep.mubr.msk.f32.mxu1 %vm9067_vm0, %v9066_v0 }
  0xc6   : > { %7630 = vmatmul.mubr.msk.f32.gmra.mxu0 %vm369_vm2, %v9676_v10  ;;  %7737 = vmatmul.mubr.msk.f32.gmra.mxu1 %vm369_vm2, %v9363_v27  ;;  %v9775_v27 = vld [vmem:[%s9192_s9 + $0x7a] sm:$0xff] }
  0xc7   : > { %7632 = vmatprep.mubr.msk.f32.mxu0 %vm9067_vm0, %v9066_v0  ;;  %7739 = vmatprep.mubr.msk.f32.mxu1 %vm9067_vm0, %v9066_v0 }
  0xca   : > { %7633 = vmatmul.mubr.msk.f32.gmra.mxu0 %vm369_vm2, %v9687_v12  ;;  %7740 = vmatmul.mubr.msk.f32.gmra.mxu1 %vm369_vm2, %v9377_v29  ;;  %v9786_v29 = vld [vmem:[%s9192_s9 + $0x82] sm:$0xff] }
  0xcb   : > { %7635 = vmatprep.mubr.msk.f32.mxu0 %vm9067_vm0, %v9066_v0  ;;  %7742 = vmatprep.mubr.msk.f32.mxu1 %vm9067_vm0, %v9066_v0 }
  0xce   : > { %7636 = vmatmul.mubr.msk.f32.gmra.mxu0 %vm369_vm2, %v9698_v14  ;;  %7743 = vmatmul.mubr.msk.f32.gmra.mxu1 %vm369_vm2, %v9391_v31 }
  0xcf   : > { %7638 = vmatprep.mubr.msk.f32.mxu0 %vm9067_vm0, %v9066_v0  ;;  %7745 = vmatprep.mubr.msk.f32.mxu1 %vm9067_vm0, %v9066_v0 }
  0xd2   : > { %7639 = vmatmul.mubr.msk.f32.gmra.mxu0 %vm369_vm2, %v9709_v15  ;;  %7746 = vmatmul.mubr.msk.f32.gmra.mxu1 %vm369_vm2, %v9405_v33  ;;  %v9799_v33 = vld [vmem:[%s9192_s9 + $0x8a] sm:$0xff] }
  0xd3   : > { %7641 = vmatprep.mubr.msk.f32.mxu0 %vm9067_vm0, %v9066_v0  ;;  %7748 = vmatprep.mubr.msk.f32.mxu1 %vm9067_vm0, %v9066_v0 }
  0xd6   : > { %7642 = vmatmul.mubr.msk.f32.gmra.mxu0 %vm369_vm2, %v9720_v17  ;;  %7749 = vmatmul.mubr.msk.f32.gmra.mxu1 %vm369_vm2, %v9419_v35 }
  0xd7   : > { %7644 = vmatprep.mubr.msk.f32.mxu0 %vm9067_vm0, %v9066_v0  ;;  %7751 = vmatprep.mubr.msk.f32.mxu1 %vm9067_vm0, %v9066_v0 }
  0xda   : > { %7645 = vmatmul.mubr.msk.f32.gmra.mxu0 %vm369_vm2, %v9731_v19  ;;  %7752 = vmatmul.mubr.msk.f32.gmra.mxu1 %vm369_vm2, %v9433_v37 }
  0xdb   : > { %7647 = vmatprep.mubr.msk.f32.mxu0 %vm9067_vm0, %v9066_v0  ;;  %7754 = vmatprep.mubr.msk.f32.mxu1 %vm9067_vm0, %v9066_v0 }
  0xde   : > { %7648 = vmatmul.mubr.msk.f32.gmra.mxu0 %vm369_vm2, %v9742_v21  ;;  %7755 = vmatmul.mubr.msk.f32.gmra.mxu1 %vm369_vm2, %v9447_v39 }
  0xdf   : > { %7650 = vmatprep.mubr.msk.f32.mxu0 %vm9067_vm0, %v9066_v0  ;;  %7757 = vmatprep.mubr.msk.f32.mxu1 %vm9067_vm0, %v9066_v0 }
  0xe2   : > { %7651 = vmatmul.mubr.msk.f32.gmra.mxu0 %vm369_vm2, %v9753_v23  ;;  %7758 = vmatmul.mubr.msk.f32.gmra.mxu1 %vm369_vm2, %v9461_v41 }
  0xe3   : > { %7653 = vmatprep.mubr.msk.f32.mxu0 %vm9067_vm0, %v9066_v0  ;;  %7760 = vmatprep.mubr.msk.f32.mxu1 %vm9067_vm0, %v9066_v0 }
  0xe6   : > { %7654 = vmatmul.mubr.msk.f32.gmra.mxu0 %vm369_vm2, %v9764_v25  ;;  %7761 = vmatmul.mubr.msk.f32.gmra.mxu1 %vm369_vm2, %v9475_v43  ;;  %v9812_v43 = vld [vmem:[%s9192_s9 + $0x92] sm:$0xff] }
  0xe7   : > { %7656 = vmatprep.mubr.msk.f32.mxu0 %vm9067_vm0, %v9066_v0  ;;  %7763 = vmatprep.mubr.msk.f32.mxu1 %vm9067_vm0, %v9066_v0 }
  0xea   : > { %7657 = vmatmul.mubr.msk.f32.gmra.mxu0 %vm369_vm2, %v9775_v27  ;;  %7764 = vmatmul.mubr.msk.f32.gmra.mxu1 %vm369_vm2, %v9489_v45 }
  0xeb   : > { %7659 = vmatprep.mubr.msk.f32.mxu0 %vm9067_vm0, %v9066_v0  ;;  %7766 = vmatprep.mubr.msk.f32.mxu1 %vm9067_vm0, %v9066_v0 }
  0xee   : > { %v9792_v31 = vpop.f32.mrf.mxu0  ;;  %7660 = vmatmul.mubr.msk.f32.gmra.mxu0 %vm369_vm2, %v9786_v29  ;;  %v842_v37 = vpop.f32.mrf.mxu1  ;;  %7767 = vmatmul.mubr.msk.f32.gmra.mxu1 %vm369_vm2, %v9503_v47 }
  0xef   : > { %7662 = vmatprep.mubr.msk.f32.mxu0 %vm9067_vm0, %v9066_v0  ;;  %7769 = vmatprep.mubr.msk.f32.mxu1 %vm9067_vm0, %v9066_v0 }
  0xf0   : > { %v7435_v35 = vpop.f32.mrf.mxu0  ;;  %v7533_v41 = vpop.f32.mrf.mxu1 }
  0xf2   : > { %v9805_v39 = vpop.f32.mrf.mxu0  ;;  %7663 = vmatmul.mubr.msk.f32.gmra.mxu0 %vm369_vm2, %v9799_v33  ;;  %v847_v48 = vpop.f32.mrf.mxu1  ;;  %7770 = vmatmul.mubr.msk.f32.gmra.mxu1 %vm369_vm2, %v9515_v49 }
  0xf3   : > { %7665 = vmatprep.mubr.msk.f32.mxu0 %vm9067_vm0, %v9066_v0  ;;  %7772 = vmatprep.mubr.msk.f32.mxu1 %vm9067_vm0, %v9066_v0 }
  0xf4   : > { %v7438_v45 = vpop.f32.mrf.mxu0  ;;  %v7536_v50 = vpop.f32.mrf.mxu1 }
  0xf5   : > { %v9865_v45 = vld [vmem:[%s9192_s9 + $0xb2] sm:$0xff] }
  0xf6   : > { %v9818_v47 = vpop.f32.mrf.mxu0  ;;  %7666 = vmatmul.mubr.msk.f32.gmra.mxu0 %vm369_vm2, %v9812_v43  ;;  %v852_v56 = vpop.f32.mrf.mxu1  ;;  %7773 = vmatmul.mubr.msk.f32.gmra.mxu1 %vm369_vm2, %v9526_v51 }
  0xf7   : > { %7668 = vmatprep.mubr.msk.f32.mxu0 %vm9067_vm0, %v9066_v0  ;;  %7775 = vmatprep.mubr.msk.f32.mxu1 %vm9067_vm0, %v9066_v0 }
  0xf8   : > { %v7441_v54 = vpop.f32.mrf.mxu0  ;;  %v7539_v57 = vpop.f32.mrf.mxu1 }
  0xf9   : > { %v9878_v57 = vld [vmem:[%s9192_s9 + $0xba] sm:$0xff] }
  0xfa   : > { %v542_v49 = vpop.f32.mrf.mxu0  ;;  %7669 = vmatmul.mubr.msk.f32.gmra.mxu0 %vm369_vm2, %v9825_v52  ;;  %v857_v61 = vpop.f32.mrf.mxu1  ;;  %7776 = vmatmul.mubr.msk.f32.gmra.mxu1 %vm369_vm2, %v9537_v53  ;;  %v1358_v53 = vld [vmem:[%s9192_s9 + $0xe8] sm:$0xff] }
  0xfb   : > { %v9833_v58 = vadd.f32 %v842_v37, %v542_v49  ;;  %7671 = vmatprep.mubr.msk.f32.mxu0 %vm9067_vm0, %v9066_v0  ;;  %7778 = vmatprep.mubr.msk.f32.mxu1 %vm9067_vm0, %v9066_v0 }
  0xfc   : > { %v7444_v60 = vpop.f32.mrf.mxu0  ;;  %v7542_v62 = vpop.f32.mrf.mxu1 }
  0xfe   : > { %v547_v51 = vpop.f32.mrf.mxu0  ;;  %7672 = vmatmul.mubr.msk.f32.gmra.mxu0 %vm369_vm2, %v9838_v59  ;;  %v862_v3 = vpop.f32.mrf.mxu1  ;;  %7779 = vmatmul.mubr.msk.f32.gmra.mxu1 %vm369_vm2, %v9548_v55  ;;  %v1359_v55 = vld [vmem:[%s9192_s9 + $0xf0] sm:$0xff] }
  0xff   : > { %v9846_v63 = vadd.f32 %v847_v48, %v547_v51  ;;  %7674 = vmatprep.mubr.msk.f32.mxu0 %vm9067_vm0, %v9066_v0  ;;  %7781 = vmatprep.mubr.msk.f32.mxu1 %vm9067_vm0, %v9066_v0 }
 0x100   : > { %v7447_v2 = vpop.f32.mrf.mxu0  ;;  %v7545_v37 = vpop.f32.mrf.mxu1 }
 0x102   : > { %v552_v35 = vpop.f32.mrf.mxu0  ;;  %7675 = vmatmul.mubr.msk.f32.gmra.mxu0 %vm369_vm2, %v9851_v1  ;;  %v867_v50 = vpop.f32.mrf.mxu1  ;;  %7782 = vmatmul.mubr.msk.f32.gmra.mxu1 %vm369_vm2, %v1358_v53  ;;  %v9890_v53 = vld [vmem:[%s9192_s9 + $0xc2] sm:$0xff] }
 0x103   : > { %v9860_v41 = vadd.f32 %v852_v56, %v552_v35  ;;  %7677 = vmatprep.mubr.msk.f32.mxu0 %vm9067_vm0, %v9066_v0  ;;  %7784 = vmatprep.mubr.msk.f32.mxu1 %vm9067_vm0, %v9066_v0 }
 0x104   : > { %v7450_v48 = vpop.f32.mrf.mxu0  ;;  %v7548_v56 = vpop.f32.mrf.mxu1 }
 0x106   : > { %v557_v54 = vpop.f32.mrf.mxu0  ;;  %7678 = vmatmul.mubr.msk.f32.gmra.mxu0 %vm369_vm2, %v9865_v45  ;;  %v872_v51 = vpop.f32.mrf.mxu1  ;;  %7785 = vmatmul.mubr.msk.f32.gmra.mxu1 %vm369_vm2, %v1359_v55 }
 0x107   : > { %v9873_v49 = vadd.f32 %v857_v61, %v557_v54  ;;  %7680 = vmatprep.mubr.msk.f32.mxu0 %vm9067_vm0, %v9066_v0  ;;  %7878 = vmatprep.mubr.msk.f32.mxu1 %vm9067_vm0, %v9066_v0  ;;  %v9903_v54 = vld [vmem:[%s9192_s9 + $0xca] sm:$0xff] }
 0x108   : > { %v7453_v60 = vpop.f32.mrf.mxu0  ;;  %v7551_v2 = vpop.f32.mrf.mxu1 }
 0x109   : > { %v9916_v2 = vld [vmem:[%s9192_s9 + $0xd2] sm:$0xff] }
 0x10a   : > { %v562_v62 = vpop.f32.mrf.mxu0  ;;  %7681 = vmatmul.mubr.msk.f32.gmra.mxu0 %vm369_vm2, %v9878_v57  ;;  %v877_v37 = vpop.f32.mrf.mxu1  ;;  %7879 = vmatmul.mubr.msk.f32.vlgmr.msra.gmra.mxu1 %vm369_vm2, %v9632_v4 }
 0x10b   : > { %v9885_v61 = vadd.f32 %v862_v3, %v562_v62  ;;  %7683 = vmatprep.mubr.msk.f32.mxu0 %vm9067_vm0, %v9066_v0  ;;  %7881 = vmatprep.mubr.msk.f32.mxu1 %vm9067_vm0, %v9066_v0 }
 0x10c   : > { %v7456_v35 = vpop.f32.mrf.mxu0  ;;  %v7554_v3 = vpop.f32.mrf.mxu1 }
 0x10e   : > { %v567_v48 = vpop.f32.mrf.mxu0  ;;  %7684 = vmatmul.mubr.msk.f32.gmra.mxu0 %vm369_vm2, %v9890_v53  ;;  %v882_v60 = vpop.f32.mrf.mxu1  ;;  %7882 = vmatmul.mubr.msk.f32.gmra.mxu1 %vm369_vm2, %v9643_v5  ;;  %v6732_v5 = vld [vmem:[%s12264_s1 + $0x1c] sm:$0xf] }
 0x10f   : > { %v9898_v55 = vadd.f32 %v867_v50, %v567_v48  ;;  %7686 = vmatprep.mubr.msk.f32.mxu0 %vm9067_vm0, %v9066_v0  ;;  %7884 = vmatprep.mubr.msk.f32.mxu1 %vm9067_vm0, %v9066_v0 }
 0x110   : > { %v7459_v56 = vpop.f32.mrf.mxu0  ;;  %v7557_v50 = vpop.f32.mrf.mxu1  ;;  %8055 = vmatpush3.msk.msra.mxu1 %vm457_vm1, %v6732_v5 }
 0x112   : > { %v572_v4 = vpop.f32.mrf.mxu0  ;;  %7687 = vmatmul.mubr.msk.f32.gmra.mxu0 %vm369_vm2, %v9903_v54  ;;  %v887_v48 = vpop.f32.mrf.mxu1  ;;  %7885 = vmatmul.mubr.msk.f32.gmra.mxu1 %vm369_vm2, %v9654_v6  ;;  %v9933_v6 = vld [vmem:[%s9192_s9 + $0xda] sm:$0xff] }
 0x113   : > { %v9911_v62 = vadd.f32 %v872_v51, %v572_v4  ;;  %7689 = vmatprep.mubr.msk.f32.mxu0 %vm9067_vm0, %v9066_v0  ;;  %7887 = vmatprep.mubr.msk.f32.mxu1 %vm9067_vm0, %v9066_v0 }
 0x114   : > { %v7462_v35 = vpop.f32.mrf.mxu0  ;;  %v7560_v51 = vpop.f32.mrf.mxu1 }
 0x116   : > { %v577_v3 = vpop.f32.mrf.mxu0  ;;  %7690 = vmatmul.mubr.msk.f32.gmra.mxu0 %vm369_vm2, %v9916_v2  ;;  %v892_v50 = vpop.f32.mrf.mxu1  ;;  %7888 = vmatmul.mubr.msk.f32.gmra.mxu1 %vm369_vm2, %v9665_v8 }
 0x117   : > { %v9928_v56 = vadd.f32 %v877_v37, %v577_v3  ;;  %7692 = vmatprep.mubr.msk.f32.mxu0 %vm9067_vm0, %v9066_v0  ;;  %7890 = vmatprep.mubr.msk.f32.mxu1 %vm9067_vm0, %v9066_v0  ;;  %v9946_v3 = vld [vmem:[%s9192_s9 + $0xe2] sm:$0xff] }
 0x118   : > { %v7465_v4 = vpop.f32.mrf.mxu0  ;;  %v7563_v5 = vpop.f32.mrf.mxu1 }
 0x11a   : > { %v582_v35 = vpop.f32.mrf.mxu0  ;;  %7693 = vmatmul.mubr.msk.f32.gmra.mxu0 %vm369_vm2, %v9933_v6  ;;  %v897_v4 = vpop.f32.mrf.mxu1  ;;  %7891 = vmatmul.mubr.msk.f32.gmra.mxu1 %vm369_vm2, %v9676_v10 }
 0x11b   : > { %v9941_v37 = vadd.f32 %v882_v60, %v582_v35  ;;  %7695 = vmatprep.mubr.msk.f32.mxu0 %vm9067_vm0, %v9066_v0  ;;  %7893 = vmatprep.mubr.msk.f32.mxu1 %vm9067_vm0, %v9066_v0 }
 0x11c   : > { %v7468_v51 = vpop.f32.mrf.mxu0  ;;  %v7566_v5 = vpop.f32.mrf.mxu1 }
 0x11d   : > { %12276 = vst [vmem:[#allocation13_spill] sm:$0xff] %v9941_v37  ;;  %v6701_v51 = vld [vmem:[%s12264_s1 + $0x18] sm:$0xf] }
 0x11e   : > { %v587_v8 = vpop.f32.mrf.mxu0  ;;  %7696 = vmatmul.mubr.msk.f32.gmra.mxu0 %vm369_vm2, %v9946_v3  ;;  %v902_v37 = vpop.f32.mrf.mxu1  ;;  %7894 = vmatmul.mubr.msk.f32.gmra.mxu1 %vm369_vm2, %v9687_v12 }
 0x11f   : > { %v9954_v60 = vadd.f32 %v887_v48, %v587_v8  ;;  %7789 = vmatprep.mubr.msk.f32.mxu0 %vm9067_vm0, %v9066_v0  ;;  %7896 = vmatprep.mubr.msk.f32.mxu1 %vm9067_vm0, %v9066_v0 }
 0x120   : > { %v7471_v35 = vpop.f32.mrf.mxu0  ;;  %v7569_v48 = vpop.f32.mrf.mxu1 }
 0x122   : > { %v592_v10 = vpop.f32.mrf.mxu0  ;;  %7790 = vmatmul.mubr.msk.f32.vlgmr.msra.gmra.mxu0 %vm369_vm2, %v9225_v7  ;;  %v907_v35 = vpop.f32.mrf.mxu1  ;;  %7897 = vmatmul.mubr.msk.f32.gmra.mxu1 %vm369_vm2, %v9698_v14 }
 0x123   : > { %v9967_v8 = vadd.f32 %v892_v50, %v592_v10  ;;  %7966 = vmatpush3.msk.msra.mxu0 %vm457_vm1, %v6701_v51  ;;  %7792 = vmatprep.mubr.msk.f32.mxu0 %vm9067_vm0, %v9066_v0 }
 0x124   : > { %v7474_v5 = vpop.f32.mrf.mxu0  ;;  %8143 = vmatprep.subr.mxu0 %v9066_v0  ;;  %7899 = vmatprep.mubr.msk.f32.mxu1 %vm9067_vm0, %v9066_v0  ;;  %v7572_v7 = vpop.f32.mrf.mxu1 }
 0x126   : > { %v597_v12 = vpop.f32.mrf.mxu0  ;;  %7793 = vmatmul.mubr.msk.f32.gmra.mxu0 %vm369_vm2, %v9239_v9  ;;  %v912_v10 = vpop.f32.mrf.mxu1  ;;  %7900 = vmatmul.mubr.msk.f32.gmra.mxu1 %vm369_vm2, %v9709_v15 }
 0x127   : > { %v9979_v50 = vadd.f32 %v897_v4, %v597_v12  ;;  %7795 = vmatprep.mubr.msk.f32.mxu0 %vm9067_vm0, %v9066_v0  ;;  %7902 = vmatprep.mubr.msk.f32.mxu1 %vm9067_vm0, %v9066_v0 }
 0x128   : > { %v7477_v51 = vpop.f32.mrf.mxu0  ;;  %v7575_v48 = vpop.f32.mrf.mxu1 }
 0x12a   : > { %v602_v14 = vpop.f32.mrf.mxu0  ;;  %7796 = vmatmul.mubr.msk.f32.gmra.mxu0 %vm369_vm2, %v9253_v11  ;;  %v917_v5 = vpop.f32.mrf.mxu1  ;;  %7903 = vmatmul.mubr.msk.f32.gmra.mxu1 %vm369_vm2, %v9720_v17 }
 0x12b   : > { %v9989_v9 = vadd.f32 %v902_v37, %v602_v14  ;;  %7798 = vmatprep.mubr.msk.f32.mxu0 %vm9067_vm0, %v9066_v0  ;;  %7905 = vmatprep.mubr.msk.f32.mxu1 %vm9067_vm0, %v9066_v0 }
 0x12c   : > { %v7480_v4 = vpop.f32.mrf.mxu0  ;;  %v7578_v12 = vpop.f32.mrf.mxu1 }
 0x12e   : > { %v607_v15 = vpop.f32.mrf.mxu0  ;;  %7799 = vmatmul.mubr.msk.f32.gmra.mxu0 %vm369_vm2, %v9267_v13  ;;  %v922_v7 = vpop.f32.mrf.mxu1  ;;  %7906 = vmatmul.mubr.msk.f32.gmra.mxu1 %vm369_vm2, %v9731_v19 }
 0x12f   : > { %v9999_v11 = vadd.f32 %v907_v35, %v607_v15  ;;  %7801 = vmatprep.mubr.msk.f32.mxu0 %vm9067_vm0, %v9066_v0  ;;  %7908 = vmatprep.mubr.msk.f32.mxu1 %vm9067_vm0, %v9066_v0 }
 0x130   : > { %v7483_v37 = vpop.f32.mrf.mxu0  ;;  %v7581_v51 = vpop.f32.mrf.mxu1 }
 0x132   : > { %v612_v17 = vpop.f32.mrf.mxu0  ;;  %7802 = vmatmul.mubr.msk.f32.gmra.mxu0 %vm369_vm2, %v9286_v16  ;;  %v927_v14 = vpop.f32.mrf.mxu1  ;;  %7909 = vmatmul.mubr.msk.f32.gmra.mxu1 %vm369_vm2, %v9742_v21 }
 0x133   : > { %v10009_v13 = vadd.f32 %v912_v10, %v612_v17  ;;  %7804 = vmatprep.mubr.msk.f32.mxu0 %vm9067_vm0, %v9066_v0  ;;  %7911 = vmatprep.mubr.msk.f32.mxu1 %vm9067_vm0, %v9066_v0 }
 0x134   : > { %v7486_v35 = vpop.f32.mrf.mxu0  ;;  %v7584_v48 = vpop.f32.mrf.mxu1 }
 0x136   : > { %v617_v19 = vpop.f32.mrf.mxu0  ;;  %7805 = vmatmul.mubr.msk.f32.gmra.mxu0 %vm369_vm2, %v9300_v18  ;;  %v932_v4 = vpop.f32.mrf.mxu1  ;;  %7912 = vmatmul.mubr.msk.f32.gmra.mxu1 %vm369_vm2, %v9753_v23 }
 0x137   : > { %v10019_v16 = vadd.f32 %v917_v5, %v617_v19  ;;  %7807 = vmatprep.mubr.msk.f32.mxu0 %vm9067_vm0, %v9066_v0  ;;  %7914 = vmatprep.mubr.msk.f32.mxu1 %vm9067_vm0, %v9066_v0 }
 0x138   : > { %v7489_v10 = vpop.f32.mrf.mxu0  ;;  %v7587_v15 = vpop.f32.mrf.mxu1 }
 0x13a   : > { %v622_v21 = vpop.f32.mrf.mxu0  ;;  %7808 = vmatmul.mubr.msk.f32.gmra.mxu0 %vm369_vm2, %v9314_v20  ;;  %v937_v12 = vpop.f32.mrf.mxu1  ;;  %7915 = vmatmul.mubr.msk.f32.gmra.mxu1 %vm369_vm2, %v9764_v25 }
 0x13b   : > { %v10029_v18 = vadd.f32 %v922_v7, %v622_v21  ;;  %7810 = vmatprep.mubr.msk.f32.mxu0 %vm9067_vm0, %v9066_v0  ;;  %7917 = vmatprep.mubr.msk.f32.mxu1 %vm9067_vm0, %v9066_v0 }
 0x13c   : > { %v7492_v5 = vpop.f32.mrf.mxu0  ;;  %v7590_v37 = vpop.f32.mrf.mxu1 }
 0x13e   : > { %v627_v23 = vpop.f32.mrf.mxu0  ;;  %7811 = vmatmul.mubr.msk.f32.gmra.mxu0 %vm369_vm2, %v9328_v22  ;;  %v942_v17 = vpop.f32.mrf.mxu1  ;;  %7918 = vmatmul.mubr.msk.f32.gmra.mxu1 %vm369_vm2, %v9775_v27 }
 0x13f   : > { %v10039_v20 = vadd.f32 %v927_v14, %v627_v23  ;;  %7813 = vmatprep.mubr.msk.f32.mxu0 %vm9067_vm0, %v9066_v0  ;;  %7920 = vmatprep.mubr.msk.f32.mxu1 %vm9067_vm0, %v9066_v0 }
 0x140   : > { %v7495_v7 = vpop.f32.mrf.mxu0  ;;  %v7593_v51 = vpop.f32.mrf.mxu1 }
 0x142   : > { %v632_v25 = vpop.f32.mrf.mxu0  ;;  %7814 = vmatmul.mubr.msk.f32.gmra.mxu0 %vm369_vm2, %v9342_v24  ;;  %v947_v14 = vpop.f32.mrf.mxu1  ;;  %7921 = vmatmul.mubr.msk.f32.gmra.mxu1 %vm369_vm2, %v9786_v29 }
 0x143   : > { %v10049_v22 = vadd.f32 %v932_v4, %v632_v25  ;;  %7816 = vmatprep.mubr.msk.f32.mxu0 %vm9067_vm0, %v9066_v0  ;;  %7923 = vmatprep.mubr.msk.f32.mxu1 %vm9067_vm0, %v9066_v0 }
 0x144   : > { %v7498_v35 = vpop.f32.mrf.mxu0  ;;  %v7596_v19 = vpop.f32.mrf.mxu1 }
 0x146   : > { %v637_v27 = vpop.f32.mrf.mxu0  ;;  %7817 = vmatmul.mubr.msk.f32.gmra.mxu0 %vm369_vm2, %v9356_v26  ;;  %v952_v10 = vpop.f32.mrf.mxu1  ;;  %7924 = vmatmul.mubr.msk.f32.gmra.mxu1 %vm369_vm2, %v9799_v33 }
 0x147   : > { %v10059_v24 = vadd.f32 %v937_v12, %v637_v27  ;;  %7819 = vmatprep.mubr.msk.f32.mxu0 %vm9067_vm0, %v9066_v0  ;;  %7926 = vmatprep.mubr.msk.f32.mxu1 %vm9067_vm0, %v9066_v0 }
 0x148   : > { %v7501_v48 = vpop.f32.mrf.mxu0  ;;  %v7599_v4 = vpop.f32.mrf.mxu1 }
 0x14a   : > { %v642_v29 = vpop.f32.mrf.mxu0  ;;  %7820 = vmatmul.mubr.msk.f32.gmra.mxu0 %vm369_vm2, %v9370_v28  ;;  %v957_v15 = vpop.f32.mrf.mxu1  ;;  %7927 = vmatmul.mubr.msk.f32.gmra.mxu1 %vm369_vm2, %v9812_v43 }
 0x14b   : > { %v10069_v26 = vadd.f32 %v942_v17, %v642_v29  ;;  %7822 = vmatprep.mubr.msk.f32.mxu0 %vm9067_vm0, %v9066_v0  ;;  %7929 = vmatprep.mubr.msk.f32.mxu1 %vm9067_vm0, %v9066_v0 }
 0x14c   : > { %v7504_v21 = vpop.f32.mrf.mxu0  ;;  %v7602_v5 = vpop.f32.mrf.mxu1 }
 0x14e   : > { %v647_v33 = vpop.f32.mrf.mxu0  ;;  %7823 = vmatmul.mubr.msk.f32.gmra.mxu0 %vm369_vm2, %v9384_v30  ;;  %v962_v23 = vpop.f32.mrf.mxu1  ;;  %7930 = vmatmul.mubr.msk.f32.gmra.mxu1 %vm369_vm2, %v9825_v52 }
 0x14f   : > { %v10079_v28 = vadd.f32 %v947_v14, %v647_v33  ;;  %7825 = vmatprep.mubr.msk.f32.mxu0 %vm9067_vm0, %v9066_v0  ;;  %7932 = vmatprep.mubr.msk.f32.mxu1 %vm9067_vm0, %v9066_v0 }
 0x150   : > { %v7507_v12 = vpop.f32.mrf.mxu0  ;;  %v7605_v37 = vpop.f32.mrf.mxu1 }
 0x151   : > { %v10163_v37 = vld [vmem:[%s9192_s9 + $0xb1] sm:$0xff] }
 0x152   : > { %v652_v43 = vpop.f32.mrf.mxu0  ;;  %7826 = vmatmul.mubr.msk.f32.gmra.mxu0 %vm369_vm2, %v9398_v32  ;;  %v967_v17 = vpop.f32.mrf.mxu1  ;;  %7933 = vmatmul.mubr.msk.f32.gmra.mxu1 %vm369_vm2, %v9838_v59 }
 0x153   : > { %v10089_v30 = vadd.f32 %v952_v10, %v652_v43  ;;  %7828 = vmatprep.mubr.msk.f32.mxu0 %vm9067_vm0, %v9066_v0  ;;  %7935 = vmatprep.mubr.msk.f32.mxu1 %vm9067_vm0, %v9066_v0 }
 0x154   : > { %v7510_v7 = vpop.f32.mrf.mxu0  ;;  %v7608_v25 = vpop.f32.mrf.mxu1 }
 0x156   : > { %v657_v52 = vpop.f32.mrf.mxu0  ;;  %7829 = vmatmul.mubr.msk.f32.gmra.mxu0 %vm369_vm2, %v9412_v34  ;;  %v1518_v35 = vpop.f32.mrf.mxu1  ;;  %7936 = vmatmul.mubr.msk.f32.gmra.mxu1 %vm369_vm2, %v9851_v1 }
 0x157   : > { %v10099_v32 = vadd.f32 %v957_v15, %v657_v52  ;;  %7831 = vmatprep.mubr.msk.f32.mxu0 %vm9067_vm0, %v9066_v0  ;;  %7938 = vmatprep.mubr.msk.f32.mxu1 %vm9067_vm0, %v9066_v0 }
 0x158   : > { %v7513_v51 = vpop.f32.mrf.mxu0  ;;  %v7702_v14 = vpop.f32.mrf.mxu1 }
 0x159   : > { %v10179_v51 = vld [vmem:[%s9192_s9 + $0xb9] sm:$0xff]  ;;  %v2078_v14 = vld [vmem:[%s9192_s9 + $0xea] sm:$0xff] }
 0x15a   : > { %v662_v59 = vpop.f32.mrf.mxu0  ;;  %7832 = vmatmul.mubr.msk.f32.gmra.mxu0 %vm369_vm2, %v9426_v36  ;;  %v1523_v19 = vpop.f32.mrf.mxu1  ;;  %7939 = vmatmul.mubr.msk.f32.gmra.mxu1 %vm369_vm2, %v9865_v45 }
 0x15b   : > { %v10109_v34 = vadd.f32 %v962_v23, %v662_v59  ;;  %7834 = vmatprep.mubr.msk.f32.mxu0 %vm9067_vm0, %v9066_v0  ;;  %7941 = vmatprep.mubr.msk.f32.mxu1 %vm9067_vm0, %v9066_v0 }
 0x15c   : > { %v7516_v27 = vpop.f32.mrf.mxu0  ;;  %v7705_v48 = vpop.f32.mrf.mxu1 }
 0x15e   : > { %v667_v1 = vpop.f32.mrf.mxu0  ;;  %7835 = vmatmul.mubr.msk.f32.gmra.mxu0 %vm369_vm2, %v9440_v38  ;;  %v1528_v29 = vpop.f32.mrf.mxu1  ;;  %7942 = vmatmul.mubr.msk.f32.gmra.mxu1 %vm369_vm2, %v9878_v57 }
 0x15f   : > { %v10119_v36 = vadd.f32 %v967_v17, %v667_v1  ;;  %7837 = vmatprep.mubr.msk.f32.mxu0 %vm9067_vm0, %v9066_v0  ;;  %7944 = vmatprep.mubr.msk.f32.mxu1 %vm9067_vm0, %v9066_v0 }
 0x160   : > { %v7519_v10 = vpop.f32.mrf.mxu0  ;;  %v7708_v4 = vpop.f32.mrf.mxu1 }
 0x162   : > { %v827_v45 = vpop.f32.mrf.mxu0  ;;  %7838 = vmatmul.mubr.msk.f32.gmra.mxu0 %vm369_vm2, %v9454_v40  ;;  %v10131_v21 = vpop.f32.mrf.mxu1  ;;  %7945 = vmatmul.mubr.msk.f32.gmra.mxu1 %vm369_vm2, %v9890_v53 }
 0x163   : > { %7840 = vmatprep.mubr.msk.f32.mxu0 %vm9067_vm0, %v9066_v0  ;;  %7947 = vmatprep.mubr.msk.f32.mxu1 %vm9067_vm0, %v9066_v0 }
 0x164   : > { %v7524_v38 = vpop.f32.mrf.mxu0  ;;  %v7711_v15 = vpop.f32.mrf.mxu1 }
 0x165   : > { %v10212_v15 = vld [vmem:[%s9192_s9 + $0xc9] sm:$0xff] }
 0x166   : > { %v832_v57 = vpop.f32.mrf.mxu0  ;;  %7841 = vmatmul.mubr.msk.f32.gmra.mxu0 %vm369_vm2, %v9468_v42  ;;  %v10141_v33 = vpop.f32.mrf.mxu1  ;;  %7948 = vmatmul.mubr.msk.f32.gmra.mxu1 %vm369_vm2, %v9903_v54  ;;  %v828_v54 = vadd.f32 %v827_v45, %v9792_v31  ;;  %v2079_v45 = vld [vmem:[%s9192_s9 + $0xf2] sm:$0xff] }
 0x167   : > { %7843 = vmatprep.mubr.msk.f32.mxu0 %vm9067_vm0, %v9066_v0  ;;  %7950 = vmatprep.mubr.msk.f32.mxu1 %vm9067_vm0, %v9066_v0  ;;  %v833_v31 = vadd.f32 %v832_v57, %v9805_v39 }
 0x168   : > { %v7527_v40 = vpop.f32.mrf.mxu0  ;;  %v7714_v5 = vpop.f32.mrf.mxu1 }
 0x169   : > { %v2771_v5 = vld [vmem:[%s9192_s9 + $0x21] sm:$0xff] }
 0x16a   : > { %v837_v53 = vpop.f32.mrf.mxu0  ;;  %7844 = vmatmul.mubr.msk.f32.gmra.mxu0 %vm369_vm2, %v9482_v44  ;;  %v10151_v12 = vpop.f32.mrf.mxu1  ;;  %7951 = vmatmul.mubr.msk.f32.gmra.mxu1 %vm369_vm2, %v9916_v2 }
 0x16b   : > { %7846 = vmatprep.mubr.msk.f32.mxu0 %vm9067_vm0, %v9066_v0  ;;  %7953 = vmatprep.mubr.msk.f32.mxu1 %vm9067_vm0, %v9066_v0  ;;  %v838_v39 = vadd.f32 %v837_v53, %v9818_v47 }
 0x16c   : > { %v7530_v42 = vpop.f32.mrf.mxu0  ;;  %v7717_v44 = vpop.f32.mrf.mxu1 }
 0x16e   : > { %v1158_v23 = vpop.f32.mrf.mxu0  ;;  %7847 = vmatmul.mubr.msk.f32.gmra.mxu0 %vm369_vm2, %v9496_v46  ;;  %v10165_v17 = vpop.f32.mrf.mxu1  ;;  %7954 = vmatmul.mubr.msk.f32.gmra.mxu1 %vm369_vm2, %v9933_v6 }
 0x16f   : > { %v1302_v43 = vadd.f32 %v1158_v23, %v828_v54  ;;  %7849 = vmatprep.mubr.msk.f32.mxu0 %vm9067_vm0, %v9066_v0  ;;  %7956 = vmatprep.mubr.msk.f32.mxu1 %vm9067_vm0, %v9066_v0  ;;  %v10229_v23 = vld [vmem:[%s9192_s9 + $0xd1] sm:$0xff] }
 0x170   : > { %v7613_v7 = vpop.f32.mrf.mxu0  ;;  %v7720_v52 = vpop.f32.mrf.mxu1 }
 0x171   : > { %v10170_v2 = vadd.f32 %v1518_v35, %v1302_v43  ;;  %v2772_v7 = vld [vmem:[%s9192_s9 + $0x29] sm:$0xff]  ;;  %v10246_v52 = vld [vmem:[%s9192_s9 + $0xd9] sm:$0xff] }
 0x172   : > { %v1163_v46 = vpop.f32.mrf.mxu0  ;;  %7850 = vmatmul.mubr.msk.f32.gmra.mxu0 %vm369_vm2, %v10163_v37  ;;  %v10181_v59 = vpop.f32.mrf.mxu1  ;;  %7957 = vmatmul.mubr.msk.f32.gmra.mxu1 %vm369_vm2, %v9946_v3  ;;  %v10196_v3 = vld [vmem:[%s9192_s9 + $0xc1] sm:$0xff] }
 0x173   : > { %v1303_v25 = vadd.f32 %v1163_v46, %v833_v31  ;;  %7852 = vmatprep.mubr.msk.f32.mxu0 %vm9067_vm0, %v9066_v0  ;;  %7959 = vmatprep.mubr.msk.f32.mxu1 %vm9067_vm0, %v9066_v0 }
 0x174   : > { %v7616_v6 = vpop.f32.mrf.mxu0  ;;  %v7723_v1 = vpop.f32.mrf.mxu1 }
 0x175   : > { %v10186_v35 = vadd.f32 %v1523_v19, %v1303_v25  ;;  %v10263_v1 = vld [vmem:[%s9192_s9 + $0xe1] sm:$0xff] }
 0x176   : > { %v1168_v27 = vpop.f32.mrf.mxu0  ;;  %7853 = vmatmul.mubr.msk.f32.gmra.mxu0 %vm369_vm2, %v10179_v51  ;;  %v10198_v47 = vpop.f32.mrf.mxu1  ;;  %7960 = vmatmul.mubr.msk.f32.gmra.mxu1 %vm369_vm2, %v2078_v14 }
 0x177   : > { %v1304_v48 = vadd.f32 %v1168_v27, %v838_v39  ;;  %7855 = vmatprep.mubr.msk.f32.mxu0 %vm9067_vm0, %v9066_v0  ;;  %7962 = vmatprep.mubr.msk.f32.mxu1 %vm9067_vm0, %v9066_v0  ;;  %v2773_v39 = vld [vmem:[%s9192_s9 + $0x31] sm:$0xff] }
 0x178   : > { %v7619_v10 = vpop.f32.mrf.mxu0  ;;  %v7726_v38 = vpop.f32.mrf.mxu1 }
 0x179   : > { %v10201_v19 = vadd.f32 %v1528_v29, %v1304_v48 }
 0x17a   : > { %v1173_v4 = vpop.f32.mrf.mxu0  ;;  %7856 = vmatmul.mubr.msk.f32.gmra.mxu0 %vm369_vm2, %v10196_v3  ;;  %v10214_v29 = vpop.f32.mrf.mxu1  ;;  %7963 = vmatmul.mubr.msk.f32.gmra.mxu1 %vm369_vm2, %v2079_v45  ;;  %v2774_v45 = vld [vmem:[%s9192_s9 + $0x39] sm:$0xff] }
 0x17b   : > { %v1305_v57 = vadd.f32 %v1173_v4, %v9833_v58  ;;  %7858 = vmatprep.mubr.msk.f32.mxu0 %vm9067_vm0, %v9066_v0  ;;  %8056 = vmatprep.mubr.msk.f32.mxu1 %vm9067_vm0, %v9066_v0 }
 0x17c   : > { %v7622_v40 = vpop.f32.mrf.mxu0  ;;  %v7729_v58 = vpop.f32.mrf.mxu1 }
 0x17d   : > { %v10218_v53 = vadd.f32 %v10131_v21, %v1305_v57  ;;  %v10280_v57 = vld [vmem:[%s9192_s9 + $0xe9] sm:$0xff] }
 0x17e   : > { %v1178_v42 = vpop.f32.mrf.mxu0  ;;  %7859 = vmatmul.mubr.msk.f32.gmra.mxu0 %vm369_vm2, %v10212_v15  ;;  %v10231_v21 = vpop.f32.mrf.mxu1  ;;  %8057 = vmatmul.mubr.msk.f32.vlgmr.msra.gmra.mxu1 %vm369_vm2, %v2771_v5 }
 0x17f   : > { %v1306_v54 = vadd.f32 %v1178_v42, %v9846_v63  ;;  %7861 = vmatprep.mubr.msk.f32.mxu0 %vm9067_vm0, %v9066_v0  ;;  %8059 = vmatprep.mubr.msk.f32.mxu1 %vm9067_vm0, %v9066_v0  ;;  %v2775_v42 = vld [vmem:[%s9192_s9 + $0x41] sm:$0xff] }
 0x180   : > { %v7625_v44 = vpop.f32.mrf.mxu0  ;;  %v7732_v63 = vpop.f32.mrf.mxu1 }
 0x181   : > { %v10235_v43 = vadd.f32 %v10141_v33, %v1306_v54  ;;  %v10297_v44 = vld [vmem:[%s9192_s9 + $0xf1] sm:$0xff]  ;;  %v2776_v63 = vld [vmem:[%s9192_s9 + $0x49] sm:$0xff] }
 0x182   : > { %v1183_v31 = vpop.f32.mrf.mxu0  ;;  %7862 = vmatmul.mubr.msk.f32.gmra.mxu0 %vm369_vm2, %v10229_v23  ;;  %v10248_v33 = vpop.f32.mrf.mxu1  ;;  %8060 = vmatmul.mubr.msk.f32.gmra.mxu1 %vm369_vm2, %v2772_v7 }
 0x183   : > { %v1307_v46 = vadd.f32 %v1183_v31, %v9860_v41  ;;  %7864 = vmatprep.mubr.msk.f32.mxu0 %vm9067_vm0, %v9066_v0  ;;  %8062 = vmatprep.mubr.msk.f32.mxu1 %vm9067_vm0, %v9066_v0 }
 0x184   : > { %v7628_v25 = vpop.f32.mrf.mxu0  ;;  %v7735_v41 = vpop.f32.mrf.mxu1 }
 0x185   : > { %v10252_v6 = vadd.f32 %v10151_v12, %v1307_v46 }
 0x186   : > { %v1188_v14 = vpop.f32.mrf.mxu0  ;;  %7865 = vmatmul.mubr.msk.f32.gmra.mxu0 %vm369_vm2, %v10246_v52  ;;  %v10265_v12 = vpop.f32.mrf.mxu1  ;;  %8063 = vmatmul.mubr.msk.f32.gmra.mxu1 %vm369_vm2, %v2773_v39  ;;  %v2411_v39 = vld [vmem:[%s9192_s9 + $0x20] sm:$0xff] }
 0x187   : > { %v1308_v27 = vadd.f32 %v1188_v14, %v9873_v49  ;;  %7867 = vmatprep.mubr.msk.f32.mxu0 %vm9067_vm0, %v9066_v0  ;;  %8065 = vmatprep.mubr.msk.f32.mxu1 %vm9067_vm0, %v9066_v0 }
 0x188   : > { %v7631_v48 = vpop.f32.mrf.mxu0  ;;  %v7738_v49 = vpop.f32.mrf.mxu1 }
 0x189   : > { %v10269_v10 = vadd.f32 %v10165_v17, %v1308_v27  ;;  %v2412_v49 = vld [vmem:[%s9192_s9 + $0x28] sm:$0xff] }
 0x18a   : > { %v1193_v4 = vpop.f32.mrf.mxu0  ;;  %7868 = vmatmul.mubr.msk.f32.gmra.mxu0 %vm369_vm2, %v10263_v1  ;;  %v10282_v17 = vpop.f32.mrf.mxu1  ;;  %8066 = vmatmul.mubr.msk.f32.gmra.mxu1 %vm369_vm2, %v2774_v45 }
 0x18b   : > { %v1309_v38 = vadd.f32 %v1193_v4, %v9885_v61  ;;  %7870 = vmatprep.mubr.msk.f32.mxu0 %vm9067_vm0, %v9066_v0  ;;  %8068 = vmatprep.mubr.msk.f32.mxu1 %vm9067_vm0, %v9066_v0 }
 0x18c   : > { %v7634_v40 = vpop.f32.mrf.mxu0  ;;  %v7741_v61 = vpop.f32.mrf.mxu1 }
 0x18d   : > { %v10286_v5 = vadd.f32 %v10181_v59, %v1309_v38  ;;  %v12277_v61 = vld [vmem:[#allocation13_spill] sm:$0xff] }
 0x18e   : > { %v1198_v58 = vpop.f32.mrf.mxu0  ;;  %7871 = vmatmul.mubr.msk.f32.gmra.mxu0 %vm369_vm2, %v10280_v57  ;;  %v10299_v59 = vpop.f32.mrf.mxu1  ;;  %8069 = vmatmul.mubr.msk.f32.gmra.mxu1 %vm369_vm2, %v2775_v42  ;;  %v2778_v42 = vld [vmem:[%s9192_s9 + $0x59] sm:$0xff] }
 0x18f   : > { %v1310_v54 = vadd.f32 %v1198_v58, %v9898_v55  ;;  %7873 = vmatprep.mubr.msk.f32.mxu0 %vm9067_vm0, %v9066_v0  ;;  %8071 = vmatprep.mubr.msk.f32.mxu1 %vm9067_vm0, %v9066_v0 }
 0x190   : > { %v7637_v7 = vpop.f32.mrf.mxu0  ;;  %v7744_v55 = vpop.f32.mrf.mxu1 }
 0x191   : > { %v10303_v31 = vadd.f32 %v10198_v47, %v1310_v54  ;;  %v6763_v47 = vld [vmem:[%s12264_s1 + $0x20] sm:$0xf]  ;;  %v2413_v7 = vld [vmem:[%s9192_s9 + $0x30] sm:$0xff] }
 0x192   : > { %v1203_v46 = vpop.f32.mrf.mxu0  ;;  %7874 = vmatmul.mubr.msk.f32.gmra.mxu0 %vm369_vm2, %v10297_v44  ;;  %v10317_v41 = vpop.f32.mrf.mxu1  ;;  %8072 = vmatmul.mubr.msk.f32.gmra.mxu1 %vm369_vm2, %v2776_v63  ;;  %v2779_v55 = vld [vmem:[%s9192_s9 + $0x61] sm:$0xff] }
 0x193   : > { %v1311_v25 = vadd.f32 %v1203_v46, %v9911_v62  ;;  %7967 = vmatprep.mubr.msk.f32.mxu0 %vm9067_vm0, %v9066_v0  ;;  %8074 = vmatprep.mubr.msk.f32.mxu1 %vm9067_vm0, %v9066_v0  ;;  %v2777_v62 = vld [vmem:[%s9192_s9 + $0x51] sm:$0xff] }
 0x194   : > { %v7640_v14 = vpop.f32.mrf.mxu0  ;;  %v7747_v45 = vpop.f32.mrf.mxu1 }
 0x195   : > { %v10321_v27 = vadd.f32 %v10214_v29, %v1311_v25  ;;  %v2780_v45 = vld [vmem:[%s9192_s9 + $0x69] sm:$0xff] }
 0x196   : > { %v1208_v48 = vpop.f32.mrf.mxu0  ;;  %7968 = vmatmul.mubr.msk.f32.vlgmr.msra.gmra.mxu0 %vm369_vm2, %v2411_v39  ;;  %v10332_v29 = vpop.f32.mrf.mxu1  ;;  %8075 = vmatmul.mubr.msk.f32.gmra.mxu1 %vm369_vm2, %v2777_v62 }
 0x197   : > { %v1312_v4 = vadd.f32 %v1208_v48, %v9928_v56  ;;  %8144 = vmatpush3.msk.msra.mxu0 %vm457_vm1, %v6763_v47  ;;  %7970 = vmatprep.mubr.msk.f32.mxu0 %vm9067_vm0, %v9066_v0  ;;  %v2414_v47 = vld [vmem:[%s9192_s9 + $0x38] sm:$0xff] }
 0x198   : > { %v7643_v38 = vpop.f32.mrf.mxu0  ;;  %8077 = vmatprep.mubr.msk.f32.mxu1 %vm9067_vm0, %v9066_v0  ;;  %v7750_v58 = vpop.f32.mrf.mxu1 }
 0x199   : > { %v10336_v40 = vadd.f32 %v10231_v21, %v1312_v4  ;;  %v2415_v38 = vld [vmem:[%s9192_s9 + $0x40] sm:$0xff]  ;;  %v2781_v58 = vld [vmem:[%s9192_s9 + $0x71] sm:$0xff] }
 0x19a   : > { %v1213_v56 = vpop.f32.mrf.mxu0  ;;  %7971 = vmatmul.mubr.msk.f32.gmra.mxu0 %vm369_vm2, %v2412_v49  ;;  %v10346_v46 = vpop.f32.mrf.mxu1  ;;  %8078 = vmatmul.mubr.msk.f32.gmra.mxu1 %vm369_vm2, %v2778_v42 }
 0x19b   : > { %v1313_v54 = vadd.f32 %v1213_v56, %v12277_v61  ;;  %7973 = vmatprep.mubr.msk.f32.mxu0 %vm9067_vm0, %v9066_v0  ;;  %8080 = vmatprep.mubr.msk.f32.mxu1 %vm9067_vm0, %v9066_v0 }
 0x19c   : > { %v7646_v63 = vpop.f32.mrf.mxu0  ;;  %v7753_v39 = vpop.f32.mrf.mxu1 }
 0x19d   : > { %v10350_v21 = vadd.f32 %v10248_v33, %v1313_v54 }
 0x19e   : > { %v1218_v25 = vpop.f32.mrf.mxu0  ;;  %7974 = vmatmul.mubr.msk.f32.gmra.mxu0 %vm369_vm2, %v2413_v7  ;;  %v10360_v48 = vpop.f32.mrf.mxu1  ;;  %8081 = vmatmul.mubr.msk.f32.gmra.mxu1 %vm369_vm2, %v2779_v55  ;;  %v2416_v7 = vld [vmem:[%s9192_s9 + $0x48] sm:$0xff] }
 0x19f   : > { %v1314_v14 = vadd.f32 %v1218_v25, %v9954_v60  ;;  %7976 = vmatprep.mubr.msk.f32.mxu0 %vm9067_vm0, %v9066_v0  ;;  %8083 = vmatprep.mubr.msk.f32.mxu1 %vm9067_vm0, %v9066_v0  ;;  %v2782_v25 = vld [vmem:[%s9192_s9 + $0x79] sm:$0xff] }
 0x1a0   : > { %v7649_v62 = vpop.f32.mrf.mxu0  ;;  %v7756_v60 = vpop.f32.mrf.mxu1 }
 0x1a1   : > { %v10364_v33 = vadd.f32 %v10265_v12, %v1314_v14 }
 0x1a2   : > { %v1223_v4 = vpop.f32.mrf.mxu0  ;;  %7977 = vmatmul.mubr.msk.f32.gmra.mxu0 %vm369_vm2, %v2414_v47  ;;  %v10374_v56 = vpop.f32.mrf.mxu1  ;;  %8084 = vmatmul.mubr.msk.f32.gmra.mxu1 %vm369_vm2, %v2780_v45  ;;  %v2417_v47 = vld [vmem:[%s9192_s9 + $0x50] sm:$0xff] }
 0x1a3   : > { %v1315_v49 = vadd.f32 %v1223_v4, %v9967_v8  ;;  %7979 = vmatprep.mubr.msk.f32.mxu0 %vm9067_vm0, %v9066_v0  ;;  %8086 = vmatprep.mubr.msk.f32.mxu1 %vm9067_vm0, %v9066_v0  ;;  %v2783_v4 = vld [vmem:[%s9192_s9 + $0x81] sm:$0xff] }
 0x1a4   : > { %v7652_v42 = vpop.f32.mrf.mxu0  ;;  %v7759_v8 = vpop.f32.mrf.mxu1 }
 0x1a5   : > { %v10378_v12 = vadd.f32 %v10282_v17, %v1315_v49 }
 0x1a6   : > { %v1228_v61 = vpop.f32.mrf.mxu0  ;;  %7980 = vmatmul.mubr.msk.f32.gmra.mxu0 %vm369_vm2, %v2415_v38  ;;  %v10388_v55 = vpop.f32.mrf.mxu1  ;;  %8087 = vmatmul.mubr.msk.f32.gmra.mxu1 %vm369_vm2, %v2781_v58  ;;  %v2418_v38 = vld [vmem:[%s9192_s9 + $0x58] sm:$0xff] }
 0x1a7   : > { %v1316_v54 = vadd.f32 %v1228_v61, %v9979_v50  ;;  %7982 = vmatprep.mubr.msk.f32.mxu0 %vm9067_vm0, %v9066_v0  ;;  %8089 = vmatprep.mubr.msk.f32.mxu1 %vm9067_vm0, %v9066_v0  ;;  %v2784_v61 = vld [vmem:[%s9192_s9 + $0x89] sm:$0xff] }
 0x1a8   : > { %v7655_v63 = vpop.f32.mrf.mxu0  ;;  %v7762_v50 = vpop.f32.mrf.mxu1 }
 0x1a9   : > { %v10392_v17 = vadd.f32 %v10299_v59, %v1316_v54 }
 0x1aa   : > { %v1233_v39 = vpop.f32.mrf.mxu0  ;;  %7983 = vmatmul.mubr.msk.f32.gmra.mxu0 %vm369_vm2, %v2416_v7  ;;  %v10402_v45 = vpop.f32.mrf.mxu1  ;;  %8090 = vmatmul.mubr.msk.f32.gmra.mxu1 %vm369_vm2, %v2782_v25  ;;  %v2419_v7 = vld [vmem:[%s9192_s9 + $0x60] sm:$0xff] }
 0x1ab   : > { %v1317_v14 = vadd.f32 %v1233_v39, %v9989_v9  ;;  %7985 = vmatprep.mubr.msk.f32.mxu0 %vm9067_vm0, %v9066_v0  ;;  %8092 = vmatprep.mubr.msk.f32.mxu1 %vm9067_vm0, %v9066_v0  ;;  %v2785_v39 = vld [vmem:[%s9192_s9 + $0x91] sm:$0xff] }
 0x1ac   : > { %v7658_v62 = vpop.f32.mrf.mxu0  ;;  %v7765_v9 = vpop.f32.mrf.mxu1 }
 0x1ad   : > { %v10406_v59 = vadd.f32 %v10317_v41, %v1317_v14 }
 0x1ae   : > { %v1238_v60 = vpop.f32.mrf.mxu0  ;;  %7986 = vmatmul.mubr.msk.f32.gmra.mxu0 %vm369_vm2, %v2417_v47  ;;  %v10416_v58 = vpop.f32.mrf.mxu1  ;;  %8093 = vmatmul.mubr.msk.f32.gmra.mxu1 %vm369_vm2, %v2783_v4  ;;  %v2420_v47 = vld [vmem:[%s9192_s9 + $0x68] sm:$0xff] }
 0x1af   : > { %v1318_v49 = vadd.f32 %v1238_v60, %v9999_v11  ;;  %7988 = vmatprep.mubr.msk.f32.mxu0 %vm9067_vm0, %v9066_v0  ;;  %8095 = vmatprep.mubr.msk.f32.mxu1 %vm9067_vm0, %v9066_v0  ;;  %v2786_v60 = vld [vmem:[%s9192_s9 + $0x99] sm:$0xff] }
 0x1b0   : > { %v7661_v42 = vpop.f32.mrf.mxu0  ;;  %v7768_v11 = vpop.f32.mrf.mxu1 }
 0x1b1   : > { %v10420_v41 = vadd.f32 %v10332_v29, %v1318_v49 }
 0x1b2   : > { %v1243_v8 = vpop.f32.mrf.mxu0  ;;  %7989 = vmatmul.mubr.msk.f32.gmra.mxu0 %vm369_vm2, %v2418_v38  ;;  %v10430_v25 = vpop.f32.mrf.mxu1  ;;  %8096 = vmatmul.mubr.msk.f32.gmra.mxu1 %vm369_vm2, %v2784_v61  ;;  %v2421_v38 = vld [vmem:[%s9192_s9 + $0x70] sm:$0xff] }
 0x1b3   : > { %v1319_v54 = vadd.f32 %v1243_v8, %v10009_v13  ;;  %7991 = vmatprep.mubr.msk.f32.mxu0 %vm9067_vm0, %v9066_v0  ;;  %8098 = vmatprep.mubr.msk.f32.mxu1 %vm9067_vm0, %v9066_v0  ;;  %v2787_v8 = vld [vmem:[%s9192_s9 + $0xa1] sm:$0xff] }
 0x1b4   : > { %v7664_v63 = vpop.f32.mrf.mxu0  ;;  %v7771_v13 = vpop.f32.mrf.mxu1 }
 0x1b5   : > { %v10434_v29 = vadd.f32 %v10346_v46, %v1319_v54 }
 0x1b6   : > { %v1248_v50 = vpop.f32.mrf.mxu0  ;;  %7992 = vmatmul.mubr.msk.f32.gmra.mxu0 %vm369_vm2, %v2419_v7  ;;  %v10444_v4 = vpop.f32.mrf.mxu1  ;;  %8099 = vmatmul.mubr.msk.f32.gmra.mxu1 %vm369_vm2, %v2785_v39  ;;  %v2422_v7 = vld [vmem:[%s9192_s9 + $0x78] sm:$0xff] }
 0x1b7   : > { %v1320_v14 = vadd.f32 %v1248_v50, %v10019_v16  ;;  %7994 = vmatprep.mubr.msk.f32.mxu0 %vm9067_vm0, %v9066_v0  ;;  %8101 = vmatprep.mubr.msk.f32.mxu1 %vm9067_vm0, %v9066_v0  ;;  %v2788_v50 = vld [vmem:[%s9192_s9 + $0xa9] sm:$0xff] }
 0x1b8   : > { %v7667_v62 = vpop.f32.mrf.mxu0  ;;  %v7774_v16 = vpop.f32.mrf.mxu1 }
 0x1b9   : > { %v10448_v46 = vadd.f32 %v10360_v48, %v1320_v14 }
 0x1ba   : > { %v1253_v9 = vpop.f32.mrf.mxu0  ;;  %7995 = vmatmul.mubr.msk.f32.gmra.mxu0 %vm369_vm2, %v2420_v47  ;;  %v10458_v61 = vpop.f32.mrf.mxu1  ;;  %8102 = vmatmul.mubr.msk.f32.gmra.mxu1 %vm369_vm2, %v2786_v60  ;;  %v2423_v47 = vld [vmem:[%s9192_s9 + $0x80] sm:$0xff] }
 0x1bb   : > { %v1321_v49 = vadd.f32 %v1253_v9, %v10029_v18  ;;  %7997 = vmatprep.mubr.msk.f32.mxu0 %vm9067_vm0, %v9066_v0  ;;  %8104 = vmatprep.mubr.msk.f32.mxu1 %vm9067_vm0, %v9066_v0 }
 0x1bc   : > { %v7670_v42 = vpop.f32.mrf.mxu0  ;;  %v7777_v18 = vpop.f32.mrf.mxu1 }
 0x1bd   : > { %v10462_v48 = vadd.f32 %v10374_v56, %v1321_v49  ;;  %v2424_v49 = vld [vmem:[%s9192_s9 + $0x88] sm:$0xff]  ;;  %v2425_v18 = vld [vmem:[%s9192_s9 + $0x90] sm:$0xff] }
 0x1be   : > { %v1258_v11 = vpop.f32.mrf.mxu0  ;;  %7998 = vmatmul.mubr.msk.f32.gmra.mxu0 %vm369_vm2, %v2421_v38  ;;  %v10472_v39 = vpop.f32.mrf.mxu1  ;;  %8105 = vmatmul.mubr.msk.f32.gmra.mxu1 %vm369_vm2, %v2787_v8 }
 0x1bf   : > { %v1322_v54 = vadd.f32 %v1258_v11, %v10039_v20  ;;  %8000 = vmatprep.mubr.msk.f32.mxu0 %vm9067_vm0, %v9066_v0  ;;  %8107 = vmatprep.mubr.msk.f32.mxu1 %vm9067_vm0, %v9066_v0 }
 0x1c0   : > { %v7673_v63 = vpop.f32.mrf.mxu0  ;;  %v7780_v20 = vpop.f32.mrf.mxu1 }
 0x1c1   : > { %v10476_v56 = vadd.f32 %v10388_v55, %v1322_v54 }
 0x1c2   : > { %v1263_v13 = vpop.f32.mrf.mxu0  ;;  %8001 = vmatmul.mubr.msk.f32.gmra.mxu0 %vm369_vm2, %v2422_v7  ;;  %v10486_v60 = vpop.f32.mrf.mxu1  ;;  %8108 = vmatmul.mubr.msk.f32.gmra.mxu1 %vm369_vm2, %v2788_v50  ;;  %v2426_v50 = vld [vmem:[%s9192_s9 + $0x98] sm:$0xff] }
 0x1c3   : > { %v1323_v14 = vadd.f32 %v1263_v13, %v10049_v22  ;;  %8003 = vmatprep.mubr.msk.f32.mxu0 %vm9067_vm0, %v9066_v0  ;;  %8110 = vmatprep.mubr.msk.f32.mxu1 %vm9067_vm0, %v9066_v0 }
 0x1c4   : > { %v7676_v62 = vpop.f32.mrf.mxu0  ;;  %v7783_v22 = vpop.f32.mrf.mxu1 }
 0x1c5   : > { %v10490_v55 = vadd.f32 %v10402_v45, %v1323_v14 }
 0x1c6   : > { %v1268_v9 = vpop.f32.mrf.mxu0  ;;  %8004 = vmatmul.mubr.msk.f32.gmra.mxu0 %vm369_vm2, %v2423_v47  ;;  %v10499_v42 = vpop.f32.mrf.mxu1  ;;  %8111 = vmatmul.mubr.msk.f32.gmra.mxu1 %vm369_vm2, %v10163_v37  ;;  %v2427_v47 = vld [vmem:[%s9192_s9 + $0xa0] sm:$0xff] }
 0x1c7   : > { %v1324_v16 = vadd.f32 %v1268_v9, %v10059_v24  ;;  %8006 = vmatprep.mubr.msk.f32.mxu0 %vm9067_vm0, %v9066_v0  ;;  %8113 = vmatprep.mubr.msk.f32.mxu1 %vm9067_vm0, %v9066_v0 }
 0x1c8   : > { %v7679_v38 = vpop.f32.mrf.mxu0  ;;  %v7786_v24 = vpop.f32.mrf.mxu1 }
 0x1c9   : > { %v10504_v45 = vadd.f32 %v10416_v58, %v1324_v16  ;;  %v2428_v16 = vld [vmem:[%s9192_s9 + $0xa8] sm:$0xff]  ;;  %v2429_v24 = vld [vmem:[%s9192_s9 + $0xb0] sm:$0xff] }
 0x1ca   : > { %v1273_v8 = vpop.f32.mrf.mxu0  ;;  %8007 = vmatmul.mubr.msk.f32.gmra.mxu0 %vm369_vm2, %v2424_v49  ;;  %v10513_v7 = vpop.f32.mrf.mxu1  ;;  %8114 = vmatmul.mubr.msk.f32.gmra.mxu1 %vm369_vm2, %v10179_v51 }
 0x1cb   : > { %v1325_v11 = vadd.f32 %v1273_v8, %v10069_v26  ;;  %8009 = vmatprep.mubr.msk.f32.mxu0 %vm9067_vm0, %v9066_v0  ;;  %8116 = vmatprep.mubr.msk.f32.mxu1 %vm9067_vm0, %v9066_v0 }
 0x1cc   : > { %v7682_v54 = vpop.f32.mrf.mxu0  ;;  %v7880_v26 = vpop.f32.mrf.mxu1 }
 0x1cd   : > { %v10518_v37 = vadd.f32 %v10430_v25, %v1325_v11 }
 0x1ce   : > { %v1278_v58 = vpop.f32.mrf.mxu0  ;;  %8010 = vmatmul.mubr.msk.f32.gmra.mxu0 %vm369_vm2, %v2425_v18  ;;  %v10527_v20 = vpop.f32.mrf.mxu1  ;;  %8117 = vmatmul.mubr.msk.f32.gmra.mxu1 %vm369_vm2, %v10196_v3 }
 0x1cf   : > { %v1326_v63 = vadd.f32 %v1278_v58, %v10079_v28  ;;  %8012 = vmatprep.mubr.msk.f32.mxu0 %vm9067_vm0, %v9066_v0  ;;  %8119 = vmatprep.mubr.msk.f32.mxu1 %vm9067_vm0, %v9066_v0  ;;  %v2430_v58 = vld [vmem:[%s9192_s9 + $0xb8] sm:$0xff] }
 0x1d0   : > { %v7685_v13 = vpop.f32.mrf.mxu0  ;;  %v7883_v28 = vpop.f32.mrf.mxu1 }
 0x1d1   : > { %v10532_v51 = vadd.f32 %v10444_v4, %v1326_v63  ;;  %v2431_v13 = vld [vmem:[%s9192_s9 + $0xc0] sm:$0xff] }
 0x1d2   : > { %v1283_v25 = vpop.f32.mrf.mxu0  ;;  %8013 = vmatmul.mubr.msk.f32.gmra.mxu0 %vm369_vm2, %v2426_v50  ;;  %v10541_v9 = vpop.f32.mrf.mxu1  ;;  %8120 = vmatmul.mubr.msk.f32.gmra.mxu1 %vm369_vm2, %v10212_v15 }
 0x1d3   : > { %v1327_v14 = vadd.f32 %v1283_v25, %v10089_v30  ;;  %8015 = vmatprep.mubr.msk.f32.mxu0 %vm9067_vm0, %v9066_v0  ;;  %8122 = vmatprep.mubr.msk.f32.mxu1 %vm9067_vm0, %v9066_v0 }
 0x1d4   : > { %v7688_v62 = vpop.f32.mrf.mxu0  ;;  %v7886_v30 = vpop.f32.mrf.mxu1 }
 0x1d5   : > { %v10546_v3 = vadd.f32 %v10458_v61, %v1327_v14 }
 0x1d6   : > { %v1288_v4 = vpop.f32.mrf.mxu0  ;;  %8016 = vmatmul.mubr.msk.f32.gmra.mxu0 %vm369_vm2, %v2427_v47  ;;  %v10555_v38 = vpop.f32.mrf.mxu1  ;;  %8123 = vmatmul.mubr.msk.f32.gmra.mxu1 %vm369_vm2, %v10229_v23  ;;  %v2432_v47 = vld [vmem:[%s9192_s9 + $0xc8] sm:$0xff] }
 0x1d7   : > { %v1328_v22 = vadd.f32 %v1288_v4, %v10099_v32  ;;  %8018 = vmatprep.mubr.msk.f32.mxu0 %vm9067_vm0, %v9066_v0  ;;  %8125 = vmatprep.mubr.msk.f32.mxu1 %vm9067_vm0, %v9066_v0 }
 0x1d8   : > { %v7691_v49 = vpop.f32.mrf.mxu0  ;;  %v7889_v32 = vpop.f32.mrf.mxu1 }
 0x1d9   : > { %v10560_v15 = vadd.f32 %v10472_v39, %v1328_v22 }
 0x1da   : > { %v1293_v61 = vpop.f32.mrf.mxu0  ;;  %8019 = vmatmul.mubr.msk.f32.gmra.mxu0 %vm369_vm2, %v2428_v16  ;;  %v10569_v18 = vpop.f32.mrf.mxu1  ;;  %8126 = vmatmul.mubr.msk.f32.gmra.mxu1 %vm369_vm2, %v10246_v52  ;;  %v2433_v16 = vld [vmem:[%s9192_s9 + $0xd0] sm:$0xff] }
 0x1db   : > { %v1329_v8 = vadd.f32 %v1293_v61, %v10109_v34  ;;  %8021 = vmatprep.mubr.msk.f32.mxu0 %vm9067_vm0, %v9066_v0  ;;  %8128 = vmatprep.mubr.msk.f32.mxu1 %vm9067_vm0, %v9066_v0  ;;  %v2799_v61 = vld [vmem:[%s9192_s9 + $0x101] sm:$0xff] }
 0x1dc   : > { %v7694_v11 = vpop.f32.mrf.mxu0  ;;  %v7892_v34 = vpop.f32.mrf.mxu1 }
 0x1dd   : > { %v10574_v23 = vadd.f32 %v10486_v60, %v1329_v8 }
 0x1de   : > { %v1298_v39 = vpop.f32.mrf.mxu0  ;;  %8022 = vmatmul.mubr.msk.f32.gmra.mxu0 %vm369_vm2, %v2429_v24  ;;  %v10583_v63 = vpop.f32.mrf.mxu1  ;;  %8129 = vmatmul.mubr.msk.f32.gmra.mxu1 %vm369_vm2, %v10263_v1  ;;  %v2434_v24 = vld [vmem:[%s9192_s9 + $0xd8] sm:$0xff] }
 0x1df   : > { %v1330_v54 = vadd.f32 %v1298_v39, %v10119_v36  ;;  %8024 = vmatprep.mubr.msk.f32.mxu0 %vm9067_vm0, %v9066_v0  ;;  %8131 = vmatprep.mubr.msk.f32.mxu1 %vm9067_vm0, %v9066_v0 }
 0x1e0   : > { %v7697_v26 = vpop.f32.mrf.mxu0  ;;  %v7895_v36 = vpop.f32.mrf.mxu1 }
 0x1e1   : > { %v10588_v52 = vadd.f32 %v10499_v42, %v1330_v54 }
 0x1e2   : > { %v1878_v60 = vpop.f32.mrf.mxu0  ;;  %8025 = vmatmul.mubr.msk.f32.gmra.mxu0 %vm369_vm2, %v2430_v58  ;;  %v10597_v1 = vpop.f32.mrf.mxu1  ;;  %8132 = vmatmul.mubr.msk.f32.gmra.mxu1 %vm369_vm2, %v10280_v57 }
 0x1e3   : > { %v2022_v50 = vadd.f32 %v1878_v60, %v10170_v2  ;;  %8027 = vmatprep.mubr.msk.f32.mxu0 %vm9067_vm0, %v9066_v0  ;;  %8134 = vmatprep.mubr.msk.f32.mxu1 %vm9067_vm0, %v9066_v0 }
 0x1e4   : > { %v7791_v25 = vpop.f32.mrf.mxu0  ;;  %v7898_v2 = vpop.f32.mrf.mxu1 }
 0x1e5   : > { %v10602_v42 = vadd.f32 %v10513_v7, %v2022_v50  ;;  %v2798_v7 = vld [vmem:[%s9192_s9 + $0xf9] sm:$0xff] }
 0x1e6   : > { %v1883_v28 = vpop.f32.mrf.mxu0  ;;  %8028 = vmatmul.mubr.msk.f32.gmra.mxu0 %vm369_vm2, %v2431_v13  ;;  %v2273_v4 = vpop.f32.mrf.mxu1  ;;  %8135 = vmatmul.mubr.msk.f32.gmra.mxu1 %vm369_vm2, %v10297_v44 }
 0x1e7   : > { %v2023_v14 = vadd.f32 %v1883_v28, %v10186_v35  ;;  %8030 = vmatprep.mubr.msk.f32.mxu0 %vm9067_vm0, %v9066_v0  ;;  %8137 = vmatprep.mubr.msk.f32.mxu1 %vm9067_vm0, %v9066_v0 }
 0x1e8   : > { %v7794_v62 = vpop.f32.mrf.mxu0  ;;  %v7901_v35 = vpop.f32.mrf.mxu1 }
 0x1e9   : > { %v10614_v57 = vadd.f32 %v10527_v20, %v2023_v14 }
 0x1ea   : > { %v1888_v30 = vpop.f32.mrf.mxu0  ;;  %8031 = vmatmul.mubr.msk.f32.gmra.mxu0 %vm369_vm2, %v2432_v47  ;;  %v2278_v44 = vpop.f32.mrf.mxu1  ;;  %8138 = vmatmul.mubr.msk.f32.gmra.mxu1 %vm369_vm2, %v2798_v7 }
 0x1eb   : > { %v2024_v22 = vadd.f32 %v1888_v30, %v10201_v19  ;;  %8033 = vmatprep.mubr.msk.f32.mxu0 %vm9067_vm0, %v9066_v0  ;;  %8140 = vmatprep.mubr.msk.f32.mxu1 %vm9067_vm0, %v9066_v0 }
 0x1ec   : > { %v7797_v49 = vpop.f32.mrf.mxu0  ;;  %v7904_v19 = vpop.f32.mrf.mxu1 }
 0x1ed   : > { %v10626_v20 = vadd.f32 %v10541_v9, %v2024_v22 }
 0x1ee   : > { %v1893_v32 = vpop.f32.mrf.mxu0  ;;  %8034 = vmatmul.mubr.msk.f32.gmra.mxu0 %vm369_vm2, %v2433_v16  ;;  %v2283_v39 = vpop.f32.mrf.mxu1  ;;  %8141 = vmatmul.mubr.msk.f32.gmra.mxu1 %vm369_vm2, %v2799_v61 }
 0x1ef   : > { %v2025_v8 = vadd.f32 %v1893_v32, %v10218_v53  ;;  %8036 = vmatprep.mubr.msk.f32.mxu0 %vm9067_vm0, %v9066_v0  ;;  %v2435_v53 = vld [vmem:[%s9192_s9 + $0xe0] sm:$0xff] }
 0x1f0   : > { %v7800_v11 = vpop.f32.mrf.mxu0  ;;  %v7907_v54 = vpop.f32.mrf.mxu1 }
 0x1f1   : > { %v10638_v9 = vadd.f32 %v10555_v38, %v2025_v8  ;;  %v2439_v8 = vld [vmem:[%s9192_s9 + $0x100] sm:$0xff] }
 0x1f2   : > { %v1898_v34 = vpop.f32.mrf.mxu0  ;;  %8037 = vmatmul.mubr.msk.f32.gmra.mxu0 %vm369_vm2, %v2434_v24  ;;  %v2288_v60 = vpop.f32.mrf.mxu1 }
 0x1f3   : > { %v2026_v58 = vadd.f32 %v1898_v34, %v10235_v43  ;;  %8039 = vmatprep.mubr.msk.f32.mxu0 %vm9067_vm0, %v9066_v0  ;;  %v2436_v43 = vld [vmem:[%s9192_s9 + $0xe8] sm:$0xff] }
 0x1f4   : > { %v7803_v26 = vpop.f32.mrf.mxu0  ;;  %v7910_v38 = vpop.f32.mrf.mxu1 }
 0x1f5   : > { %v10646_v36 = vadd.f32 %v10569_v18, %v2026_v58  ;;  %v3131_v58 = vld [vmem:[%s9192_s9 + $0x22] sm:$0xff] }
 0x1f6   : > { %v1903_v50 = vpop.f32.mrf.mxu0  ;;  %8040 = vmatmul.mubr.msk.f32.gmra.mxu0 %vm369_vm2, %v2435_v53  ;;  %v2293_v28 = vpop.f32.mrf.mxu1 }
 0x1f7   : > { %v2027_v13 = vadd.f32 %v1903_v50, %v10252_v6  ;;  %8042 = vmatprep.mubr.msk.f32.mxu0 %vm9067_vm0, %v9066_v0  ;;  %v2437_v6 = vld [vmem:[%s9192_s9 + $0xf0] sm:$0xff] }
 0x1f8   : > { %v7806_v25 = vpop.f32.mrf.mxu0  ;;  %v7913_v18 = vpop.f32.mrf.mxu1 }
 0x1f9   : > { %v10654_v2 = vadd.f32 %v10583_v63, %v2027_v13  ;;  %v3132_v13 = vld [vmem:[%s9192_s9 + $0x2a] sm:$0xff] }
 0x1fa   : > { %v1908_v14 = vpop.f32.mrf.mxu0  ;;  %8043 = vmatmul.mubr.msk.f32.gmra.mxu0 %vm369_vm2, %v2436_v43  ;;  %v2298_v7 = vpop.f32.mrf.mxu1 }
 0x1fb   : > { %v2028_v47 = vadd.f32 %v1908_v14, %v10269_v10  ;;  %8045 = vmatprep.mubr.msk.f32.mxu0 %vm9067_vm0, %v9066_v0  ;;  %v2438_v10 = vld [vmem:[%s9192_s9 + $0xf8] sm:$0xff] }
 0x1fc   : > { %v7809_v62 = vpop.f32.mrf.mxu0  ;;  %v7916_v63 = vpop.f32.mrf.mxu1 }
 0x1fd   : > { %v10662_v30 = vadd.f32 %v10597_v1, %v2028_v47  ;;  %v3133_v47 = vld [vmem:[%s9192_s9 + $0x32] sm:$0xff] }
 0x1fe   : > { %v1913_v35 = vpop.f32.mrf.mxu0  ;;  %8046 = vmatmul.mubr.msk.f32.gmra.mxu0 %vm369_vm2, %v2437_v6  ;;  %v2303_v49 = vpop.f32.mrf.mxu1 }
 0x1ff   : > { %v2029_v22 = vadd.f32 %v1913_v35, %v10286_v5  ;;  %8048 = vmatprep.mubr.msk.f32.mxu0 %vm9067_vm0, %v9066_v0 }
 0x200   : > { %v7812_v16 = vpop.f32.mrf.mxu0  ;;  %v7919_v1 = vpop.f32.mrf.mxu1 }
 0x201   : > { %v10669_v61 = vadd.f32 %v2273_v4, %v2029_v22  ;;  %v3134_v22 = vld [vmem:[%s9192_s9 + $0x3a] sm:$0xff] }
 0x202   : > { %v1918_v32 = vpop.f32.mrf.mxu0  ;;  %8049 = vmatmul.mubr.msk.f32.gmra.mxu0 %vm369_vm2, %v2438_v10  ;;  %v2308_v24 = vpop.f32.mrf.mxu1 }
 0x203   : > { %v2030_v19 = vadd.f32 %v1918_v32, %v10303_v31  ;;  %8051 = vmatprep.mubr.msk.f32.mxu0 %vm9067_vm0, %v9066_v0 }
 0x204   : > { %v7815_v5 = vpop.f32.mrf.mxu0  ;;  %v7922_v4 = vpop.f32.mrf.mxu1 }
 0x205   : > { %v10676_v11 = vadd.f32 %v2278_v44, %v2030_v19 }
 0x206   : > { %v1923_v34 = vpop.f32.mrf.mxu0  ;;  %8052 = vmatmul.mubr.msk.f32.gmra.mxu0 %vm369_vm2, %v2439_v8  ;;  %v2313_v53 = vpop.f32.mrf.mxu1 }
 0x207   : > { %v2031_v54 = vadd.f32 %v1923_v34, %v10321_v27  ;;  %8145 = vmatprep.mubr.msk.f32.mxu0 %vm9067_vm0, %v9066_v0  ;;  %v3665_v34 = vld [vmem:[#allocation3 + $0xf8] sm:$0xff] }
 0x208   : > { %v7818_v31 = vpop.f32.mrf.mxu0  ;;  %v7925_v44 = vpop.f32.mrf.mxu1  ;;  %8232 = vmatprep.subr.mxu1 %v3665_v34 }
 0x209   : > { %v10683_v26 = vadd.f32 %v2283_v39, %v2031_v54  ;;  %8233 = vmatpush3.msra.mxu1 %v3665_v34 }
 0x20a   : > { %v1928_v50 = vpop.f32.mrf.mxu0  ;;  %8146 = vmatmul.mubr.msk.f32.vlgmr.msra.gmra.mxu0 %vm369_vm2, %v3131_v58  ;;  %v2318_v43 = vpop.f32.mrf.mxu1 }
 0x20b   : > { %v2032_v38 = vadd.f32 %v1928_v50, %v10336_v40  ;;  %8148 = vmatprep.mubr.msk.f32.mxu0 %vm9067_vm0, %v9066_v0 }
 0x20c   : > { %v7821_v27 = vpop.f32.mrf.mxu0  ;;  %v7928_v39 = vpop.f32.mrf.mxu1 }
 0x20d   : > { %v10690_v25 = vadd.f32 %v2288_v60, %v2032_v38  ;;  %v3664_v39 = vld [vmem:[#allocation3 + $0xf0] sm:$0xff] }
 0x20e   : > { %v1933_v14 = vpop.f32.mrf.mxu0  ;;  %8149 = vmatmul.mubr.msk.f32.gmra.mxu0 %vm369_vm2, %v3132_v13  ;;  %v2323_v6 = vpop.f32.mrf.mxu1  ;;  %8234 = vmatprep.subr.mxu1 %v3664_v39 }
 0x20f   : > { %v2033_v18 = vadd.f32 %v1933_v14, %v10350_v21  ;;  %8151 = vmatprep.mubr.msk.f32.mxu0 %vm9067_vm0, %v9066_v0  ;;  %8235 = vmatpush3.msra.mxu1 %v3664_v39 }
 0x210   : > { %v7824_v40 = vpop.f32.mrf.mxu0  ;;  %v7931_v60 = vpop.f32.mrf.mxu1 }
 0x211   : > { %v10697_v62 = vadd.f32 %v2293_v28, %v2033_v18 }
 0x212   : > { %v1938_v35 = vpop.f32.mrf.mxu0  ;;  %8152 = vmatmul.mubr.msk.f32.gmra.mxu0 %vm369_vm2, %v3133_v47  ;;  %v10704_v10 = vpop.f32.mrf.mxu1 }
 0x213   : > { %v2034_v63 = vadd.f32 %v1938_v35, %v10364_v33  ;;  %8154 = vmatprep.mubr.msk.f32.mxu0 %vm9067_vm0, %v9066_v0  ;;  %v3135_v33 = vld [vmem:[%s9192_s9 + $0x42] sm:$0xff] }
 0x214   : > { %v7827_v21 = vpop.f32.mrf.mxu0  ;;  %v7934_v28 = vpop.f32.mrf.mxu1 }
 0x215   : > { %v10706_v16 = vadd.f32 %v2298_v7, %v2034_v63 }
 0x216   : > { %v1943_v32 = vpop.f32.mrf.mxu0  ;;  %8155 = vmatmul.mubr.msk.f32.gmra.mxu0 %vm369_vm2, %v3134_v22  ;;  %v10713_v8 = vpop.f32.mrf.mxu1 }
 0x217   : > { %v2035_v1 = vadd.f32 %v1943_v32, %v10378_v12  ;;  %8157 = vmatprep.mubr.msk.f32.mxu0 %vm9067_vm0, %v9066_v0  ;;  %v3136_v12 = vld [vmem:[%s9192_s9 + $0x4a] sm:$0xff] }
 0x218   : > { %v7830_v19 = vpop.f32.mrf.mxu0  ;;  %v7937_v7 = vpop.f32.mrf.mxu1 }
 0x219   : > { %v10715_v5 = vadd.f32 %v2303_v49, %v2035_v1  ;;  %v3663_v1 = vld [vmem:[#allocation3 + $0xe8] sm:$0xff] }
 0x21a   : > { %v1948_v4 = vpop.f32.mrf.mxu0  ;;  %8158 = vmatmul.mubr.msk.f32.gmra.mxu0 %vm369_vm2, %v3135_v33  ;;  %v10722_v31 = vpop.f32.mrf.mxu1  ;;  %8236 = vmatprep.subr.mxu1 %v3663_v1 }
 0x21b   : > { %v2036_v54 = vadd.f32 %v1948_v4, %v10392_v17  ;;  %8160 = vmatprep.mubr.msk.f32.mxu0 %vm9067_vm0, %v9066_v0  ;;  %v3137_v17 = vld [vmem:[%s9192_s9 + $0x52] sm:$0xff]  ;;  %8237 = vmatpush3.msra.mxu1 %v3663_v1 }
 0x21c   : > { %v7833_v58 = vpop.f32.mrf.mxu0  ;;  %v7940_v44 = vpop.f32.mrf.mxu1 }
 0x21d   : > { %v10724_v50 = vadd.f32 %v2308_v24, %v2036_v54  ;;  %v3662_v58 = vld [vmem:[#allocation3 + $0xe0] sm:$0xff] }
 0x21e   : > { %v1953_v49 = vpop.f32.mrf.mxu0  ;;  %8161 = vmatmul.mubr.msk.f32.gmra.mxu0 %vm369_vm2, %v3136_v12  ;;  %v10731_v27 = vpop.f32.mrf.mxu1  ;;  %8238 = vmatprep.subr.mxu1 %v3662_v58 }
 0x21f   : > { %v2037_v38 = vadd.f32 %v1953_v49, %v10406_v59  ;;  %8163 = vmatprep.mubr.msk.f32.mxu0 %vm9067_vm0, %v9066_v0  ;;  %v3138_v59 = vld [vmem:[%s9192_s9 + $0x5a] sm:$0xff]  ;;  %8239 = vmatpush3.msra.mxu1 %v3662_v58 }
 0x220   : > { %v7836_v13 = vpop.f32.mrf.mxu0  ;;  %v7943_v24 = vpop.f32.mrf.mxu1 }
 0x221   : > { %v10733_v14 = vadd.f32 %v2313_v53, %v2037_v38  ;;  %v3142_v13 = vld [vmem:[%s9192_s9 + $0x7a] sm:$0xff] }
 0x222   : > { %v1958_v18 = vpop.f32.mrf.mxu0  ;;  %8164 = vmatmul.mubr.msk.f32.gmra.mxu0 %vm369_vm2, %v3137_v17  ;;  %v10740_v35 = vpop.f32.mrf.mxu1 }
 0x223   : > { %v2038_v47 = vadd.f32 %v1958_v18, %v10420_v41  ;;  %8166 = vmatprep.mubr.msk.f32.mxu0 %vm9067_vm0, %v9066_v0  ;;  %v3139_v41 = vld [vmem:[%s9192_s9 + $0x62] sm:$0xff] }
 0x224   : > { %v7839_v40 = vpop.f32.mrf.mxu0  ;;  %v7946_v63 = vpop.f32.mrf.mxu1 }
 0x225   : > { %v10742_v60 = vadd.f32 %v2318_v43, %v2038_v47  ;;  %v3661_v40 = vld [vmem:[#allocation3 + $0xd8] sm:$0xff] }
 0x226   : > { %v1963_v53 = vpop.f32.mrf.mxu0  ;;  %8167 = vmatmul.mubr.msk.f32.gmra.mxu0 %vm369_vm2, %v3138_v59  ;;  %v10749_v32 = vpop.f32.mrf.mxu1  ;;  %8240 = vmatprep.subr.mxu1 %v3661_v40 }
 0x227   : > { %v2039_v22 = vadd.f32 %v1963_v53, %v10434_v29  ;;  %8169 = vmatprep.mubr.msk.f32.mxu0 %vm9067_vm0, %v9066_v0  ;;  %v3140_v29 = vld [vmem:[%s9192_s9 + $0x6a] sm:$0xff]  ;;  %8241 = vmatpush3.msra.mxu1 %v3661_v40  ;;  %v3147_v40 = vld [vmem:[%s9192_s9 + $0xa2] sm:$0xff] }
 0x228   : > { %v7842_v21 = vpop.f32.mrf.mxu0  ;;  %v7949_v43 = vpop.f32.mrf.mxu1 }
 0x229   : > { %v10751_v28 = vadd.f32 %v2323_v6, %v2039_v22  ;;  %v3144_v21 = vld [vmem:[%s9192_s9 + $0x8a] sm:$0xff]  ;;  %v4326_v43 = vld [vmem:[#allocation3 + $0x1f8] sm:$0xff] }
 0x22a   : > { %v1968_v33 = vpop.f32.mrf.mxu0  ;;  %8170 = vmatmul.mubr.msk.f32.gmra.mxu0 %vm369_vm2, %v3139_v41  ;;  %v10758_v4 = vpop.f32.mrf.mxu1  ;;  %8436 = vmatprep.subr.mxu0 %v4326_v43 }
 0x22b   : > { %v2040_v19 = vadd.f32 %v1968_v33, %v10448_v46  ;;  %8172 = vmatprep.mubr.msk.f32.mxu0 %vm9067_vm0, %v9066_v0  ;;  %v3141_v46 = vld [vmem:[%s9192_s9 + $0x72] sm:$0xff]  ;;  %8437 = vmatpush3.msra.mxu0 %v4326_v43  ;;  %v3148_v43 = vld [vmem:[%s9192_s9 + $0xaa] sm:$0xff] }
 0x22c   : > { %v7845_v34 = vpop.f32.mrf.mxu0  ;;  %v7952_v54 = vpop.f32.mrf.mxu1 }
 0x22d   : > { %v10761_v6 = vadd.f32 %v10704_v10, %v2040_v19  ;;  %v4325_v34 = vld [vmem:[#allocation3 + $0x1f0] sm:$0xff] }
 0x22e   : > { %v1973_v7 = vpop.f32.mrf.mxu0  ;;  %8173 = vmatmul.mubr.msk.f32.gmra.mxu0 %vm369_vm2, %v3140_v29  ;;  %v10768_v44 = vpop.f32.mrf.mxu1  ;;  %v3660_v54 = vld [vmem:[#allocation3 + $0xd0] sm:$0xff]  ;;  %8438 = vmatprep.subr.mxu0 %v4325_v34 }
 0x22f   : > { %v2041_v12 = vadd.f32 %v1973_v7, %v10462_v48  ;;  %8175 = vmatprep.mubr.msk.f32.mxu0 %vm9067_vm0, %v9066_v0  ;;  %8242 = vmatprep.subr.mxu1 %v3660_v54 }
 0x230   : > { %v7848_v49 = vpop.f32.mrf.mxu0  ;;  %v7955_v17 = vpop.f32.mrf.mxu1  ;;  %8243 = vmatpush3.msra.mxu1 %v3660_v54  ;;  %8439 = vmatpush3.msra.mxu0 %v4325_v34  ;;  %v4318_v54 = vld [vmem:[#allocation3 + $0x1b8] sm:$0xff] }
 0x231   : > { %v10771_v38 = vadd.f32 %v10713_v8, %v2041_v12 }
 0x232   : > { %v1978_v10 = vpop.f32.mrf.mxu0  ;;  %8176 = vmatmul.mubr.msk.f32.gmra.mxu0 %vm369_vm2, %v3141_v46  ;;  %v10778_v18 = vpop.f32.mrf.mxu1 }
 0x233   : > { %v2042_v48 = vadd.f32 %v1978_v10, %v10476_v56  ;;  %8178 = vmatprep.mubr.msk.f32.mxu0 %vm9067_vm0, %v9066_v0  ;;  %v3143_v56 = vld [vmem:[%s9192_s9 + $0x82] sm:$0xff] }
 0x234   : > { %v7851_v39 = vpop.f32.mrf.mxu0  ;;  %v7958_v47 = vpop.f32.mrf.mxu1  ;;  %v4323_v10 = vld [vmem:[#allocation3 + $0x1e0] sm:$0xff] }
 0x235   : > { %v10781_v24 = vadd.f32 %v10722_v31, %v2042_v48  ;;  %v3146_v48 = vld [vmem:[%s9192_s9 + $0x9a] sm:$0xff] }
 0x236   : > { %v1983_v8 = vpop.f32.mrf.mxu0  ;;  %8179 = vmatmul.mubr.msk.f32.gmra.mxu0 %vm369_vm2, %v3142_v13  ;;  %v10788_v63 = vpop.f32.mrf.mxu1  ;;  %v4322_v47 = vld [vmem:[#allocation3 + $0x1d8] sm:$0xff] }
 0x237   : > { %v2043_v59 = vadd.f32 %v1983_v8, %v10490_v55  ;;  %8181 = vmatprep.mubr.msk.f32.mxu0 %vm9067_vm0, %v9066_v0  ;;  %v3659_v8 = vld [vmem:[#allocation3 + $0xc8] sm:$0xff] }
 0x238   : > { %v7854_v53 = vpop.f32.mrf.mxu0  ;;  %v7961_v41 = vpop.f32.mrf.mxu1  ;;  %8244 = vmatprep.subr.mxu1 %v3659_v8 }
 0x239   : > { %v10791_v22 = vadd.f32 %v10731_v27, %v2043_v59  ;;  %8245 = vmatpush3.msra.mxu1 %v3659_v8  ;;  %v4321_v53 = vld [vmem:[#allocation3 + $0x1d0] sm:$0xff] }
 0x23a   : > { %v1988_v31 = vpop.f32.mrf.mxu0  ;;  %8182 = vmatmul.mubr.msk.f32.gmra.mxu0 %vm369_vm2, %v3143_v56  ;;  %v10798_v33 = vpop.f32.mrf.mxu1 }
 0x23b   : > { %v2044_v55 = vadd.f32 %v1988_v31, %v10504_v45  ;;  %8184 = vmatprep.mubr.msk.f32.mxu0 %vm9067_vm0, %v9066_v0  ;;  %v3145_v45 = vld [vmem:[%s9192_s9 + $0x92] sm:$0xff] }
 0x23c   : > { %v7857_v1 = vpop.f32.mrf.mxu0  ;;  %v7964_v29 = vpop.f32.mrf.mxu1 }
 0x23d   : > { %v10801_v19 = vadd.f32 %v10740_v35, %v2044_v55  ;;  %v4324_v35 = vld [vmem:[#allocation3 + $0x1e8] sm:$0xff] }
 0x23e   : > { %v1993_v27 = vpop.f32.mrf.mxu0  ;;  %8185 = vmatmul.mubr.msk.f32.gmra.mxu0 %vm369_vm2, %v3144_v21  ;;  %v10808_v46 = vpop.f32.mrf.mxu1  ;;  %8440 = vmatprep.subr.mxu0 %v4324_v35  ;;  %v4320_v55 = vld [vmem:[#allocation3 + $0x1c8] sm:$0xff] }
 0x23f   : > { %v2045_v7 = vadd.f32 %v1993_v27, %v10518_v37  ;;  %8187 = vmatprep.mubr.msk.f32.mxu0 %vm9067_vm0, %v9066_v0  ;;  %8441 = vmatpush3.msra.mxu0 %v4324_v35  ;;  %v4319_v27 = vld [vmem:[#allocation3 + $0x1c0] sm:$0xff]  ;;  %v3149_v35 = vld [vmem:[%s9192_s9 + $0xb2] sm:$0xff] }
 0x240   : > { %v7860_v12 = vpop.f32.mrf.mxu0  ;;  %v8058_v37 = vpop.f32.mrf.mxu1  ;;  %8442 = vmatprep.subr.mxu0 %v4323_v10 }
 0x241   : > { %v10811_v58 = vadd.f32 %v10749_v32, %v2045_v7  ;;  %8443 = vmatpush3.msra.mxu0 %v4323_v10 }
 0x242   : > { %v1998_v49 = vpop.f32.mrf.mxu0  ;;  %8188 = vmatmul.mubr.msk.f32.gmra.mxu0 %vm369_vm2, %v3145_v45  ;;  %v10818_v39 = vpop.f32.mrf.mxu1  ;;  %8444 = vmatprep.subr.mxu0 %v4322_v47 }
 0x243   : > { %v2046_v17 = vadd.f32 %v1998_v49, %v10532_v51  ;;  %8190 = vmatprep.mubr.msk.f32.mxu0 %vm9067_vm0, %v9066_v0  ;;  %8445 = vmatpush3.msra.mxu0 %v4322_v47  ;;  %v3150_v47 = vld [vmem:[%s9192_s9 + $0xba] sm:$0xff] }
 0x244   : > { %v7863_v13 = vpop.f32.mrf.mxu0  ;;  %v8061_v51 = vpop.f32.mrf.mxu1  ;;  %8446 = vmatprep.subr.mxu0 %v4321_v53 }
 0x245   : > { %v10821_v32 = vadd.f32 %v10758_v4, %v2046_v17  ;;  %8447 = vmatpush3.msra.mxu0 %v4321_v53  ;;  %v4317_v13 = vld [vmem:[#allocation3 + $0x1b0] sm:$0xff]  ;;  %v3655_v51 = vld [vmem:[#allocation3 + $0xa8] sm:$0xff]  ;;  %v3654_v53 = vld [vmem:[#allocation3 + $0xa0] sm:$0xff] }
 0x246   : > { %v2003_v59 = vpop.f32.mrf.mxu0  ;;  %8191 = vmatmul.mubr.msk.f32.gmra.mxu0 %vm369_vm2, %v3146_v48  ;;  %v10828_v4 = vpop.f32.mrf.mxu1  ;;  %8448 = vmatprep.subr.mxu0 %v4320_v55  ;;  %v3656_v48 = vld [vmem:[#allocation3 + $0xb0] sm:$0xff] }
 0x247   : > { %v2047_v56 = vadd.f32 %v2003_v59, %v10546_v3  ;;  %8193 = vmatprep.mubr.msk.f32.mxu0 %vm9067_vm0, %v9066_v0  ;;  %8449 = vmatpush3.msra.mxu0 %v4320_v55 }
 0x248   : > { %v7866_v31 = vpop.f32.mrf.mxu0  ;;  %v8064_v3 = vpop.f32.mrf.mxu1  ;;  %8450 = vmatprep.subr.mxu0 %v4319_v27 }
 0x249   : > { %v10831_v41 = vadd.f32 %v10768_v44, %v2047_v56  ;;  %8451 = vmatpush3.msra.mxu0 %v4319_v27  ;;  %v4316_v31 = vld [vmem:[#allocation3 + $0x1a8] sm:$0xff]  ;;  %v4315_v27 = vld [vmem:[#allocation3 + $0x1a0] sm:$0xff] }
 0x24a   : > { %v2008_v21 = vpop.f32.mrf.mxu0  ;;  %8194 = vmatmul.mubr.msk.f32.gmra.mxu0 %vm369_vm2, %v3147_v40  ;;  %v10838_v34 = vpop.f32.mrf.mxu1  ;;  %8452 = vmatprep.subr.mxu0 %v4318_v54 }
 0x24b   : > { %v2048_v1 = vadd.f32 %v2008_v21, %v10560_v15  ;;  %8196 = vmatprep.mubr.msk.f32.mxu0 %vm9067_vm0, %v9066_v0  ;;  %v3658_v15 = vld [vmem:[#allocation3 + $0xc0] sm:$0xff]  ;;  %8453 = vmatpush3.msra.mxu0 %v4318_v54 }
 0x24c   : > { %v7869_v29 = vpop.f32.mrf.mxu0  ;;  %v8067_v45 = vpop.f32.mrf.mxu1  ;;  %8246 = vmatprep.subr.mxu1 %v3658_v15  ;;  %8454 = vmatprep.subr.mxu0 %v4317_v13  ;;  %v3151_v21 = vld [vmem:[%s9192_s9 + $0xc2] sm:$0xff] }
 0x24d   : > { %v10841_v44 = vadd.f32 %v10778_v18, %v2048_v1  ;;  %8247 = vmatpush3.msra.mxu1 %v3658_v15  ;;  %v3657_v18 = vld [vmem:[#allocation3 + $0xb8] sm:$0xff]  ;;  %8455 = vmatpush3.msra.mxu0 %v4317_v13  ;;  %v3152_v15 = vld [vmem:[%s9192_s9 + $0xca] sm:$0xff]  ;;  %v3153_v13 = vld [vmem:[%s9192_s9 + $0xd2] sm:$0xff] }
 0x24e   : > { %v2013_v7 = vpop.f32.mrf.mxu0  ;;  %8197 = vmatmul.mubr.msk.f32.gmra.mxu0 %vm369_vm2, %v3148_v43  ;;  %v10848_v37 = vpop.f32.mrf.mxu1  ;;  %8248 = vmatprep.subr.mxu1 %v3657_v18  ;;  %v3653_v1 = vld [vmem:[#allocation3 + $0x98] sm:$0xff] }
 0x24f   : > { %v2049_v12 = vadd.f32 %v2013_v7, %v10574_v23  ;;  %8199 = vmatprep.mubr.msk.f32.mxu0 %vm9067_vm0, %v9066_v0  ;;  %8249 = vmatpush3.msra.mxu1 %v3657_v18  ;;  %v3652_v7 = vld [vmem:[#allocation3 + $0x90] sm:$0xff] }
 0x250   : > { %v7872_v49 = vpop.f32.mrf.mxu0  ;;  %v8070_v23 = vpop.f32.mrf.mxu1  ;;  %8250 = vmatprep.subr.mxu1 %v3656_v48  ;;  %8456 = vmatprep.subr.mxu0 %v4316_v31 }
 0x251   : > { %v10851_v10 = vadd.f32 %v10788_v63, %v2049_v12  ;;  %8251 = vmatpush3.msra.mxu1 %v3656_v48  ;;  %8457 = vmatpush3.msra.mxu0 %v4316_v31  ;;  %v4313_v23 = vld [vmem:[#allocation3 + $0x190] sm:$0xff] }
 0x252   : > { %v2018_v17 = vpop.f32.mrf.mxu0  ;;  %8200 = vmatmul.mubr.msk.f32.gmra.mxu0 %vm369_vm2, %v3149_v35  ;;  %v10858_v63 = vpop.f32.mrf.mxu1  ;;  %8252 = vmatprep.subr.mxu1 %v3655_v51  ;;  %v4314_v35 = vld [vmem:[#allocation3 + $0x198] sm:$0xff] }
 0x253   : > { %v2050_v8 = vadd.f32 %v2018_v17, %v10588_v52  ;;  %8202 = vmatprep.mubr.msk.f32.mxu0 %vm9067_vm0, %v9066_v0  ;;  %8253 = vmatpush3.msra.mxu1 %v3655_v51  ;;  %v3650_v17 = vld [vmem:[#allocation3 + $0x80] sm:$0xff] }
 0x254   : > { %v7875_v59 = vpop.f32.mrf.mxu0  ;;  %v8073_v52 = vpop.f32.mrf.mxu1  ;;  %8254 = vmatprep.subr.mxu1 %v3654_v53  ;;  %8458 = vmatprep.subr.mxu0 %v4315_v27 }
 0x255   : > { %v10861_v56 = vadd.f32 %v10798_v33, %v2050_v8  ;;  %8255 = vmatpush3.msra.mxu1 %v3654_v53  ;;  %8459 = vmatpush3.msra.mxu0 %v4315_v27  ;;  %v4312_v59 = vld [vmem:[#allocation3 + $0x188] sm:$0xff]  ;;  %v3154_v52 = vld [vmem:[%s9192_s9 + $0xda] sm:$0xff]  ;;  %v4311_v53 = vld [vmem:[#allocation3 + $0x180] sm:$0xff] }
 0x256   : > { %v2598_v40 = vpop.f32.mrf.mxu0  ;;  %8203 = vmatmul.mubr.msk.f32.gmra.mxu0 %vm369_vm2, %v3150_v47  ;;  %v10868_v33 = vpop.f32.mrf.mxu1  ;;  %8256 = vmatprep.subr.mxu1 %v3653_v1 }
 0x257   : > { %v2742_v55 = vadd.f32 %v2598_v40, %v10602_v42  ;;  %8205 = vmatprep.mubr.msk.f32.mxu0 %vm9067_vm0, %v9066_v0  ;;  %8257 = vmatpush3.msra.mxu1 %v3653_v1  ;;  %v3155_v1 = vld [vmem:[%s9192_s9 + $0xe2] sm:$0xff] }
 0x258   : > { %v7969_v3 = vpop.f32.mrf.mxu0  ;;  %v8076_v42 = vpop.f32.mrf.mxu1  ;;  %8258 = vmatprep.subr.mxu1 %v3652_v7  ;;  %8460 = vmatprep.subr.mxu0 %v4314_v35 }
 0x259   : > { %v10871_v43 = vadd.f32 %v10808_v46, %v2742_v55  ;;  %v3651_v46 = vld [vmem:[#allocation3 + $0x88] sm:$0xff]  ;;  %8259 = vmatpush3.msra.mxu1 %v3652_v7  ;;  %8461 = vmatpush3.msra.mxu0 %v4314_v35 }
 0x25a   : > { %v2603_v29 = vpop.f32.mrf.mxu0  ;;  %8206 = vmatmul.mubr.msk.f32.gmra.mxu0 %vm369_vm2, %v3151_v21  ;;  %v10878_v12 = vpop.f32.mrf.mxu1  ;;  %8260 = vmatprep.subr.mxu1 %v3651_v46 }
 0x25b   : > { %v2743_v45 = vadd.f32 %v2603_v29, %v10614_v57  ;;  %8208 = vmatprep.mubr.msk.f32.mxu0 %vm9067_vm0, %v9066_v0  ;;  %8261 = vmatpush3.msra.mxu1 %v3651_v46 }
 0x25c   : > { %v7972_v54 = vpop.f32.mrf.mxu0  ;;  %v8079_v57 = vpop.f32.mrf.mxu1  ;;  %8262 = vmatprep.subr.mxu1 %v3650_v17  ;;  %8462 = vmatprep.subr.mxu0 %v4313_v23 }
 0x25d   : > { %v10881_v49 = vadd.f32 %v10818_v39, %v2743_v45  ;;  %8263 = vmatpush3.msra.mxu1 %v3650_v17  ;;  %8463 = vmatpush3.msra.mxu0 %v4313_v23 }
 0x25e   : > { %v2608_v18 = vpop.f32.mrf.mxu0  ;;  %8209 = vmatmul.mubr.msk.f32.gmra.mxu0 %vm369_vm2, %v3152_v15  ;;  %v10888_v39 = vpop.f32.mrf.mxu1  ;;  %8464 = vmatprep.subr.mxu0 %v4312_v59 }
 0x25f   : > { %v2744_v48 = vadd.f32 %v2608_v18, %v10626_v20  ;;  %8211 = vmatprep.mubr.msk.f32.mxu0 %vm9067_vm0, %v9066_v0  ;;  %8465 = vmatpush3.msra.mxu0 %v4312_v59 }
 0x260   : > { %v7975_v8 = vpop.f32.mrf.mxu0  ;;  %v8082_v20 = vpop.f32.mrf.mxu1  ;;  %8466 = vmatprep.subr.mxu0 %v4311_v53 }
 0x261   : > { %v10891_v47 = vadd.f32 %v10828_v4, %v2744_v48  ;;  %8467 = vmatpush3.msra.mxu0 %v4311_v53 }
 0x262   : > { %v2613_v51 = vpop.f32.mrf.mxu0  ;;  %8212 = vmatmul.mubr.msk.f32.gmra.mxu0 %vm369_vm2, %v3153_v13  ;;  %v3003_v4 = vpop.f32.mrf.mxu1 }
 0x263   : > { %v2745_v40 = vadd.f32 %v2613_v51, %v10638_v9  ;;  %8214 = vmatprep.mubr.msk.f32.mxu0 %vm9067_vm0, %v9066_v0 }
 0x264   : > { %v7978_v31 = vpop.f32.mrf.mxu0  ;;  %v8085_v3 = vpop.f32.mrf.mxu1 }
 0x265   : > { %v10899_v55 = vadd.f32 %v10838_v34, %v2745_v40 }
 0x266   : > { %v2618_v21 = vpop.f32.mrf.mxu0  ;;  %8215 = vmatmul.mubr.msk.f32.gmra.mxu0 %vm369_vm2, %v3154_v52  ;;  %v3008_v29 = vpop.f32.mrf.mxu1  ;;  %v3159_v52 = vld [vmem:[%s9192_s9 + $0x102] sm:$0xff] }
 0x267   : > { %v2746_v9 = vadd.f32 %v2618_v21, %v10646_v36  ;;  %8217 = vmatprep.mubr.msk.f32.mxu0 %vm9067_vm0, %v9066_v0  ;;  %v3156_v36 = vld [vmem:[%s9192_s9 + $0xea] sm:$0xff] }
 0x268   : > { %v7981_v27 = vpop.f32.mrf.mxu0  ;;  %v8088_v7 = vpop.f32.mrf.mxu1 }
 0x269   : > { %v10907_v34 = vadd.f32 %v10848_v37, %v2746_v9 }
 0x26a   : > { %v2623_v42 = vpop.f32.mrf.mxu0  ;;  %8218 = vmatmul.mubr.msk.f32.gmra.mxu0 %vm369_vm2, %v3155_v1  ;;  %v3013_v54 = vpop.f32.mrf.mxu1 }
 0x26b   : > { %v2747_v45 = vadd.f32 %v2623_v42, %v10654_v2  ;;  %8220 = vmatprep.mubr.msk.f32.mxu0 %vm9067_vm0, %v9066_v0  ;;  %v3157_v2 = vld [vmem:[%s9192_s9 + $0xf2] sm:$0xff] }
 0x26c   : > { %v7984_v15 = vpop.f32.mrf.mxu0  ;;  %v8091_v37 = vpop.f32.mrf.mxu1 }
 0x26d   : > { %v10915_v46 = vadd.f32 %v10858_v63, %v2747_v45 }
 0x26e   : > { %v2628_v35 = vpop.f32.mrf.mxu0  ;;  %8221 = vmatmul.mubr.msk.f32.gmra.mxu0 %vm369_vm2, %v3156_v36  ;;  %v3018_v17 = vpop.f32.mrf.mxu1 }
 0x26f   : > { %v2748_v18 = vadd.f32 %v2628_v35, %v10662_v30  ;;  %8223 = vmatprep.mubr.msk.f32.mxu0 %vm9067_vm0, %v9066_v0  ;;  %v3158_v30 = vld [vmem:[%s9192_s9 + $0xfa] sm:$0xff]  ;;  %s8941_s9 = scalar_lea.vmem %s12151_s14, 3072 }
 0x270   : > { %v7987_v57 = vpop.f32.mrf.mxu0  ;;  %v8094_v63 = vpop.f32.mrf.mxu1  ;;  %p8942_p6 = scmp.ne.s32.totalorder %s12151_s14, %s8941_s9  ;;  %p8949_p12 = scmp.lt.s32.totalorder %s8947_s22, %s8941_s9 }
 0x271   : > { %v10923_v23 = vadd.f32 %v10868_v33, %v2748_v18 }
 0x272   : > { %v2633_v48 = vpop.f32.mrf.mxu0  ;;  %8224 = vmatmul.mubr.msk.f32.gmra.mxu0 %vm369_vm2, %v3157_v2  ;;  %v3023_v59 = vpop.f32.mrf.mxu1  ;;  %p8943_p9 = pnand %p8942_p6, %p9153_p5  ;;  %p8950_p13 = por %p8949_p12, %p8948_p11 }
 0x273   : > { %v2749_v13 = vadd.f32 %v2633_v48, %v10669_v61  ;;  %8226 = vmatprep.mubr.msk.f32.mxu0 %vm9067_vm0, %v9066_v0 }
 0x274   : > { %v7990_v8 = vpop.f32.mrf.mxu0  ;;  %v8097_v33 = vpop.f32.mrf.mxu1  ;;  %p8944_p10 = pneg %p8943_p9 }
 0x275   : > { %v10931_v51 = vadd.f32 %v10878_v12, %v2749_v13 }
 0x276   : > { %v2638_v20 = vpop.f32.mrf.mxu0  ;;  %8227 = vmatmul.mubr.msk.f32.gmra.mxu0 %vm369_vm2, %v3158_v30  ;;  %v3028_v53 = vpop.f32.mrf.mxu1  ;;  %p8951_p0 = pnand %p8950_p13, %p8944_p10 }
 0x277   : > { %v2750_v40 = vadd.f32 %v2638_v20, %v10676_v11  ;;  %8229 = vmatprep.mubr.msk.f32.mxu0 %vm9067_vm0, %v9066_v0 }
 0x278   : > { %v7993_v61 = vpop.f32.mrf.mxu0  ;;  %v8100_v12 = vpop.f32.mrf.mxu1 }
 0x279   : > { %v10939_v31 = vadd.f32 %v10888_v39, %v2750_v40 }
 0x27a   : > { %v2643_v21 = vpop.f32.mrf.mxu0  ;;  %8230 = vmatmul.mubr.msk.f32.gmra.mxu0 %vm369_vm2, %v3159_v52  ;;  %v3033_v1 = vpop.f32.mrf.mxu1 }
 0x27b   : > { %v2751_v3 = vadd.f32 %v2643_v21, %v10683_v26 }
 0x27c   : > { %v7996_v9 = vpop.f32.mrf.mxu0  ;;  %v8103_v42 = vpop.f32.mrf.mxu1 }
 0x27d   : > { %v10943_v27 = vadd.f32 %v3003_v4, %v2751_v3 }
 0x27e   : > { %v2648_v11 = vpop.f32.mrf.mxu0  ;;  %v3038_v45 = vpop.f32.mrf.mxu1 }
 0x27f   : > { %v2752_v0 = vadd.f32 %v2648_v11, %v10690_v25 }
 0x280   : > { %v7999_v7 = vpop.f32.mrf.mxu0  ;;  %v8106_v15 = vpop.f32.mrf.mxu1 }
 0x281   : > { %v10946_v36 = vadd.f32 %v3008_v29, %v2752_v0 }
 0x282   : > { %v2653_v39 = vpop.f32.mrf.mxu0  ;;  %v3043_v18 = vpop.f32.mrf.mxu1 }
 0x283   : > { %v2753_v35 = vadd.f32 %v2653_v39, %v10697_v62 }
 0x284   : > { %v8002_v37 = vpop.f32.mrf.mxu0  ;;  %v8109_v57 = vpop.f32.mrf.mxu1 }
 0x285   : > { %v10949_v2 = vadd.f32 %v3013_v54, %v2753_v35 }
 0x286   : > { %v2658_v26 = vpop.f32.mrf.mxu0  ;;  %v3048_v63 = vpop.f32.mrf.mxu1 }
 0x287   : > { %v2754_v4 = vadd.f32 %v2658_v26, %v10706_v16  ;;  %v10960_v16 = vld [vmem:[#allocation3 + $0x78] sm:$0xff] }
 0x288   : > { %v8005_v48 = vpop.f32.mrf.mxu0  ;;  %v8112_v30 = vpop.f32.mrf.mxu1  ;;  %8300 = vmatprep.subr.mxu1 %v10960_v16 }
 0x289   : > { %v10952_v13 = vadd.f32 %v3018_v17, %v2754_v4 }
 0x28a   : > { %v2663_v25 = vpop.f32.mrf.mxu0  ;;  %v3053_v20 = vpop.f32.mrf.mxu1 }
 0x28b   : > { %v2755_v29 = vadd.f32 %v2663_v25, %v10715_v5 }
 0x28c   : > { %v8008_v8 = vpop.f32.mrf.mxu0  ;;  %v8115_v40 = vpop.f32.mrf.mxu1 }
 0x28d   : > { %v10955_v33 = vadd.f32 %v3023_v59, %v2755_v29 }
 0x28e   : > { %v2668_v62 = vpop.f32.mrf.mxu0  ;;  %v3058_v61 = vpop.f32.mrf.mxu1 }
 0x28f   : > { %v2756_v54 = vadd.f32 %v2668_v62, %v10724_v50 }
 0x290   : > { %v8011_v52 = vpop.f32.mrf.mxu0  ;;  %v8118_v12 = vpop.f32.mrf.mxu1 }
 0x291   : > { %v10958_v21 = vadd.f32 %v3028_v53, %v2756_v54  ;;  %v10967_v53 = vld [vmem:[#allocation3 + $0x2f8] sm:$0xff] }
 0x292   : > { %v2673_v17 = vpop.f32.mrf.mxu0  ;;  %v3063_v9 = vpop.f32.mrf.mxu1  ;;  %8572 = vmatprep.subr.mxu0 %v10967_v53 }
 0x293   : > { %v2757_v5 = vadd.f32 %v2673_v17, %v10733_v14 }
 0x294   : > { %v8014_v3 = vpop.f32.mrf.mxu0  ;;  %v8121_v42 = vpop.f32.mrf.mxu1 }
 0x295   : > { %v10964_v59 = vadd.f32 %v3033_v1, %v2757_v5 }
 0x296   : > { %v2678_v11 = vpop.f32.mrf.mxu0  ;;  %v3068_v7 = vpop.f32.mrf.mxu1 }
 0x297   : > { %v2758_v50 = vadd.f32 %v2678_v11, %v10742_v60 }
 0x298   : > { %v8017_v0 = vpop.f32.mrf.mxu0  ;;  %v8124_v35 = vpop.f32.mrf.mxu1 }
 0x299   : > { %v10969_v39 = vadd.f32 %v3038_v45, %v2758_v50 }
 0x29a   : > { %v2683_v15 = vpop.f32.mrf.mxu0  ;;  %v3073_v26 = vpop.f32.mrf.mxu1 }
 0x29b   : > { %v2759_v14 = vadd.f32 %v2683_v15, %v10751_v28 }
 0x29c   : > { %v8020_v37 = vpop.f32.mrf.mxu0  ;;  %v8127_v4 = vpop.f32.mrf.mxu1 }
 0x29d   : > { %v10973_v1 = vadd.f32 %v3043_v18, %v2759_v14 }
 0x29e   : > { %v2688_v57 = vpop.f32.mrf.mxu0  ;;  %v3078_v25 = vpop.f32.mrf.mxu1 }
 0x29f   : > { %v2760_v60 = vadd.f32 %v2688_v57, %v10761_v6 }
 0x2a0   : > { %v8023_v48 = vpop.f32.mrf.mxu0  ;;  %v8130_v29 = vpop.f32.mrf.mxu1 }
 0x2a1   : > { %v10976_v30 = vadd.f32 %v3048_v63, %v2760_v60 }
 0x2a2   : > { %v2693_v45 = vpop.f32.mrf.mxu0  ;;  %v3083_v40 = vpop.f32.mrf.mxu1 }
 0x2a3   : > { %v2761_v8 = vadd.f32 %v2693_v45, %v10771_v38 }
 0x2a4   : > { %v8026_v62 = vpop.f32.mrf.mxu0  ;;  %v8133_v52 = vpop.f32.mrf.mxu1 }
 0x2a5   : > { %v10979_v54 = vadd.f32 %v3053_v20, %v2761_v8 }
 0x2a6   : > { %v2698_v28 = vpop.f32.mrf.mxu0  ;;  %v3088_v12 = vpop.f32.mrf.mxu1 }
 0x2a7   : > { %v2762_v18 = vadd.f32 %v2698_v28, %v10781_v24 }
 0x2a8   : > { %v8029_v17 = vpop.f32.mrf.mxu0  ;;  %v8136_v3 = vpop.f32.mrf.mxu1 }
 0x2a9   : > { %v10982_v5 = vadd.f32 %v3058_v61, %v2762_v18 }
 0x2aa   : > { %v2703_v6 = vpop.f32.mrf.mxu0  ;;  %v3093_v42 = vpop.f32.mrf.mxu1 }
 0x2ab   : > { %v2763_v63 = vadd.f32 %v2703_v6, %v10791_v22 }
 0x2ac   : > { %v8032_v11 = vpop.f32.mrf.mxu0  ;;  %v8139_v0 = vpop.f32.mrf.mxu1 }
 0x2ad   : > { %v10985_v50 = vadd.f32 %v3063_v9, %v2763_v63 }
 0x2ae   : > { %v2708_v38 = vpop.f32.mrf.mxu0  ;;  %v3098_v35 = vpop.f32.mrf.mxu1 }
 0x2af   : > { %v2764_v20 = vadd.f32 %v2708_v38, %v10801_v19 }
 0x2b0   : > { %v8035_v15 = vpop.f32.mrf.mxu0  ;;  %v8142_v37 = vpop.f32.mrf.mxu1 }
 0x2b1   : > { %v10988_v14 = vadd.f32 %v3068_v7, %v2764_v20 }
 0x2b2   : > { %v2713_v24 = vpop.f32.mrf.mxu0 }
 0x2b3   : > { %v2765_v61 = vadd.f32 %v2713_v24, %v10811_v58 }
 0x2b4   : > { %v8038_v57 = vpop.f32.mrf.mxu0 }
 0x2b5   : > { %v10991_v4 = vadd.f32 %v3073_v26, %v2765_v61 }
 0x2b6   : > { %v2718_v22 = vpop.f32.mrf.mxu0 }
 0x2b7   : > { %v2766_v60 = vadd.f32 %v2718_v22, %v10821_v32 }
 0x2b8   : > { %v8041_v9 = vpop.f32.mrf.mxu0 }
 0x2b9   : > { %v10994_v48 = vadd.f32 %v3078_v25, %v2766_v60 }
 0x2ba   : > { %v2723_v45 = vpop.f32.mrf.mxu0 }
 0x2bb   : > { %v2767_v19 = vadd.f32 %v2723_v45, %v10831_v41 }
 0x2bc   : > { %v8044_v29 = vpop.f32.mrf.mxu0 }
 0x2bd   : > { %v10997_v8 = vadd.f32 %v3083_v40, %v2767_v19  ;;  %v4825_v19 = vld [vmem:[#allocation3 + $0x2f0] sm:$0xff] }
 0x2be   : > { %v2728_v7 = vpop.f32.mrf.mxu0 }
 0x2bf   : > { %v2768_v62 = vadd.f32 %v2728_v7, %v10841_v44  ;;  %v11011_v44 = vld [vmem:[%s12265_s2] ss:$0 sm:$0xff] }
 0x2c0   : > { %v8047_v28 = vpop.f32.mrf.mxu0 }
 0x2c1   : > { %v11000_v58 = vadd.f32 %v3088_v12, %v2768_v62  ;;  %v4824_v28 = vld [vmem:[#allocation3 + $0x2e8] sm:$0xff] }
 0x2c2   : > { %v2733_v26 = vpop.f32.mrf.mxu0 }
 0x2c3   : > { %v2769_v52 = vadd.f32 %v2733_v26, %v10851_v10 }
 0x2c4   : > { %v8050_v18 = vpop.f32.mrf.mxu0 }
 0x2c5   : > { %v11003_v32 = vadd.f32 %v3093_v42, %v2769_v52  ;;  %v3623_v52 = vld [vmem:[#allocation3 + $0x70] sm:$0xff] }
 0x2c6   : > { %v2738_v25 = vpop.f32.mrf.mxu0 }
 0x2c7   : > { %v2770_v17 = vadd.f32 %v2738_v25, %v10861_v56  ;;  %v4823_v25 = vld [vmem:[#allocation3 + $0x2e0] sm:$0xff] }
 0x2c8   : > { %v8053_v6 = vpop.f32.mrf.mxu0 }
 0x2c9   : > { %v11006_v41 = vadd.f32 %v3098_v35, %v2770_v17  ;;  %v3622_v6 = vld [vmem:[#allocation3 + $0x68] sm:$0xff] }
 0x2ca   : > { %v3318_v40 = vpop.f32.mrf.mxu0 }
 0x2cb   : > { %v3462_v12 = vadd.f32 %v3318_v40, %v10871_v43 }
 0x2cc   : > { %v8147_v3 = vpop.f32.mrf.mxu0 }
 0x2cd   : > { %v11015_v10 = vadd.f32 %v11011_v44, %v3462_v12  ;;  %v4822_v3 = vld [vmem:[#allocation3 + $0x2d8] sm:$0xff] }
 0x2ce   : > { %v3323_v63 = vpop.f32.mrf.mxu0 }
 0x2cf   : > { %v3527_v11 = vmax.f32 %v11015_v10, 0.0  ;;  %v3463_v56 = vadd.f32 %v3323_v63, %v10881_v49 }
 0x2d0   : > { %v8150_v42 = vpop.f32.mrf.mxu0 }
 0x2d1   : > { %3556 = vst [vmem:[#allocation2] sm:$0xff] %v3527_v11  ;;  %v11022_v38 = vadd.f32 %v11011_v44, %v3463_v56 }
 0x2d2   : > { %v3328_v0 = vpop.f32.mrf.mxu0 }
 0x2d3   : > { %v3528_v20 = vmax.f32 %v11022_v38, 0.0  ;;  %v3464_v43 = vadd.f32 %v3328_v0, %v10891_v47  ;;  %v4821_v0 = vld [vmem:[#allocation3 + $0x2d0] sm:$0xff] }
 0x2d4   : > { %v8153_v15 = vpop.f32.mrf.mxu0 }
 0x2d5   : > { %3557 = vst [vmem:[#allocation2 + $0x8] sm:$0xff] %v3528_v20  ;;  %v3500_v35 = vadd.f32 %v11011_v44, %v3464_v43 }
 0x2d6   : > { %v3333_v24 = vpop.f32.mrf.mxu0 }
 0x2d7   : > { %v11029_v49 = vmax.f32 %v3500_v35, 0.0  ;;  %v3465_v37 = vadd.f32 %v3333_v24, %v10899_v55  ;;  %v3620_v35 = vld [vmem:[#allocation3 + $0x58] sm:$0xff] }
 0x2d8   : > { %v8156_v61 = vpop.f32.mrf.mxu0 }
 0x2d9   : > { %3558 = vst [vmem:[#allocation2 + $0x10] sm:$0xff] %v11029_v49  ;;  %v3501_v57 = vadd.f32 %v11011_v44, %v3465_v37  ;;  %8468 = vmatprep.mubr.f32.mxu0 %v11029_v49  ;;  %v4820_v37 = vld [vmem:[#allocation3 + $0x2c8] sm:$0xff] }
 0x2da   : > { %v3338_v22 = vpop.f32.mrf.mxu0 }
 0x2db   : > { %v11035_v47 = vmax.f32 %v3501_v57, 0.0  ;;  %v3466_v60 = vadd.f32 %v3338_v22, %v10907_v34  ;;  %v3619_v22 = vld [vmem:[#allocation3 + $0x50] sm:$0xff] }
 0x2dc   : > { %v8159_v9 = vpop.f32.mrf.mxu0  ;;  %v3625_v45 = vld [vmem:[#allocation2 + $0x1] sm:$0xff] }
 0x2dd   : > { %3559 = vst [vmem:[#allocation2 + $0x18] sm:$0xff] %v11035_v47  ;;  %v3502_v29 = vadd.f32 %v11011_v44, %v3466_v60  ;;  %8264 = vmatprep.mubr.f32.mxu1 %v3625_v45  ;;  %8469 = vmatmul.mubr.f32.vlgmr.msra.gmra.mxu0 %v11035_v47  ;;  %v4819_v45 = vld [vmem:[#allocation3 + $0x2c0] sm:$0xff] }
 0x2de   : > { %v3343_v55 = vpop.f32.mrf.mxu0  ;;  %8573 = vmatpush3.msra.mxu0 %v10967_v53 }
 0x2df   : > { %v11042_v7 = vmax.f32 %v3502_v29, 0.0  ;;  %v3467_v62 = vadd.f32 %v3343_v55, %v10915_v46  ;;  %8574 = vmatprep.subr.mxu0 %v4825_v19  ;;  %v3618_v29 = vld [vmem:[#allocation3 + $0x48] sm:$0xff] }
 0x2e0   : > { %v8162_v34 = vpop.f32.mrf.mxu0  ;;  %v3626_v26 = vld [vmem:[#allocation2 + $0x9] sm:$0xff]  ;;  %8575 = vmatpush3.msra.mxu0 %v4825_v19 }
 0x2e1   : > { %3560 = vst [vmem:[#allocation2 + $0x20] sm:$0xff] %v11042_v7  ;;  %v3503_v18 = vadd.f32 %v11011_v44, %v3467_v62  ;;  %8265 = vmatmul.mubr.f32.vlgmr.msra.gmra.mxu1 %v3626_v26  ;;  %8471 = vmatprep.mubr.f32.mxu0 %v11042_v7 }
 0x2e2   : > { %v3348_v17 = vpop.f32.mrf.mxu0  ;;  %8301 = vmatpush3.msra.mxu1 %v10960_v16  ;;  %8576 = vmatprep.subr.mxu0 %v4824_v28  ;;  %v3621_v16 = vld [vmem:[#allocation3 + $0x60] sm:$0xff] }
 0x2e3   : > { %v11049_v53 = vmax.f32 %v3503_v18, 0.0  ;;  %v3468_v46 = vadd.f32 %v3348_v17, %v10923_v23  ;;  %8302 = vmatprep.subr.mxu1 %v3623_v52  ;;  %8577 = vmatpush3.msra.mxu0 %v4824_v28  ;;  %v4818_v28 = vld [vmem:[#allocation3 + $0x2b8] sm:$0xff] }
 0x2e4   : > { %v8165_v40 = vpop.f32.mrf.mxu0  ;;  %v3627_v12 = vld [vmem:[#allocation2 + $0x11] sm:$0xff]  ;;  %8303 = vmatpush3.msra.mxu1 %v3623_v52  ;;  %8578 = vmatprep.subr.mxu0 %v4823_v25  ;;  %v3617_v52 = vld [vmem:[#allocation3 + $0x40] sm:$0xff] }
 0x2e5   : > { %3561 = vst [vmem:[#allocation2 + $0x28] sm:$0xff] %v11049_v53  ;;  %v3504_v63 = vadd.f32 %v11011_v44, %v3468_v46  ;;  %8267 = vmatprep.mubr.f32.mxu1 %v3627_v12  ;;  %8472 = vmatmul.mubr.f32.gmra.mxu0 %v11049_v53 }
 0x2e6   : > { %v3353_v56 = vpop.f32.mrf.mxu0  ;;  %8304 = vmatprep.subr.mxu1 %v3622_v6  ;;  %8579 = vmatpush3.msra.mxu0 %v4823_v25  ;;  %v4817_v25 = vld [vmem:[#allocation3 + $0x2b0] sm:$0xff] }
 0x2e7   : > { %v11055_v23 = vmax.f32 %v3504_v63, 0.0  ;;  %v3469_v42 = vadd.f32 %v3353_v56, %v10931_v51  ;;  %8305 = vmatpush3.msra.mxu1 %v3622_v6  ;;  %8580 = vmatprep.subr.mxu0 %v4822_v3  ;;  %v3616_v6 = vld [vmem:[#allocation3 + $0x38] sm:$0xff] }
 0x2e8   : > { %v8168_v43 = vpop.f32.mrf.mxu0  ;;  %v3628_v15 = vld [vmem:[#allocation2 + $0x19] sm:$0xff]  ;;  %8306 = vmatprep.subr.mxu1 %v3621_v16  ;;  %8581 = vmatpush3.msra.mxu0 %v4822_v3  ;;  %v4816_v3 = vld [vmem:[#allocation3 + $0x2a8] sm:$0xff] }
 0x2e9   : > { %3562 = vst [vmem:[#allocation2 + $0x30] sm:$0xff] %v11055_v23  ;;  %v3505_v24 = vadd.f32 %v11011_v44, %v3469_v42  ;;  %8268 = vmatmul.mubr.f32.gmra.mxu1 %v3628_v15  ;;  %8474 = vmatprep.mubr.f32.mxu0 %v11055_v23 }
 0x2ea   : > { %v3358_v61 = vpop.f32.mrf.mxu0  ;;  %8307 = vmatpush3.msra.mxu1 %v3621_v16  ;;  %8582 = vmatprep.subr.mxu0 %v4821_v0  ;;  %v3615_v16 = vld [vmem:[#allocation3 + $0x30] sm:$0xff] }
 0x2eb   : > { %v11061_v51 = vmax.f32 %v3505_v24, 0.0  ;;  %v3470_v57 = vadd.f32 %v3358_v61, %v10939_v31  ;;  %8308 = vmatprep.subr.mxu1 %v3620_v35  ;;  %8583 = vmatpush3.msra.mxu0 %v4821_v0  ;;  %v4815_v0 = vld [vmem:[#allocation3 + $0x2a0] sm:$0xff] }
 0x2ec   : > { %v8171_v60 = vpop.f32.mrf.mxu0  ;;  %v11064_v9 = vld [vmem:[#allocation2 + $0x21] sm:$0xff]  ;;  %8309 = vmatpush3.msra.mxu1 %v3620_v35  ;;  %8584 = vmatprep.subr.mxu0 %v4820_v37  ;;  %v3614_v35 = vld [vmem:[#allocation3 + $0x28] sm:$0xff] }
 0x2ed   : > { %3563 = vst [vmem:[#allocation2 + $0x38] sm:$0xff] %v11061_v51  ;;  %v3506_v19 = vadd.f32 %v11011_v44, %v3470_v57  ;;  %8270 = vmatprep.mubr.f32.mxu1 %v11064_v9  ;;  %8475 = vmatmul.mubr.f32.gmra.mxu0 %v11061_v51 }
 0x2ee   : > { %v3363_v55 = vpop.f32.mrf.mxu0  ;;  %8310 = vmatprep.subr.mxu1 %v3619_v22  ;;  %8585 = vmatpush3.msra.mxu0 %v4820_v37  ;;  %v4814_v37 = vld [vmem:[#allocation3 + $0x298] sm:$0xff] }
 0x2ef   : > { %v11070_v31 = vmax.f32 %v3506_v19, 0.0  ;;  %v3471_v62 = vadd.f32 %v3363_v55, %v10943_v27  ;;  %8311 = vmatpush3.msra.mxu1 %v3619_v22  ;;  %8586 = vmatprep.subr.mxu0 %v4819_v45  ;;  %v3613_v22 = vld [vmem:[#allocation3 + $0x20] sm:$0xff]  ;;  %v4813_v19 = vld [vmem:[#allocation3 + $0x290] sm:$0xff]  ;;  %v3612_v55 = vld [vmem:[#allocation3 + $0x18] sm:$0xff] }
 0x2f0   : > { %v8174_v34 = vpop.f32.mrf.mxu0  ;;  %v11073_v26 = vld [vmem:[#allocation2 + $0x29] sm:$0xff]  ;;  %8312 = vmatprep.subr.mxu1 %v3618_v29  ;;  %8587 = vmatpush3.msra.mxu0 %v4819_v45 }
 0x2f1   : > { %3564 = vst [vmem:[#allocation2 + $0x40] sm:$0xff] %v11070_v31  ;;  %v3507_v18 = vadd.f32 %v11011_v44, %v3471_v62  ;;  %8271 = vmatmul.mubr.f32.gmra.mxu1 %v11073_v26  ;;  %8477 = vmatprep.mubr.f32.mxu0 %v11070_v31  ;;  %v4812_v34 = vld [vmem:[#allocation3 + $0x288] sm:$0xff] }
 0x2f2   : > { %v3368_v17 = vpop.f32.mrf.mxu0  ;;  %8313 = vmatpush3.msra.mxu1 %v3618_v29  ;;  %8588 = vmatprep.subr.mxu0 %v4818_v28 }
 0x2f3   : > { %v11079_v27 = vmax.f32 %v3507_v18, 0.0  ;;  %v3472_v46 = vadd.f32 %v3368_v17, %v10946_v36  ;;  %8314 = vmatprep.subr.mxu1 %v3617_v52  ;;  %8589 = vmatpush3.msra.mxu0 %v4818_v28 }
 0x2f4   : > { %v8177_v40 = vpop.f32.mrf.mxu0  ;;  %v11082_v12 = vld [vmem:[#allocation2 + $0x31] sm:$0xff]  ;;  %8315 = vmatpush3.msra.mxu1 %v3617_v52  ;;  %8590 = vmatprep.subr.mxu0 %v4817_v25 }
 0x2f5   : > { %3565 = vst [vmem:[#allocation2 + $0x48] sm:$0xff] %v11079_v27  ;;  %v3508_v63 = vadd.f32 %v11011_v44, %v3472_v46  ;;  %8273 = vmatprep.mubr.f32.mxu1 %v11082_v12  ;;  %8478 = vmatmul.mubr.f32.gmra.mxu0 %v11079_v27  ;;  %v4811_v46 = vld [vmem:[#allocation3 + $0x280] sm:$0xff]  ;;  %v11256_v10 = vld [vmem:[#allocation2 + $0x32] sm:$0xff] }
 0x2f6   : > { %v3373_v56 = vpop.f32.mrf.mxu0  ;;  %8316 = vmatprep.subr.mxu1 %v3616_v6  ;;  %8591 = vmatpush3.msra.mxu0 %v4817_v25  ;;  %v3611_v25 = vld [vmem:[#allocation3 + $0x10] sm:$0xff] }
 0x2f7   : > { %v11088_v36 = vmax.f32 %v3508_v63, 0.0  ;;  %v3473_v42 = vadd.f32 %v3373_v56, %v10949_v2  ;;  %8317 = vmatpush3.msra.mxu1 %v3616_v6  ;;  %8592 = vmatprep.subr.mxu0 %v4816_v3  ;;  %v11120_v56 = vld [vmem:[#allocation3 + $0x3f8] sm:$0xff] }
 0x2f8   : > { %v8180_v43 = vpop.f32.mrf.mxu0  ;;  %v11091_v15 = vld [vmem:[#allocation2 + $0x39] sm:$0xff]  ;;  %8318 = vmatprep.subr.mxu1 %v3615_v16  ;;  %8593 = vmatpush3.msra.mxu0 %v4816_v3  ;;  %v3610_v3 = vld [vmem:[#allocation3 + $0x8] sm:$0xff] }
 0x2f9   : > { %3566 = vst [vmem:[#allocation2 + $0x50] sm:$0xff] %v11088_v36  ;;  %v3509_v24 = vadd.f32 %v11011_v44, %v3473_v42  ;;  %8274 = vmatmul.mubr.f32.gmra.mxu1 %v11091_v15  ;;  %8480 = vmatprep.mubr.f32.mxu0 %v11088_v36  ;;  %v11261_v38 = vld [vmem:[#allocation2 + $0x3a] sm:$0xff] }
 0x2fa   : > { %v3378_v61 = vpop.f32.mrf.mxu0  ;;  %8319 = vmatpush3.msra.mxu1 %v3615_v16  ;;  %8594 = vmatprep.subr.mxu0 %v4815_v0 }
 0x2fb   : > { %v11097_v2 = vmax.f32 %v3509_v24, 0.0  ;;  %v3474_v57 = vadd.f32 %v3378_v61, %v10952_v13  ;;  %8320 = vmatprep.subr.mxu1 %v3614_v35  ;;  %8595 = vmatpush3.msra.mxu0 %v4815_v0  ;;  %v3609_v0 = vld [vmem:[#allocation3] sm:$0xff]  ;;  %v11132_v61 = vld [vmem:[#allocation3 + $0x178] sm:$0xff] }
 0x2fc   : > { %v8183_v60 = vpop.f32.mrf.mxu0  ;;  %v11100_v45 = vld [vmem:[#allocation2 + $0x41] sm:$0xff]  ;;  %8321 = vmatpush3.msra.mxu1 %v3614_v35  ;;  %8596 = vmatprep.subr.mxu0 %v4814_v37 }
 0x2fd   : > { %3567 = vst [vmem:[#allocation2 + $0x58] sm:$0xff] %v11097_v2  ;;  %v3510_v29 = vadd.f32 %v11011_v44, %v3474_v57  ;;  %8276 = vmatprep.mubr.f32.mxu1 %v11100_v45  ;;  %8481 = vmatmul.mubr.f32.gmra.mxu0 %v11097_v2 }
 0x2fe   : > { %v3383_v62 = vpop.f32.mrf.mxu0  ;;  %8322 = vmatprep.subr.mxu1 %v3613_v22  ;;  %8597 = vmatpush3.msra.mxu0 %v4814_v37 }
 0x2ff   : > { %v11106_v13 = vmax.f32 %v3510_v29, 0.0  ;;  %v3475_v28 = vadd.f32 %v3383_v62, %v10955_v33  ;;  %8323 = vmatpush3.msra.mxu1 %v3613_v22  ;;  %8598 = vmatprep.subr.mxu0 %v4813_v19 }
 0x300   : > { %v8186_v52 = vpop.f32.mrf.mxu0  ;;  %v11109_v18 = vld [vmem:[#allocation2 + $0x49] sm:$0xff]  ;;  %8324 = vmatprep.subr.mxu1 %v3612_v55  ;;  %8599 = vmatpush3.msra.mxu0 %v4813_v19 }
 0x301   : > { %3568 = vst [vmem:[#allocation2 + $0x60] sm:$0xff] %v11106_v13  ;;  %v3511_v17 = vadd.f32 %v11011_v44, %v3475_v28  ;;  %8277 = vmatmul.mubr.f32.gmra.mxu1 %v11109_v18  ;;  %8483 = vmatprep.mubr.f32.mxu0 %v11106_v13 }
 0x302   : > { %v3388_v6 = vpop.f32.mrf.mxu0  ;;  %8325 = vmatpush3.msra.mxu1 %v3612_v55  ;;  %8600 = vmatprep.subr.mxu0 %v4812_v34 }
 0x303   : > { %v11115_v33 = vmax.f32 %v3511_v17, 0.0  ;;  %v3476_v40 = vadd.f32 %v3388_v6, %v10958_v21  ;;  %8326 = vmatprep.subr.mxu1 %v3611_v25  ;;  %8601 = vmatpush3.msra.mxu0 %v4812_v34 }
 0x304   : > { %v8189_v63 = vpop.f32.mrf.mxu0  ;;  %v11118_v16 = vld [vmem:[#allocation2 + $0x51] sm:$0xff]  ;;  %8327 = vmatpush3.msra.mxu1 %v3611_v25  ;;  %8602 = vmatprep.subr.mxu0 %v4811_v46 }
 0x305   : > { %3569 = vst [vmem:[#allocation2 + $0x68] sm:$0xff] %v11115_v33  ;;  %v3512_v42 = vadd.f32 %v11011_v44, %v3476_v40  ;;  %8279 = vmatprep.mubr.f32.mxu1 %v11118_v16  ;;  %8484 = vmatmul.mubr.f32.gmra.mxu0 %v11115_v33 }
 0x306   : > { %v3393_v21 = vpop.f32.mrf.mxu0  ;;  %8328 = vmatprep.subr.mxu1 %v3610_v3  ;;  %8603 = vmatpush3.msra.mxu0 %v4811_v46 }
 0x307   : > { %v11126_v43 = vmax.f32 %v3512_v42, 0.0  ;;  %v3477_v35 = vadd.f32 %v3393_v21, %v10964_v59  ;;  %8329 = vmatpush3.msra.mxu1 %v3610_v3  ;;  %8708 = vmatprep.subr.mxu0 %v11120_v56 }
 0x308   : > { %v8192_v24 = vpop.f32.mrf.mxu0  ;;  %v11130_v37 = vld [vmem:[#allocation2 + $0x59] sm:$0xff]  ;;  %8330 = vmatprep.subr.mxu1 %v3609_v0 }
 0x309   : > { %3570 = vst [vmem:[#allocation2 + $0x70] sm:$0xff] %v11126_v43  ;;  %v3513_v57 = vadd.f32 %v11011_v44, %v3477_v35  ;;  %8280 = vmatmul.mubr.f32.gmra.mxu1 %v11130_v37  ;;  %8486 = vmatprep.mubr.f32.mxu0 %v11126_v43 }
 0x30a   : > { %v3398_v22 = vpop.f32.mrf.mxu0  ;;  %8331 = vmatpush3.msra.mxu1 %v3609_v0 }
 0x30b   : > { %v11138_v59 = vmax.f32 %v3513_v57, 0.0  ;;  %v3478_v60 = vadd.f32 %v3398_v22, %v10969_v39  ;;  %8368 = vmatprep.subr.mxu1 %v11132_v61 }
 0x30c   : > { %v8195_v19 = vpop.f32.mrf.mxu0  ;;  %v11142_v29 = vld [vmem:[#allocation2 + $0x61] sm:$0xff] }
 0x30d   : > { %3571 = vst [vmem:[#allocation2 + $0x78] sm:$0xff] %v11138_v59  ;;  %v3514_v55 = vadd.f32 %v11011_v44, %v3478_v60  ;;  %8282 = vmatprep.mubr.f32.mxu1 %v11142_v29  ;;  %8487 = vmatmul.mubr.f32.gmra.mxu0 %v11138_v59 }
 0x30e   : > { %v3403_v62 = vpop.f32.mrf.mxu0 }
 0x30f   : > { %v11148_v28 = vmax.f32 %v3514_v55, 0.0  ;;  %v3479_v34 = vadd.f32 %v3403_v62, %v10973_v1 }
 0x310   : > { %v8198_v52 = vpop.f32.mrf.mxu0  ;;  %v11151_v39 = vld [vmem:[#allocation2 + $0x69] sm:$0xff] }
 0x311   : > { %3572 = vst [vmem:[#allocation2 + $0x80] sm:$0xff] %v11148_v28  ;;  %v3515_v25 = vadd.f32 %v11011_v44, %v3479_v34  ;;  %8283 = vmatmul.mubr.f32.gmra.mxu1 %v11151_v39  ;;  %8489 = vmatprep.mubr.f32.mxu0 %v11148_v28 }
 0x312   : > { %v3408_v17 = vpop.f32.mrf.mxu0 }
 0x313   : > { %v11157_v46 = vmax.f32 %v3515_v25, 0.0  ;;  %v3480_v6 = vadd.f32 %v3408_v17, %v10976_v30 }
 0x314   : > { %v8201_v40 = vpop.f32.mrf.mxu0  ;;  %v11160_v3 = vld [vmem:[#allocation2 + $0x71] sm:$0xff] }
 0x315   : > { %3573 = vst [vmem:[#allocation2 + $0x88] sm:$0xff] %v11157_v46  ;;  %v3516_v1 = vadd.f32 %v11011_v44, %v3480_v6  ;;  %8285 = vmatprep.mubr.f32.mxu1 %v11160_v3  ;;  %8490 = vmatmul.mubr.f32.gmra.mxu0 %v11157_v46 }
 0x316   : > { %v3413_v63 = vpop.f32.mrf.mxu0 }
 0x317   : > { %v11166_v42 = vmax.f32 %v3516_v1, 0.0  ;;  %v3481_v0 = vadd.f32 %v3413_v63, %v10979_v54 }
 0x318   : > { %v8204_v21 = vpop.f32.mrf.mxu0  ;;  %v11169_v35 = vld [vmem:[#allocation2 + $0x79] sm:$0xff] }
 0x319   : > { %3574 = vst [vmem:[#allocation2 + $0x90] sm:$0xff] %v11166_v42  ;;  %v3517_v30 = vadd.f32 %v11011_v44, %v3481_v0  ;;  %8286 = vmatmul.mubr.f32.gmra.mxu1 %v11169_v35  ;;  %8492 = vmatprep.mubr.f32.mxu0 %v11166_v42 }
 0x31a   : > { %v3418_v24 = vpop.f32.mrf.mxu0 }
 0x31b   : > { %v11175_v57 = vmax.f32 %v3517_v30, 0.0  ;;  %v3482_v22 = vadd.f32 %v3418_v24, %v10982_v5 }
 0x31c   : > { %v8207_v60 = vpop.f32.mrf.mxu0  ;;  %v11178_v19 = vld [vmem:[#allocation2 + $0x81] sm:$0xff] }
 0x31d   : > { %3575 = vst [vmem:[#allocation2 + $0x98] sm:$0xff] %v11175_v57  ;;  %v3518_v54 = vadd.f32 %v11011_v44, %v3482_v22  ;;  %8288 = vmatprep.mubr.f32.mxu1 %v11178_v19  ;;  %8493 = vmatmul.mubr.f32.gmra.mxu0 %v11175_v57 }
 0x31e   : > { %v3423_v55 = vpop.f32.mrf.mxu0 }
 0x31f   : > { %v11184_v62 = vmax.f32 %v3518_v54, 0.0  ;;  %v3483_v34 = vadd.f32 %v3423_v55, %v10985_v50 }
 0x320   : > { %v8210_v52 = vpop.f32.mrf.mxu0  ;;  %v11187_v25 = vld [vmem:[#allocation2 + $0x89] sm:$0xff] }
 0x321   : > { %3576 = vst [vmem:[#allocation2 + $0xa0] sm:$0xff] %v11184_v62  ;;  %v3519_v5 = vadd.f32 %v11011_v44, %v3483_v34  ;;  %8289 = vmatmul.mubr.f32.gmra.mxu1 %v11187_v25  ;;  %8495 = vmatprep.mubr.f32.mxu0 %v11184_v62 }
 0x322   : > { %v3428_v17 = vpop.f32.mrf.mxu0 }
 0x323   : > { %v11193_v6 = vmax.f32 %v3519_v5, 0.0  ;;  %v3484_v40 = vadd.f32 %v3428_v17, %v10988_v14 }
 0x324   : > { %v8213_v1 = vpop.f32.mrf.mxu0  ;;  %v11196_v63 = vld [vmem:[#allocation2 + $0x91] sm:$0xff] }
 0x325   : > { %3577 = vst [vmem:[#allocation2 + $0xa8] sm:$0xff] %v11193_v6  ;;  %v3520_v50 = vadd.f32 %v11011_v44, %v3484_v40  ;;  %8291 = vmatprep.mubr.f32.mxu1 %v11196_v63  ;;  %8496 = vmatmul.mubr.f32.gmra.mxu0 %v11193_v6 }
 0x326   : > { %v3433_v0 = vpop.f32.mrf.mxu0 }
 0x327   : > { %v11202_v21 = vmax.f32 %v3520_v50, 0.0  ;;  %v3485_v30 = vadd.f32 %v3433_v0, %v10991_v4 }
 0x328   : > { %v8216_v24 = vpop.f32.mrf.mxu0  ;;  %v11205_v22 = vld [vmem:[#allocation2 + $0x99] sm:$0xff] }
 0x329   : > { %3578 = vst [vmem:[#allocation2 + $0xb0] sm:$0xff] %v11202_v21  ;;  %v3521_v14 = vadd.f32 %v11011_v44, %v3485_v30  ;;  %8292 = vmatmul.mubr.f32.gmra.mxu1 %v11205_v22  ;;  %8498 = vmatprep.mubr.f32.mxu0 %v11202_v21 }
 0x32a   : > { %v3438_v60 = vpop.f32.mrf.mxu0 }
 0x32b   : > { %v11211_v54 = vmax.f32 %v3521_v14, 0.0  ;;  %v3486_v55 = vadd.f32 %v3438_v60, %v10994_v48 }
 0x32c   : > { %v8219_v34 = vpop.f32.mrf.mxu0  ;;  %v11214_v52 = vld [vmem:[#allocation2 + $0xa1] sm:$0xff] }
 0x32d   : > { %3579 = vst [vmem:[#allocation2 + $0xb8] sm:$0xff] %v11211_v54  ;;  %v3522_v4 = vadd.f32 %v11011_v44, %v3486_v55  ;;  %8294 = vmatprep.mubr.f32.mxu1 %v11214_v52  ;;  %8499 = vmatmul.mubr.f32.gmra.mxu0 %v11211_v54 }
 0x32e   : > { %v3443_v5 = vpop.f32.mrf.mxu0 }
 0x32f   : > { %v3551_v17 = vmax.f32 %v3522_v4, 0.0  ;;  %v3487_v40 = vadd.f32 %v3443_v5, %v10997_v8  ;;  %v11230_v8 = vld [vmem:[#allocation2 + $0x12] sm:$0xff] }
 0x330   : > { %v8222_v1 = vpop.f32.mrf.mxu0  ;;  %v11221_v50 = vld [vmem:[#allocation2 + $0xa9] sm:$0xff] }
 0x331   : > { %3580 = vst [vmem:[#allocation2 + $0xc0] sm:$0xff] %v3551_v17  ;;  %v3523_v48 = vadd.f32 %v11011_v44, %v3487_v40  ;;  %8295 = vmatmul.mubr.f32.gmra.mxu1 %v11221_v50  ;;  %8501 = vmatprep.mubr.f32.mxu0 %v3551_v17 }
 0x332   : > { %v3448_v0 = vpop.f32.mrf.mxu0 }
 0x333   : > { %v3552_v30 = vmax.f32 %v3523_v48, 0.0  ;;  %v3488_v24 = vadd.f32 %v3448_v0, %v11000_v58  ;;  %v11236_v58 = vld [vmem:[#allocation2 + $0x1a] sm:$0xff]  ;;  %v11241_v48 = vld [vmem:[#allocation2 + $0x22] sm:$0xff] }
 0x334   : > { %v8225_v14 = vpop.f32.mrf.mxu0  ;;  %v11226_v60 = vld [vmem:[#allocation2 + $0xb1] sm:$0xff] }
 0x335   : > { %3581 = vst [vmem:[#allocation2 + $0xc8] sm:$0xff] %v3552_v30  ;;  %v3524_v55 = vadd.f32 %v11011_v44, %v3488_v24  ;;  %8297 = vmatprep.mubr.f32.mxu1 %v11226_v60  ;;  %8502 = vmatmul.mubr.f32.gmra.mxu0 %v3552_v30  ;;  %v5325_v0 = vld [vmem:[#allocation3 + $0x3f0] sm:$0xff] }
 0x336   : > { %v3453_v34 = vpop.f32.mrf.mxu0  ;;  %8604 = vmatprep.mubr.f32.mxu0 %v11230_v8  ;;  %v4075_v14 = vld [vmem:[#allocation3 + $0x170] sm:$0xff] }
 0x337   : > { %v3553_v4 = vmax.f32 %v3524_v55, 0.0  ;;  %v3489_v5 = vadd.f32 %v3453_v34, %v11003_v32  ;;  %v11248_v55 = vld [vmem:[#allocation2 + $0x2a] sm:$0xff] }
 0x338   : > { %v8228_v17 = vpop.f32.mrf.mxu0  ;;  %v11234_v40 = vld [vmem:[#allocation2 + $0xb9] sm:$0xff] }
 0x339   : > { %3582 = vst [vmem:[#allocation2 + $0xd0] sm:$0xff] %v3553_v4  ;;  %v3525_v1 = vadd.f32 %v11011_v44, %v3489_v5  ;;  %8298 = vmatmul.mubr.f32.gmra.mxu1 %v11234_v40  ;;  %8605 = vmatmul.mubr.f32.vlgmr.msra.gmra.mxu0 %v11236_v58  ;;  %v4069_v5 = vld [vmem:[#allocation3 + $0x140] sm:$0xff] }
 0x33a   : > { %v3458_v30 = vpop.f32.mrf.mxu0  ;;  %8332 = vmatprep.mubr.f32.mxu1 %v3527_v11  ;;  %8607 = vmatprep.mubr.f32.mxu0 %v11241_v48  ;;  %v11280_v17 = vld [vmem:[#allocation2 + $0x62] sm:$0xff] }
 0x33b   : > { %v3554_v32 = vmax.f32 %v3525_v1, 0.0  ;;  %v3490_v24 = vadd.f32 %v3458_v30, %v11006_v41  ;;  %8709 = vmatpush3.msra.mxu0 %v11120_v56  ;;  %v4074_v41 = vld [vmem:[#allocation3 + $0x168] sm:$0xff]  ;;  %v4073_v56 = vld [vmem:[#allocation3 + $0x160] sm:$0xff]  ;;  %v4067_v30 = vld [vmem:[#allocation3 + $0x130] sm:$0xff] }
 0x33c   : > { %8710 = vmatprep.subr.mxu0 %v5325_v0  ;;  %v8231_v34 = vpop.f32.mrf.mxu0  ;;  %v5324_v1 = vld [vmem:[#allocation3 + $0x3e8] sm:$0xff] }
 0x33d   : > { %3583 = vst [vmem:[#allocation2 + $0xd8] sm:$0xff] %v3554_v32  ;;  %v3526_v4 = vadd.f32 %v11011_v44, %v3490_v24  ;;  %8333 = vmatmul.mubr.f32.vlgmr.msra.gmra.mxu1 %v3528_v20  ;;  %8608 = vmatmul.mubr.f32.gmra.mxu0 %v11248_v55  ;;  %v4072_v44 = vld [vmem:[#allocation3 + $0x158] sm:$0xff]  ;;  %v4066_v24 = vld [vmem:[#allocation3 + $0x128] sm:$0xff]  ;;  %v4065_v34 = vld [vmem:[#allocation3 + $0x120] sm:$0xff] }
 0x33e   : > { %8335 = vmatprep.mubr.f32.mxu1 %v11029_v49  ;;  %8369 = vmatpush3.msra.mxu1 %v11132_v61  ;;  %v11264_v20 = vld [vmem:[#allocation2 + $0x42] sm:$0xff]  ;;  %v4071_v49 = vld [vmem:[#allocation3 + $0x150] sm:$0xff] }
 0x33f   : > { %v3555_v11 = vmax.f32 %v3526_v4, 0.0  ;;  %8370 = vmatprep.subr.mxu1 %v4075_v14  ;;  %8610 = vmatprep.mubr.f32.mxu0 %v11256_v10  ;;  %v11272_v61 = vld [vmem:[#allocation2 + $0x52] sm:$0xff]  ;;  %v11296_v32 = vld [vmem:[#allocation2 + $0x82] sm:$0xff] }
 0x340   : > { %8371 = vmatpush3.msra.mxu1 %v4075_v14  ;;  %8711 = vmatpush3.msra.mxu0 %v5325_v0  ;;  %v11288_v0 = vld [vmem:[#allocation2 + $0x72] sm:$0xff]  ;;  %v5319_v4 = vld [vmem:[#allocation3 + $0x3c0] sm:$0xff] }
 0x341   : > { %3584 = vst [vmem:[#allocation2 + $0xe0] sm:$0xff] %v3555_v11  ;;  %8336 = vmatmul.mubr.f32.gmra.mxu1 %v11035_v47  ;;  %8372 = vmatprep.subr.mxu1 %v4074_v41  ;;  %v11269_v47 = vld [vmem:[#allocation2 + $0x4a] sm:$0xff]  ;;  %v5321_v14 = vld [vmem:[#allocation3 + $0x3d0] sm:$0xff] }
 0x342   : > { %8338 = vmatprep.mubr.f32.mxu1 %v11042_v7  ;;  %8373 = vmatpush3.msra.mxu1 %v4074_v41  ;;  %v4070_v7 = vld [vmem:[#allocation3 + $0x148] sm:$0xff]  ;;  %v5318_v41 = vld [vmem:[#allocation3 + $0x3b8] sm:$0xff]  ;;  %v5317_v11 = vld [vmem:[#allocation3 + $0x3b0] sm:$0xff] }
 0x343   : > { %8374 = vmatprep.subr.mxu1 %v4073_v56  ;;  %8611 = vmatmul.mubr.f32.gmra.mxu0 %v11261_v38 }
 0x344   : > { %8375 = vmatpush3.msra.mxu1 %v4073_v56  ;;  %8613 = vmatprep.mubr.f32.mxu0 %v11264_v20  ;;  %v4063_v56 = vld [vmem:[#allocation3 + $0x110] sm:$0xff] }
 0x345   : > { %8339 = vmatmul.mubr.f32.gmra.mxu1 %v11049_v53  ;;  %8376 = vmatprep.subr.mxu1 %v4072_v44  ;;  %v11277_v53 = vld [vmem:[#allocation2 + $0x5a] sm:$0xff] }
 0x346   : > { %8341 = vmatprep.mubr.f32.mxu1 %v11055_v23  ;;  %8377 = vmatpush3.msra.mxu1 %v4072_v44  ;;  %v4068_v23 = vld [vmem:[#allocation3 + $0x138] sm:$0xff]  ;;  %v4062_v44 = vld [vmem:[#allocation3 + $0x108] sm:$0xff] }
 0x347   : > { %8378 = vmatprep.subr.mxu1 %v4071_v49  ;;  %8614 = vmatmul.mubr.f32.gmra.mxu0 %v11269_v47 }
 0x348   : > { %8379 = vmatpush3.msra.mxu1 %v4071_v49  ;;  %8616 = vmatprep.mubr.f32.mxu0 %v11272_v61  ;;  %v5315_v49 = vld [vmem:[#allocation3 + $0x3a0] sm:$0xff] }
 0x349   : > { %8342 = vmatmul.mubr.f32.gmra.mxu1 %v11061_v51  ;;  %8380 = vmatprep.subr.mxu1 %v4070_v7  ;;  %v11285_v51 = vld [vmem:[#allocation2 + $0x6a] sm:$0xff] }
 0x34a   : > { %8344 = vmatprep.mubr.f32.mxu1 %v11070_v31  ;;  %8381 = vmatpush3.msra.mxu1 %v4070_v7  ;;  %v5323_v31 = vld [vmem:[#allocation3 + $0x3e0] sm:$0xff] }
 0x34b   : > { %8617 = vmatmul.mubr.f32.gmra.mxu0 %v11277_v53  ;;  %8382 = vmatprep.subr.mxu1 %v4069_v5  ;;  %v4061_v7 = vld [vmem:[#allocation3 + $0x100] sm:$0xff] }
 0x34c   : > { %8619 = vmatprep.mubr.f32.mxu0 %v11280_v17  ;;  %8383 = vmatpush3.msra.mxu1 %v4069_v5  ;;  %v11327_v5 = vld [vmem:[#allocation2 + $0xba] sm:$0xff] }
 0x34d   : > { %8345 = vmatmul.mubr.f32.gmra.mxu1 %v11079_v27  ;;  %8384 = vmatprep.subr.mxu1 %v4068_v23  ;;  %v5322_v27 = vld [vmem:[#allocation3 + $0x3d8] sm:$0xff] }
 0x34e   : > { %8347 = vmatprep.mubr.f32.mxu1 %v11088_v36  ;;  %8712 = vmatprep.subr.mxu0 %v5324_v1  ;;  %v11293_v36 = vld [vmem:[#allocation2 + $0x7a] sm:$0xff] }
 0x34f   : > { %8620 = vmatmul.mubr.f32.gmra.mxu0 %v11285_v51  ;;  %8385 = vmatpush3.msra.mxu1 %v4068_v23  ;;  %v5313_v23 = vld [vmem:[#allocation3 + $0x390] sm:$0xff] }
 0x350   : > { %8622 = vmatprep.mubr.f32.mxu0 %v11288_v0  ;;  %8713 = vmatpush3.msra.mxu0 %v5324_v1  ;;  %v4576_v1 = vld [vmem:[#allocation3 + $0x278] sm:$0xff] }
 0x351   : > { %8348 = vmatmul.mubr.f32.gmra.mxu1 %v11097_v2  ;;  %8714 = vmatprep.subr.mxu0 %v5323_v31  ;;  %v5320_v2 = vld [vmem:[#allocation3 + $0x3c8] sm:$0xff] }
 0x352   : > { %8350 = vmatprep.mubr.f32.mxu1 %v11106_v13  ;;  %8386 = vmatprep.subr.mxu1 %v4067_v30  ;;  %v11301_v13 = vld [vmem:[#allocation2 + $0x8a] sm:$0xff] }
 0x353   : > { %8715 = vmatpush3.msra.mxu0 %v5323_v31  ;;  %8387 = vmatpush3.msra.mxu1 %v4067_v30  ;;  %v4037_v31 = vld [vmem:[#allocation2 + $0xa] sm:$0xff] }
 0x354   : > { %8623 = vmatmul.mubr.f32.gmra.mxu0 %v11293_v36  ;;  %8716 = vmatprep.subr.mxu0 %v5322_v27  ;;  %v5312_v30 = vld [vmem:[#allocation3 + $0x388] sm:$0xff] }
 0x355   : > { %8351 = vmatmul.mubr.f32.gmra.mxu1 %v11115_v33  ;;  %8625 = vmatprep.mubr.f32.mxu0 %v11296_v32  ;;  %v11306_v33 = vld [vmem:[#allocation2 + $0x92] sm:$0xff] }
 0x356   : > { %8353 = vmatprep.mubr.f32.mxu1 %v11126_v43  ;;  %8717 = vmatpush3.msra.mxu0 %v5322_v27  ;;  %v4064_v43 = vld [vmem:[#allocation3 + $0x118] sm:$0xff]  ;;  %v5311_v27 = vld [vmem:[#allocation3 + $0x380] sm:$0xff] }
 0x357   : > { %8388 = vmatprep.subr.mxu1 %v4066_v24  ;;  %8718 = vmatprep.subr.mxu0 %v5321_v14 }
 0x358   : > { %8389 = vmatpush3.msra.mxu1 %v4066_v24  ;;  %8719 = vmatpush3.msra.mxu0 %v5321_v14  ;;  %v4575_v24 = vld [vmem:[#allocation3 + $0x270] sm:$0xff]  ;;  %v4574_v14 = vld [vmem:[#allocation3 + $0x268] sm:$0xff] }
 0x359   : > { %8354 = vmatmul.mubr.f32.gmra.mxu1 %v11138_v59  ;;  %8626 = vmatmul.mubr.f32.gmra.mxu0 %v11301_v13  ;;  %v11311_v59 = vld [vmem:[#allocation2 + $0x9a] sm:$0xff] }
 0x35a   : > { %8356 = vmatprep.mubr.f32.mxu1 %v11148_v28  ;;  %8720 = vmatprep.subr.mxu0 %v5320_v2  ;;  %v11314_v28 = vld [vmem:[#allocation2 + $0xa2] sm:$0xff] }
 0x35b   : > { %8390 = vmatprep.subr.mxu1 %v4065_v34  ;;  %8628 = vmatprep.mubr.f32.mxu0 %v11306_v33 }
 0x35c   : > { %8721 = vmatpush3.msra.mxu0 %v5320_v2  ;;  %8391 = vmatpush3.msra.mxu1 %v4065_v34  ;;  %v4573_v2 = vld [vmem:[#allocation3 + $0x260] sm:$0xff]  ;;  %v4544_v34 = vld [vmem:[#allocation2 + $0x51] sm:$0xff] }
 0x35d   : > { %8357 = vmatmul.mubr.f32.gmra.mxu1 %v11157_v46  ;;  %8722 = vmatprep.subr.mxu0 %v5319_v4  ;;  %v5316_v46 = vld [vmem:[#allocation3 + $0x3a8] sm:$0xff] }
 0x35e   : > { %8359 = vmatprep.mubr.f32.mxu1 %v11166_v42  ;;  %8723 = vmatpush3.msra.mxu0 %v5319_v4  ;;  %v11319_v42 = vld [vmem:[#allocation2 + $0xaa] sm:$0xff]  ;;  %v4545_v4 = vld [vmem:[#allocation2 + $0x59] sm:$0xff] }
 0x35f   : > { %8392 = vmatprep.subr.mxu1 %v4064_v43  ;;  %8629 = vmatmul.mubr.f32.gmra.mxu0 %v11311_v59 }
 0x360   : > { %8724 = vmatprep.subr.mxu0 %v5318_v41  ;;  %8393 = vmatpush3.msra.mxu1 %v4064_v43  ;;  %v5067_v43 = vld [vmem:[#allocation3 + $0x330] sm:$0xff] }
 0x361   : > { %8360 = vmatmul.mubr.f32.gmra.mxu1 %v11175_v57  ;;  %8631 = vmatprep.mubr.f32.mxu0 %v11314_v28  ;;  %v11324_v57 = vld [vmem:[#allocation2 + $0xb2] sm:$0xff] }
 0x362   : > { %8362 = vmatprep.mubr.f32.mxu1 %v11184_v62  ;;  %8725 = vmatpush3.msra.mxu0 %v5318_v41  ;;  %v5314_v62 = vld [vmem:[#allocation3 + $0x398] sm:$0xff] }
 0x363   : > { %8726 = vmatprep.subr.mxu0 %v5317_v11  ;;  %8394 = vmatprep.subr.mxu1 %v4063_v56  ;;  %v4546_v41 = vld [vmem:[#allocation2 + $0x61] sm:$0xff] }
 0x364   : > { %8727 = vmatpush3.msra.mxu0 %v5317_v11  ;;  %8395 = vmatpush3.msra.mxu1 %v4063_v56  ;;  %v4547_v11 = vld [vmem:[#allocation2 + $0x69] sm:$0xff] }
 0x365   : > { %8363 = vmatmul.mubr.f32.gmra.mxu1 %v11193_v6  ;;  %8632 = vmatmul.mubr.f32.gmra.mxu0 %v11319_v42  ;;  %v4036_v6 = vld [vmem:[#allocation2 + $0x2] sm:$0xff] }
 0x366   : > { %8728 = vmatprep.subr.mxu0 %v5316_v46  ;;  %8365 = vmatprep.mubr.f32.mxu1 %v11202_v21  ;;  %v11331_v21 = vld [vmem:[#allocation2 + $0xc2] sm:$0xff] }
 0x367   : > { %8634 = vmatprep.mubr.f32.mxu0 %v11324_v57  ;;  %8729 = vmatpush3.msra.mxu0 %v5316_v46  ;;  %v5065_v56 = vld [vmem:[#allocation3 + $0x320] sm:$0xff]  ;;  %v4548_v46 = vld [vmem:[#allocation2 + $0x71] sm:$0xff] }
 0x368   : > { %8396 = vmatprep.subr.mxu1 %v4062_v44  ;;  %8730 = vmatprep.subr.mxu0 %v5315_v49 }
 0x369   : > { %8397 = vmatpush3.msra.mxu1 %v4062_v44  ;;  %8731 = vmatpush3.msra.mxu0 %v5315_v49  ;;  %v5064_v44 = vld [vmem:[#allocation3 + $0x318] sm:$0xff] }
 0x36a   : > { %8366 = vmatmul.mubr.f32.gmra.mxu1 %v11211_v54  ;;  %8635 = vmatmul.mubr.f32.gmra.mxu0 %v11327_v5  ;;  %v11334_v54 = vld [vmem:[#allocation2 + $0xca] sm:$0xff] }
 0x36b   : > { %8732 = vmatprep.subr.mxu0 %v5314_v62  ;;  %8398 = vmatprep.subr.mxu1 %v4061_v7 }
 0x36c   : > { %8400 = vmatprep.mubr.f32.mxu1 %v4036_v6  ;;  %8637 = vmatprep.mubr.f32.mxu0 %v11331_v21  ;;  %v4550_v6 = vld [vmem:[#allocation2 + $0x81] sm:$0xff] }
 0x36d   : > { %8733 = vmatpush3.msra.mxu0 %v5314_v62  ;;  %8399 = vmatpush3.msra.mxu1 %v4061_v7  ;;  %v4549_v62 = vld [vmem:[#allocation2 + $0x79] sm:$0xff] }
 0x36e   : > { %8734 = vmatprep.subr.mxu0 %v5313_v23  ;;  %8401 = vmatmul.mubr.f32.vlgmr.msra.gmra.mxu1 %v4037_v31  ;;  %v5063_v7 = vld [vmem:[#allocation3 + $0x310] sm:$0xff]  ;;  %v4551_v31 = vld [vmem:[#allocation2 + $0x89] sm:$0xff] }
 0x36f   : > { %8735 = vmatpush3.msra.mxu0 %v5313_v23  ;;  %8504 = vmatprep.subr.mxu1 %v4576_v1  ;;  %v5062_v23 = vld [vmem:[#allocation3 + $0x308] sm:$0xff] }
 0x370   : > { %8638 = vmatmul.mubr.f32.gmra.mxu0 %v11334_v54  ;;  %8736 = vmatprep.subr.mxu0 %v5312_v30 }
 0x371   : > { %8403 = vmatprep.mubr.f32.mxu1 %v11230_v8  ;;  %8505 = vmatpush3.msra.mxu1 %v4576_v1  ;;  %v5308_v8 = vld [vmem:[#allocation2 + $0xd1] sm:$0xff] }
 0x372   : > { %8737 = vmatpush3.msra.mxu0 %v5312_v30  ;;  %8740 = vmatprep.mubr.f32.mxu0 %v11064_v9  ;;  %v4572_v9 = vld [vmem:[#allocation3 + $0x258] sm:$0xff]  ;;  %v5061_v30 = vld [vmem:[#allocation3 + $0x300] sm:$0xff] }
 0x373   : > { %8738 = vmatprep.subr.mxu0 %v5311_v27  ;;  %8506 = vmatprep.subr.mxu1 %v4575_v24 }
 0x374   : > { %8739 = vmatpush3.msra.mxu0 %v5311_v27  ;;  %8404 = vmatmul.mubr.f32.gmra.mxu1 %v11236_v58  ;;  %v4537_v58 = vld [vmem:[#allocation2 + $0x19] sm:$0xff] }
 0x375   : > { %8507 = vmatpush3.msra.mxu1 %v4575_v24  ;;  %8741 = vmatmul.mubr.f32.vlgmr.msra.gmra.mxu0 %v11073_v26  ;;  %v4571_v26 = vld [vmem:[#allocation3 + $0x250] sm:$0xff] }
 0x376   : > { %8406 = vmatprep.mubr.f32.mxu1 %v11241_v48  ;;  %8743 = vmatprep.mubr.f32.mxu0 %v11082_v12  ;;  %v4570_v12 = vld [vmem:[#allocation3 + $0x248] sm:$0xff]  ;;  %v5309_v48 = vld [vmem:[#allocation2 + $0xd9] sm:$0xff] }
 0x377   : > { %8508 = vmatprep.subr.mxu1 %v4574_v14  ;;  %v4552_v24 = vld [vmem:[#allocation2 + $0x91] sm:$0xff] }
 0x378   : > { %8509 = vmatpush3.msra.mxu1 %v4574_v14  ;;  %v5576_v14 = vld [vmem:[#allocation3 + $0x478] sm:$0xff] }
 0x379   : > { %8407 = vmatmul.mubr.f32.gmra.mxu1 %v11248_v55  ;;  %8744 = vmatmul.mubr.f32.gmra.mxu0 %v11091_v15  ;;  %v4569_v15 = vld [vmem:[#allocation3 + $0x240] sm:$0xff]  ;;  %v5075_v55 = vld [vmem:[#allocation3 + $0x370] sm:$0xff] }
 0x37a   : > { %8409 = vmatprep.mubr.f32.mxu1 %v11256_v10  ;;  %8510 = vmatprep.subr.mxu1 %v4573_v2  ;;  %v4538_v10 = vld [vmem:[#allocation2 + $0x21] sm:$0xff] }
 0x37b   : > { %8746 = vmatprep.mubr.f32.mxu0 %v11100_v45  ;;  %8511 = vmatpush3.msra.mxu1 %v4573_v2  ;;  %v4568_v45 = vld [vmem:[#allocation3 + $0x238] sm:$0xff] }
 0x37c   : > { %8512 = vmatprep.subr.mxu1 %v4572_v9  ;;  %v4553_v2 = vld [vmem:[#allocation2 + $0x99] sm:$0xff] }
 0x37d   : > { %8410 = vmatmul.mubr.f32.gmra.mxu1 %v11261_v38  ;;  %8747 = vmatmul.mubr.f32.gmra.mxu0 %v11109_v18  ;;  %v4567_v18 = vld [vmem:[#allocation3 + $0x230] sm:$0xff]  ;;  %v5074_v38 = vld [vmem:[#allocation3 + $0x368] sm:$0xff] }
 0x37e   : > { %8412 = vmatprep.mubr.f32.mxu1 %v11264_v20  ;;  %8513 = vmatpush3.msra.mxu1 %v4572_v9  ;;  %v4539_v20 = vld [vmem:[#allocation2 + $0x29] sm:$0xff] }
 0x37f   : > { %8749 = vmatprep.mubr.f32.mxu0 %v11118_v16  ;;  %8514 = vmatprep.subr.mxu1 %v4571_v26  ;;  %v4566_v16 = vld [vmem:[#allocation3 + $0x228] sm:$0xff] }
 0x380   : > { %8515 = vmatpush3.msra.mxu1 %v4571_v26 }
 0x381   : > { %8413 = vmatmul.mubr.f32.gmra.mxu1 %v11269_v47  ;;  %8750 = vmatmul.mubr.f32.gmra.mxu0 %v11130_v37  ;;  %v4565_v37 = vld [vmem:[#allocation3 + $0x220] sm:$0xff] }
 0x382   : > { %8415 = vmatprep.mubr.f32.mxu1 %v11272_v61  ;;  %8752 = vmatprep.mubr.f32.mxu0 %v11142_v29  ;;  %v4564_v29 = vld [vmem:[#allocation3 + $0x218] sm:$0xff]  ;;  %v5073_v47 = vld [vmem:[#allocation3 + $0x360] sm:$0xff]  ;;  %v4540_v61 = vld [vmem:[#allocation2 + $0x31] sm:$0xff] }
 0x383   : > { %8516 = vmatprep.subr.mxu1 %v4570_v12 }
 0x384   : > { %8517 = vmatpush3.msra.mxu1 %v4570_v12 }
 0x385   : > { %8416 = vmatmul.mubr.f32.gmra.mxu1 %v11277_v53  ;;  %8753 = vmatmul.mubr.f32.gmra.mxu0 %v11151_v39  ;;  %v4563_v39 = vld [vmem:[#allocation3 + $0x210] sm:$0xff]  ;;  %v5072_v53 = vld [vmem:[#allocation3 + $0x358] sm:$0xff] }
 0x386   : > { %8418 = vmatprep.mubr.f32.mxu1 %v11280_v17  ;;  %8518 = vmatprep.subr.mxu1 %v4569_v15  ;;  %v4541_v17 = vld [vmem:[#allocation2 + $0x39] sm:$0xff] }
 0x387   : > { %8755 = vmatprep.mubr.f32.mxu0 %v11160_v3  ;;  %8519 = vmatpush3.msra.mxu1 %v4569_v15  ;;  %v4562_v3 = vld [vmem:[#allocation3 + $0x208] sm:$0xff] }
 0x388   : > { %8520 = vmatprep.subr.mxu1 %v4568_v45 }
 0x389   : > { %8419 = vmatmul.mubr.f32.gmra.mxu1 %v11285_v51  ;;  %8756 = vmatmul.mubr.f32.gmra.mxu0 %v11169_v35  ;;  %v11377_v35 = vld [vmem:[#allocation2 + $0xc1] sm:$0xff]  ;;  %v5071_v51 = vld [vmem:[#allocation3 + $0x350] sm:$0xff] }
 0x38a   : > { %8421 = vmatprep.mubr.f32.mxu1 %v11288_v0  ;;  %8521 = vmatpush3.msra.mxu1 %v4568_v45  ;;  %v4542_v0 = vld [vmem:[#allocation2 + $0x41] sm:$0xff] }
 0x38b   : > { %8758 = vmatprep.mubr.f32.mxu0 %v11178_v19  ;;  %8522 = vmatprep.subr.mxu1 %v4567_v18  ;;  %v4561_v19 = vld [vmem:[#allocation3 + $0x200] sm:$0xff] }
 0x38c   : > { %8523 = vmatpush3.msra.mxu1 %v4567_v18  ;;  %v5036_v18 = vld [vmem:[#allocation2 + $0x20] sm:$0xff] }
 0x38d   : > { %8422 = vmatmul.mubr.f32.gmra.mxu1 %v11293_v36  ;;  %8759 = vmatmul.mubr.f32.gmra.mxu0 %v11187_v25  ;;  %v11381_v25 = vld [vmem:[#allocation2 + $0xc9] sm:$0xff] }
 0x38e   : > { %8424 = vmatprep.mubr.f32.mxu1 %v11296_v32  ;;  %8761 = vmatprep.mubr.f32.mxu0 %v11196_v63  ;;  %v4536_v63 = vld [vmem:[#allocation2 + $0x11] sm:$0xff]  ;;  %v4543_v32 = vld [vmem:[#allocation2 + $0x49] sm:$0xff] }
 0x38f   : > { %8524 = vmatprep.subr.mxu1 %v4566_v16  ;;  %v5070_v36 = vld [vmem:[#allocation3 + $0x348] sm:$0xff] }
 0x390   : > { %8525 = vmatpush3.msra.mxu1 %v4566_v16  ;;  %v5037_v16 = vld [vmem:[#allocation2 + $0x28] sm:$0xff] }
 0x391   : > { %8425 = vmatmul.mubr.f32.gmra.mxu1 %v11301_v13  ;;  %8762 = vmatmul.mubr.f32.gmra.mxu0 %v11205_v22  ;;  %v5076_v22 = vld [vmem:[#allocation3 + $0x378] sm:$0xff]  ;;  %v5069_v13 = vld [vmem:[#allocation3 + $0x340] sm:$0xff] }
 0x392   : > { %8427 = vmatprep.mubr.f32.mxu1 %v11306_v33  ;;  %8526 = vmatprep.subr.mxu1 %v4565_v37  ;;  %v5068_v33 = vld [vmem:[#allocation3 + $0x338] sm:$0xff] }
 0x393   : > { %8764 = vmatprep.mubr.f32.mxu0 %v11214_v52  ;;  %8527 = vmatpush3.msra.mxu1 %v4565_v37  ;;  %v5574_v37 = vld [vmem:[#allocation3 + $0x468] sm:$0xff] }
 0x394   : > { %8528 = vmatprep.subr.mxu1 %v4564_v29 }
 0x395   : > { %8428 = vmatmul.mubr.f32.gmra.mxu1 %v11311_v59  ;;  %8765 = vmatmul.mubr.f32.gmra.mxu0 %v11221_v50  ;;  %v5066_v59 = vld [vmem:[#allocation3 + $0x328] sm:$0xff] }
 0x396   : > { %8430 = vmatprep.mubr.f32.mxu1 %v11314_v28  ;;  %8529 = vmatpush3.msra.mxu1 %v4564_v29 }
 0x397   : > { %8767 = vmatprep.mubr.f32.mxu0 %v11226_v60  ;;  %8530 = vmatprep.subr.mxu1 %v4563_v39 }
 0x398   : > { %8531 = vmatpush3.msra.mxu1 %v4563_v39  ;;  %v5573_v39 = vld [vmem:[#allocation3 + $0x460] sm:$0xff] }
 0x399   : > { %8431 = vmatmul.mubr.f32.gmra.mxu1 %v11319_v42  ;;  %8768 = vmatmul.mubr.f32.gmra.mxu0 %v11234_v40 }
 0x39a   : > { %8433 = vmatprep.mubr.f32.mxu1 %v11324_v57  ;;  %8770 = vmatprep.mubr.f32.mxu0 %v11377_v35 }
 0x39b   : > { %8532 = vmatprep.subr.mxu1 %v4562_v3 }
 0x39c   : > { %8533 = vmatpush3.msra.mxu1 %v4562_v3 }
 0x39d   : > { %8434 = vmatmul.mubr.f32.gmra.mxu1 %v11327_v5  ;;  %8771 = vmatmul.mubr.f32.gmra.mxu0 %v11381_v25 }
 0x39e   : > { %8534 = vmatprep.subr.mxu1 %v4561_v19  ;;  %8536 = vmatprep.mubr.f32.mxu1 %v4536_v63  ;;  %v5571_v63 = vld [vmem:[#allocation3 + $0x450] sm:$0xff] }
 0x39f   : > { %8773 = vmatprep.mubr.f32.mxu0 %v5308_v8  ;;  %8535 = vmatpush3.msra.mxu1 %v4561_v19  ;;  %v5572_v19 = vld [vmem:[#allocation3 + $0x458] sm:$0xff]  ;;  %v5042_v8 = vld [vmem:[#allocation2 + $0x50] sm:$0xff] }
 0x3a0   : > { %8640 = vmatprep.subr.mxu1 %v5076_v22 }
 0x3a1   : > { %8537 = vmatmul.mubr.f32.vlgmr.msra.gmra.mxu1 %v4537_v58  ;;  %8774 = vmatmul.mubr.f32.gmra.mxu0 %v5309_v48  ;;  %v11385_v49 = vpop.f32.mrf.mxu1  ;;  %v5570_v58 = vld [vmem:[#allocation3 + $0x448] sm:$0xff] }
 0x3a2   : > { %8539 = vmatprep.mubr.f32.mxu1 %v4538_v10  ;;  %8641 = vmatpush3.msra.mxu1 %v5076_v22  ;;  %v5569_v10 = vld [vmem:[#allocation3 + $0x440] sm:$0xff] }
 0x3a3   : > { %8642 = vmatprep.subr.mxu1 %v5075_v55  ;;  %v11387_v1 = vpop.f32.mrf.mxu1 }
 0x3a4   : > { %8643 = vmatpush3.msra.mxu1 %v5075_v55  ;;  %v5043_v55 = vld [vmem:[#allocation2 + $0x58] sm:$0xff] }
 0x3a5   : > { %8540 = vmatmul.mubr.f32.gmra.mxu1 %v4539_v20  ;;  %8644 = vmatprep.subr.mxu1 %v5074_v38  ;;  %v5568_v20 = vld [vmem:[#allocation3 + $0x438] sm:$0xff] }
 0x3a6   : > { %8542 = vmatprep.mubr.f32.mxu1 %v4540_v61  ;;  %8645 = vmatpush3.msra.mxu1 %v5074_v38  ;;  %v5044_v38 = vld [vmem:[#allocation2 + $0x60] sm:$0xff]  ;;  %v5045_v61 = vld [vmem:[#allocation2 + $0x68] sm:$0xff] }
 0x3a7   : > { %8646 = vmatprep.subr.mxu1 %v5073_v47 }
 0x3a8   : > { %8647 = vmatpush3.msra.mxu1 %v5073_v47 }
 0x3a9   : > { %8543 = vmatmul.mubr.f32.gmra.mxu1 %v4541_v17  ;;  %8648 = vmatprep.subr.mxu1 %v5072_v53  ;;  %v11389_v27 = vpop.f32.mrf.mxu1 }
 0x3aa   : > { %8545 = vmatprep.mubr.f32.mxu1 %v4542_v0  ;;  %8649 = vmatpush3.msra.mxu1 %v5072_v53  ;;  %v5567_v53 = vld [vmem:[#allocation3 + $0x430] sm:$0xff]  ;;  %v5566_v0 = vld [vmem:[#allocation3 + $0x428] sm:$0xff] }
 0x3ab   : > { %8650 = vmatprep.subr.mxu1 %v5071_v51  ;;  %v11391_v9 = vpop.f32.mrf.mxu1 }
 0x3ac   : > { %8651 = vmatpush3.msra.mxu1 %v5071_v51  ;;  %v5046_v51 = vld [vmem:[#allocation2 + $0x70] sm:$0xff] }
 0x3ad   : > { %8546 = vmatmul.mubr.f32.gmra.mxu1 %v4543_v32  ;;  %8652 = vmatprep.subr.mxu1 %v5070_v36  ;;  %v5565_v32 = vld [vmem:[#allocation3 + $0x420] sm:$0xff] }
 0x3ae   : > { %8548 = vmatprep.mubr.f32.mxu1 %v4544_v34  ;;  %8653 = vmatpush3.msra.mxu1 %v5070_v36  ;;  %v5047_v36 = vld [vmem:[#allocation2 + $0x78] sm:$0xff]  ;;  %v5048_v34 = vld [vmem:[#allocation2 + $0x80] sm:$0xff] }
 0x3af   : > { %8654 = vmatprep.subr.mxu1 %v5069_v13 }
 0x3b0   : > { %8655 = vmatpush3.msra.mxu1 %v5069_v13 }
 0x3b1   : > { %8549 = vmatmul.mubr.f32.gmra.mxu1 %v4545_v4  ;;  %8656 = vmatprep.subr.mxu1 %v5068_v33  ;;  %v11394_v26 = vpop.f32.mrf.mxu1  ;;  %v11423_v4 = vpop.f32.mrf.mxu0 }
 0x3b2   : > { %8551 = vmatprep.mubr.f32.mxu1 %v4546_v41  ;;  %8657 = vmatpush3.msra.mxu1 %v5068_v33  ;;  %v5564_v33 = vld [vmem:[#allocation3 + $0x418] sm:$0xff]  ;;  %v5049_v41 = vld [vmem:[#allocation2 + $0x88] sm:$0xff] }
 0x3b3   : > { %8658 = vmatprep.subr.mxu1 %v5067_v43  ;;  %v11398_v12 = vpop.f32.mrf.mxu1 }
 0x3b4   : > { %8659 = vmatpush3.msra.mxu1 %v5067_v43 }
 0x3b5   : > { %8552 = vmatmul.mubr.f32.gmra.mxu1 %v4547_v11  ;;  %8660 = vmatprep.subr.mxu1 %v5066_v59  ;;  %v5050_v11 = vld [vmem:[#allocation2 + $0x90] sm:$0xff] }
 0x3b6   : > { %8554 = vmatprep.mubr.f32.mxu1 %v4548_v46  ;;  %8661 = vmatpush3.msra.mxu1 %v5066_v59  ;;  %v5563_v59 = vld [vmem:[#allocation3 + $0x410] sm:$0xff]  ;;  %v11427_v46 = vpop.f32.mrf.mxu0 }
 0x3b7   : > { %8662 = vmatprep.subr.mxu1 %v5065_v56 }
 0x3b8   : > { %8663 = vmatpush3.msra.mxu1 %v5065_v56  ;;  %v5562_v56 = vld [vmem:[#allocation3 + $0x408] sm:$0xff] }
 0x3b9   : > { %8555 = vmatmul.mubr.f32.gmra.mxu1 %v4549_v62  ;;  %8664 = vmatprep.subr.mxu1 %v5064_v44  ;;  %v11400_v15 = vpop.f32.mrf.mxu1  ;;  %v5051_v62 = vld [vmem:[#allocation2 + $0x98] sm:$0xff] }
 0x3ba   : > { %8557 = vmatprep.mubr.f32.mxu1 %v4550_v6  ;;  %8665 = vmatpush3.msra.mxu1 %v5064_v44  ;;  %v11431_v6 = vpop.f32.mrf.mxu0 }
 0x3bb   : > { %8666 = vmatprep.subr.mxu1 %v5063_v7  ;;  %v11404_v45 = vpop.f32.mrf.mxu1 }
 0x3bc   : > { %8667 = vmatpush3.msra.mxu1 %v5063_v7  ;;  %v5561_v7 = vld [vmem:[#allocation3 + $0x400] sm:$0xff] }
 0x3bd   : > { %8558 = vmatmul.mubr.f32.gmra.mxu1 %v4551_v31  ;;  %8668 = vmatprep.subr.mxu1 %v5062_v23  ;;  %v5052_v31 = vld [vmem:[#allocation2 + $0xa0] sm:$0xff] }
 0x3be   : > { %8560 = vmatprep.mubr.f32.mxu1 %v4552_v24  ;;  %8669 = vmatpush3.msra.mxu1 %v5062_v23  ;;  %v11435_v24 = vpop.f32.mrf.mxu0 }
 0x3bf   : > { %8670 = vmatprep.subr.mxu1 %v5061_v30 }
 0x3c0   : > { %8671 = vmatpush3.msra.mxu1 %v5061_v30  ;;  %v5053_v30 = vld [vmem:[#allocation2 + $0xa8] sm:$0xff] }
 0x3c1   : > { %8561 = vmatmul.mubr.f32.gmra.mxu1 %v4553_v2  ;;  %8776 = vmatprep.subr.mxu1 %v5576_v14  ;;  %v5054_v2 = vld [vmem:[#allocation2 + $0xb0] sm:$0xff] }
 0x3c2   : > { %8563 = vmatprep.mubr.f32.mxu1 %v11214_v52  ;;  %v11407_v52 = vpop.f32.mrf.mxu1 }
 0x3c4   : > { %v11409_v29 = vpop.f32.mrf.mxu1 }
 0x3c5   : > { %8564 = vmatmul.mubr.f32.gmra.mxu1 %v11221_v50  ;;  %v5575_v50 = vld [vmem:[#allocation3 + $0x470] sm:$0xff] }
 0x3c6   : > { %8566 = vmatprep.mubr.f32.mxu1 %v11226_v60  ;;  %v5038_v60 = vld [vmem:[#allocation2 + $0x30] sm:$0xff] }
 0x3c9   : > { %8567 = vmatmul.mubr.f32.gmra.mxu1 %v11234_v40  ;;  %v5039_v40 = vld [vmem:[#allocation2 + $0x38] sm:$0xff]  ;;  %v11411_v3 = vpop.f32.mrf.mxu1 }
 0x3ca   : > { %8569 = vmatprep.mubr.f32.mxu1 %v11377_v35  ;;  %v5040_v35 = vld [vmem:[#allocation2 + $0x40] sm:$0xff] }
 0x3cb   : > { %v11413_v22 = vpop.f32.mrf.mxu1 }
 0x3cd   : > { %8570 = vmatmul.mubr.f32.gmra.mxu1 %v11381_v25  ;;  %v5041_v25 = vld [vmem:[#allocation2 + $0x48] sm:$0xff] }
 0x3ce   : > { %8672 = vmatprep.mubr.f32.mxu1 %v5036_v18  ;;  %v11439_v18 = vpop.f32.mrf.mxu0 }
 0x3d1   : > { %8673 = vmatmul.mubr.f32.vlgmr.msra.gmra.mxu1 %v5037_v16  ;;  %v11415_v48 = vpop.f32.mrf.mxu1 }
 0x3d2   : > { %8675 = vmatprep.mubr.f32.mxu1 %v5038_v60  ;;  %8777 = vmatpush3.msra.mxu1 %v5576_v14  ;;  %v5056_v60 = vld [vmem:[#allocation2 + $0xc0] sm:$0xff] }
 0x3d3   : > { %8778 = vmatprep.subr.mxu1 %v5575_v50  ;;  %v11417_v47 = vpop.f32.mrf.mxu1 }
 0x3d4   : > { %8779 = vmatpush3.msra.mxu1 %v5575_v50  ;;  %v5055_v50 = vld [vmem:[#allocation2 + $0xb8] sm:$0xff] }
 0x3d5   : > { %8676 = vmatmul.mubr.f32.gmra.mxu1 %v5039_v40  ;;  %8780 = vmatprep.subr.mxu1 %v5574_v37 }
 0x3d6   : > { %8678 = vmatprep.mubr.f32.mxu1 %v5040_v35  ;;  %8781 = vmatpush3.msra.mxu1 %v5574_v37  ;;  %v11443_v37 = vpop.f32.mrf.mxu0 }
 0x3d7   : > { %8782 = vmatprep.subr.mxu1 %v5573_v39 }
 0x3d8   : > { %8783 = vmatpush3.msra.mxu1 %v5573_v39  ;;  %v5057_v39 = vld [vmem:[#allocation2 + $0xc8] sm:$0xff]  ;;  %v11447_v35 = vpop.f32.mrf.mxu0 }
 0x3d9   : > { %8679 = vmatmul.mubr.f32.gmra.mxu1 %v5041_v25  ;;  %8784 = vmatprep.subr.mxu1 %v5572_v19  ;;  %v11419_v17 = vpop.f32.mrf.mxu1 }
 0x3da   : > { %8681 = vmatprep.mubr.f32.mxu1 %v5042_v8  ;;  %8785 = vmatpush3.msra.mxu1 %v5572_v19  ;;  %v5058_v19 = vld [vmem:[#allocation2 + $0xd0] sm:$0xff]  ;;  %v5059_v8 = vld [vmem:[#allocation2 + $0xd8] sm:$0xff] }
 0x3db   : > { %8786 = vmatprep.subr.mxu1 %v5571_v63  ;;  %v11421_v13 = vpop.f32.mrf.mxu1 }
 0x3dc   : > { %8787 = vmatpush3.msra.mxu1 %v5571_v63 }
 0x3dd   : > { %8682 = vmatmul.mubr.f32.gmra.mxu1 %v5043_v55  ;;  %8788 = vmatprep.subr.mxu1 %v5570_v58  ;;  %v5536_v55 = vld [vmem:[#allocation2 + $0x22] sm:$0xff] }
 0x3de   : > { %8684 = vmatprep.mubr.f32.mxu1 %v5044_v38  ;;  %8789 = vmatpush3.msra.mxu1 %v5570_v58  ;;  %v11453_v58 = vpop.f32.mrf.mxu0 }
 0x3df   : > { %8790 = vmatprep.subr.mxu1 %v5569_v10 }
 0x3e0   : > { %8791 = vmatpush3.msra.mxu1 %v5569_v10  ;;  %v11457_v38 = vpop.f32.mrf.mxu0 }
 0x3e1   : > { %8685 = vmatmul.mubr.f32.gmra.mxu1 %v5045_v61  ;;  %8792 = vmatprep.subr.mxu1 %v5568_v20  ;;  %v11425_v43 = vpop.f32.mrf.mxu1  ;;  %v5537_v61 = vld [vmem:[#allocation2 + $0x2a] sm:$0xff] }
 0x3e2   : > { %8687 = vmatprep.mubr.f32.mxu1 %v5046_v51  ;;  %8793 = vmatpush3.msra.mxu1 %v5568_v20 }
 0x3e3   : > { %8794 = vmatprep.subr.mxu1 %v5567_v53  ;;  %v11429_v44 = vpop.f32.mrf.mxu1 }
 0x3e4   : > { %8795 = vmatpush3.msra.mxu1 %v5567_v53  ;;  %v5538_v53 = vld [vmem:[#allocation2 + $0x32] sm:$0xff] }
 0x3e5   : > { %8688 = vmatmul.mubr.f32.gmra.mxu1 %v5047_v36  ;;  %8796 = vmatprep.subr.mxu1 %v5566_v0 }
 0x3e6   : > { %8690 = vmatprep.mubr.f32.mxu1 %v5048_v34  ;;  %8797 = vmatpush3.msra.mxu1 %v5566_v0  ;;  %v11463_v0 = vpop.f32.mrf.mxu0 }
 0x3e7   : > { %8798 = vmatprep.subr.mxu1 %v5565_v32  ;;  %12278 = vst [vmem:[#allocation13_spill] sm:$0xff] %v11463_v0 }
 0x3e8   : > { %8799 = vmatpush3.msra.mxu1 %v5565_v32  ;;  %v5539_v32 = vld [vmem:[#allocation2 + $0x3a] sm:$0xff]  ;;  %v11467_v34 = vpop.f32.mrf.mxu0 }
 0x3e9   : > { %8691 = vmatmul.mubr.f32.gmra.mxu1 %v5049_v41  ;;  %8800 = vmatprep.subr.mxu1 %v5564_v33  ;;  %v11433_v23 = vpop.f32.mrf.mxu1  ;;  %12279 = vst [vmem:[#allocation14_spill] sm:$0xff] %v11467_v34  ;;  %v5551_v34 = vld [vmem:[#allocation2 + $0x9a] sm:$0xff] }
 0x3ea   : > { %8693 = vmatprep.mubr.f32.mxu1 %v5050_v11  ;;  %8801 = vmatpush3.msra.mxu1 %v5564_v33  ;;  %v5540_v33 = vld [vmem:[#allocation2 + $0x42] sm:$0xff]  ;;  %v5541_v11 = vld [vmem:[#allocation2 + $0x4a] sm:$0xff] }
 0x3eb   : > { %8802 = vmatprep.subr.mxu1 %v5563_v59  ;;  %v11437_v14 = vpop.f32.mrf.mxu1 }
 0x3ec   : > { %8803 = vmatpush3.msra.mxu1 %v5563_v59 }
 0x3ed   : > { %8694 = vmatmul.mubr.f32.gmra.mxu1 %v5051_v62  ;;  %8804 = vmatprep.subr.mxu1 %v5562_v56  ;;  %v5542_v62 = vld [vmem:[#allocation2 + $0x52] sm:$0xff] }
 0x3ee   : > { %8696 = vmatprep.mubr.f32.mxu1 %v5052_v31  ;;  %8805 = vmatpush3.msra.mxu1 %v5562_v56  ;;  %v11473_v56 = vpop.f32.mrf.mxu0 }
 0x3ef   : > { %8806 = vmatprep.subr.mxu1 %v5561_v7  ;;  %12280 = vst [vmem:[#allocation15_spill] sm:$0xff] %v11473_v56 }
 0x3f0   : > { %8807 = vmatpush3.msra.mxu1 %v5561_v7  ;;  %v11477_v31 = vpop.f32.mrf.mxu0 }
 0x3f1   : > { %8697 = vmatmul.mubr.f32.gmra.mxu1 %v5053_v30  ;;  %v11441_v16 = vpop.f32.mrf.mxu1  ;;  %12281 = vst [vmem:[#allocation16_spill] sm:$0xff] %v11477_v31  ;;  %v5549_v31 = vld [vmem:[#allocation2 + $0x8a] sm:$0xff] }
 0x3f2   : > { %8699 = vmatprep.mubr.f32.mxu1 %v5054_v2  ;;  %v5543_v2 = vld [vmem:[#allocation2 + $0x5a] sm:$0xff] }
 0x3f3   : > { %v11445_v40 = vpop.f32.mrf.mxu1 }
 0x3f5   : > { %8700 = vmatmul.mubr.f32.gmra.mxu1 %v5055_v50  ;;  %v5544_v50 = vld [vmem:[#allocation2 + $0x62] sm:$0xff] }
 0x3f6   : > { %8702 = vmatprep.mubr.f32.mxu1 %v5056_v60 }
 0x3f9   : > { %8703 = vmatmul.mubr.f32.gmra.mxu1 %v5057_v39  ;;  %v11449_v25 = vpop.f32.mrf.mxu1  ;;  %v11483_v39 = vpop.f32.mrf.mxu0 }
 0x3fa   : > { %8705 = vmatprep.mubr.f32.mxu1 %v5058_v19  ;;  %12282 = vst [vmem:[#allocation17_spill] sm:$0xff] %v11483_v39 }
 0x3fb   : > { %v11451_v63 = vpop.f32.mrf.mxu1 }
 0x3fd   : > { %8706 = vmatmul.mubr.f32.gmra.mxu1 %v5059_v8  ;;  %v11455_v10 = vpop.f32.mrf.mxu1  ;;  %v5545_v8 = vld [vmem:[#allocation2 + $0x6a] sm:$0xff] }
 0x3fe   : > { %8808 = vmatprep.mubr.f32.mxu1 %v5536_v55  ;;  %v11487_v55 = vpop.f32.mrf.mxu0 }
 0x3ff   : > { %v11459_v20 = vpop.f32.mrf.mxu1  ;;  %12283 = vst [vmem:[#allocation18_spill] sm:$0xff] %v11487_v55  ;;  %v5550_v55 = vld [vmem:[#allocation2 + $0x92] sm:$0xff] }
 0x401   : > { %8809 = vmatmul.mubr.f32.vlgmr.msra.gmra.mxu1 %v5537_v61  ;;  %v11461_v51 = vpop.f32.mrf.mxu1  ;;  %v5546_v61 = vld [vmem:[#allocation2 + $0x72] sm:$0xff] }
 0x402   : > { %8811 = vmatprep.mubr.f32.mxu1 %v5538_v53 }
 0x403   : > { %v11465_v36 = vpop.f32.mrf.mxu1 }
 0x405   : > { %8812 = vmatmul.mubr.f32.gmra.mxu1 %v5539_v32  ;;  %v11469_v41 = vpop.f32.mrf.mxu1 }
 0x406   : > { %8814 = vmatprep.mubr.f32.mxu1 %v5540_v33  ;;  %v5547_v33 = vld [vmem:[#allocation2 + $0x7a] sm:$0xff] }
 0x407   : > { %v11471_v59 = vpop.f32.mrf.mxu1 }
 0x409   : > { %8815 = vmatmul.mubr.f32.gmra.mxu1 %v5541_v11  ;;  %v11475_v7 = vpop.f32.mrf.mxu1  ;;  %v11493_v11 = vpop.f32.mrf.mxu0 }
 0x40a   : > { %8817 = vmatprep.mubr.f32.mxu1 %v5542_v62  ;;  %12284 = vst [vmem:[#allocation19_spill] sm:$0xff] %v11493_v11  ;;  %v5548_v62 = vld [vmem:[#allocation2 + $0x82] sm:$0xff] }
 0x40b   : > { %v11479_v30 = vpop.f32.mrf.mxu1 }
 0x40d   : > { %8818 = vmatmul.mubr.f32.gmra.mxu1 %v5543_v2  ;;  %v11481_v60 = vpop.f32.mrf.mxu1 }
 0x40e   : > { %8820 = vmatprep.mubr.f32.mxu1 %v5544_v50  ;;  %v11497_v50 = vpop.f32.mrf.mxu0 }
 0x40f   : > { %v11485_v19 = vpop.f32.mrf.mxu1  ;;  %12285 = vst [vmem:[#allocation20_spill] sm:$0xff] %v11497_v50 }
 0x410   : > { %v11505_v11 = vpop.f32.mrf.mxu0 }
 0x411   : > { %8821 = vmatmul.mubr.f32.gmra.mxu1 %v5545_v8  ;;  %v11489_v53 = vpop.f32.mrf.mxu1 }
 0x412   : > { %8823 = vmatprep.mubr.f32.mxu1 %v5546_v61  ;;  %v11510_v50 = vpop.f32.mrf.mxu0 }
 0x413   : > { %v11491_v32 = vpop.f32.mrf.mxu1 }
 0x415   : > { %8824 = vmatmul.mubr.f32.gmra.mxu1 %v5547_v33  ;;  %v11495_v2 = vpop.f32.mrf.mxu1 }
 0x416   : > { %8826 = vmatprep.mubr.f32.mxu1 %v5548_v62 }
 0x417   : > { %v3977_v39 = vpop.f32.mrf.mxu1 }
 0x418   : > { %v11500_v8 = vadd.f32 %v3977_v39, %v11417_v47  ;;  %v11519_v39 = vpop.f32.mrf.mxu0 }
 0x419   : > { %8827 = vmatmul.mubr.f32.gmra.mxu1 %v5549_v31  ;;  %v8355_v61 = vpop.f32.mrf.mxu1 }
 0x41a   : > { %8829 = vmatprep.mubr.f32.mxu1 %v5550_v55  ;;  %v11503_v56 = vadd.f32 %v8355_v61, %v11419_v17 }
 0x41b   : > { %v3987_v33 = vpop.f32.mrf.mxu1 }
 0x41c   : > { %v11508_v62 = vadd.f32 %v3987_v33, %v11421_v13 }
 0x41d   : > { %8830 = vmatmul.mubr.f32.gmra.mxu1 %v5551_v34  ;;  %v8358_v0 = vpop.f32.mrf.mxu1  ;;  %v11526_v34 = vpop.f32.mrf.mxu0 }
 0x41e   : > { %8832 = vmatprep.mubr.f32.mxu1 %v11314_v28  ;;  %v11514_v47 = vadd.f32 %v8358_v0, %v11425_v43 }
 0x41f   : > { %v3997_v31 = vpop.f32.mrf.mxu1 }
 0x420   : > { %v11517_v17 = vadd.f32 %v3997_v31, %v11429_v44 }
 0x421   : > { %8833 = vmatmul.mubr.f32.gmra.mxu1 %v11319_v42  ;;  %v8361_v55 = vpop.f32.mrf.mxu1  ;;  %v11536_v42 = vpop.f32.mrf.mxu0 }
 0x422   : > { %8835 = vmatprep.mubr.f32.mxu1 %v11324_v57  ;;  %v11524_v13 = vadd.f32 %v8361_v55, %v11433_v23 }
 0x423   : > { %v4007_v28 = vpop.f32.mrf.mxu1  ;;  %v11541_v61 = vpop.f32.mrf.mxu0 }
 0x424   : > { %v11529_v43 = vadd.f32 %v4007_v28, %v11437_v14  ;;  %v5558_v14 = vld [vmem:[#allocation2 + $0xd2] sm:$0xff] }
 0x425   : > { %8836 = vmatmul.mubr.f32.gmra.mxu1 %v11327_v5  ;;  %v8364_v44 = vpop.f32.mrf.mxu1  ;;  %v11549_v55 = vpop.f32.mrf.mxu0 }
 0x426   : > { %8838 = vmatprep.mubr.f32.mxu1 %v11331_v21  ;;  %v11534_v0 = vadd.f32 %v8364_v44, %v11441_v16  ;;  %v5559_v21 = vld [vmem:[#allocation2 + $0xda] sm:$0xff]  ;;  %v3923_v16 = vadd.f32 %v11455_v10, %v11385_v49  ;;  %v3933_v49 = vadd.f32 %v11461_v51, %v11389_v27  ;;  %v3938_v27 = vadd.f32 %v11471_v59, %v11398_v12 }
 0x427   : > { %v4017_v57 = vpop.f32.mrf.mxu1  ;;  %v3963_v12 = vadd.f32 %v11481_v60, %v11407_v52  ;;  %v3968_v52 = vadd.f32 %v11491_v32, %v11413_v22 }
 0x428   : > { %v11539_v23 = vadd.f32 %v4017_v57, %v11445_v40 }
 0x429   : > { %8839 = vmatmul.mubr.f32.gmra.mxu1 %v11334_v54  ;;  %v3918_v54 = vadd.f32 %v11459_v20, %v11387_v1  ;;  %v3943_v20 = vadd.f32 %v11469_v41, %v11394_v26  ;;  %v3948_v26 = vadd.f32 %v11479_v30, %v11404_v45  ;;  %v3973_v45 = vadd.f32 %v11489_v53, %v11411_v3 }
 0x42a   : > { %8841 = vmatprep.mubr.f32.mxu1 %v5558_v14  ;;  %v8367_v33 = vpop.f32.mrf.mxu1 }
 0x42b   : > { %v11545_v5 = vadd.f32 %v8367_v33, %v11449_v25  ;;  %v11558_v25 = vpop.f32.mrf.mxu0  ;;  %v3928_v33 = vadd.f32 %v11465_v36, %v11391_v9  ;;  %v3953_v9 = vadd.f32 %v11475_v7, %v11400_v15  ;;  %v3958_v15 = vadd.f32 %v11485_v19, %v11409_v29 }
 0x42c   : > { %v4027_v31 = vpop.f32.mrf.mxu1  ;;  %v3983_v29 = vadd.f32 %v11495_v2, %v11415_v48 }
 0x42d   : > { %8842 = vmatmul.mubr.f32.gmra.mxu1 %v5559_v21  ;;  %v11552_v40 = vadd.f32 %v4027_v31, %v11451_v63  ;;  %v11566_v63 = vpop.f32.mrf.mxu0 }
 0x42e   : > { %v8402_v28 = vpop.f32.mrf.mxu1 }
 0x42f   : > { %v11556_v44 = vadd.f32 %v8402_v28, %v3923_v16  ;;  %v11574_v16 = vpop.f32.mrf.mxu0 }
 0x430   : > { %v4143_v57 = vpop.f32.mrf.mxu1 }
 0x431   : > { %v11560_v14 = vadd.f32 %v4143_v57, %v3918_v54  ;;  %v11584_v57 = vpop.f32.mrf.mxu0 }
 0x434   : > { %v8405_v10 = vpop.f32.mrf.mxu1 }
 0x435   : > { %v11568_v21 = vadd.f32 %v8405_v10, %v3933_v49 }
 0x436   : > { %v4153_v31 = vpop.f32.mrf.mxu1 }
 0x437   : > { %v11570_v1 = vadd.f32 %v4153_v31, %v3928_v33  ;;  %v11594_v33 = vpop.f32.mrf.mxu0 }
 0x439   : > { %v8408_v28 = vpop.f32.mrf.mxu1 }
 0x43a   : > { %v11578_v51 = vadd.f32 %v8408_v28, %v3943_v20  ;;  %v11604_v28 = vpop.f32.mrf.mxu0 }
 0x43b   : > { %v4163_v54 = vpop.f32.mrf.mxu1 }
 0x43c   : > { %v11582_v36 = vadd.f32 %v4163_v54, %v3938_v27 }
 0x43d   : > { %v8411_v49 = vpop.f32.mrf.mxu1 }
 0x43e   : > { %v11588_v41 = vadd.f32 %v8411_v49, %v3953_v9  ;;  %v11614_v9 = vpop.f32.mrf.mxu0 }
 0x43f   : > { %v4173_v10 = vpop.f32.mrf.mxu1 }
 0x440   : > { %v11592_v59 = vadd.f32 %v4173_v10, %v3948_v26  ;;  %v11621_v10 = vpop.f32.mrf.mxu0 }
 0x441   : > { %v8414_v31 = vpop.f32.mrf.mxu1 }
 0x442   : > { %v11598_v7 = vadd.f32 %v8414_v31, %v3963_v12  ;;  %v11629_v2 = vpop.f32.mrf.mxu0 }
 0x443   : > { %v4183_v20 = vpop.f32.mrf.mxu1 }
 0x444   : > { %v11602_v30 = vadd.f32 %v4183_v20, %v3958_v15 }
 0x445   : > { %v8417_v27 = vpop.f32.mrf.mxu1 }
 0x446   : > { %v11608_v60 = vadd.f32 %v8417_v27, %v3973_v45  ;;  %v11637_v45 = vpop.f32.mrf.mxu0 }
 0x447   : > { %v4193_v54 = vpop.f32.mrf.mxu1 }
 0x448   : > { %v11612_v19 = vadd.f32 %v4193_v54, %v3968_v52  ;;  %v11645_v54 = vpop.f32.mrf.mxu0 }
 0x449   : > { %v8420_v49 = vpop.f32.mrf.mxu1 }
 0x44a   : > { %v11616_v3 = vadd.f32 %v8420_v49, %v3983_v29 }
 0x44b   : > { %v4203_v53 = vpop.f32.mrf.mxu1 }
 0x44c   : > { %v11619_v26 = vadd.f32 %v4203_v53, %v11500_v8  ;;  %v11653_v53 = vpop.f32.mrf.mxu0 }
 0x44d   : > { %v8423_v22 = vpop.f32.mrf.mxu1 }
 0x44e   : > { %v11624_v32 = vadd.f32 %v8423_v22, %v11503_v56 }
 0x44f   : > { %v4213_v12 = vpop.f32.mrf.mxu1 }
 0x450   : > { %v11627_v48 = vadd.f32 %v4213_v12, %v11508_v62 }
 0x451   : > { %v8426_v31 = vpop.f32.mrf.mxu1 }
 0x452   : > { %v11632_v15 = vadd.f32 %v8426_v31, %v11514_v47  ;;  %v4513_v31 = vadd.f32 %v11423_v4, %v11556_v44  ;;  %v4514_v4 = vadd.f32 %v11435_v24, %v11570_v1  ;;  %v4519_v24 = vadd.f32 %v11447_v35, %v11588_v41  ;;  %v12286_v35 = vld [vmem:[#allocation13_spill] sm:$0xff] }
 0x453   : > { %v4223_v20 = vpop.f32.mrf.mxu1  ;;  %v4520_v41 = vadd.f32 %v12286_v35, %v11602_v30 }
 0x454   : > { %v11635_v8 = vadd.f32 %v4223_v20, %v11517_v17  ;;  %v11663_v20 = vpop.f32.mrf.mxu0 }
 0x455   : > { %v8429_v27 = vpop.f32.mrf.mxu1 }
 0x456   : > { %v11640_v56 = vadd.f32 %v8429_v27, %v11524_v13 }
 0x457   : > { %v4233_v52 = vpop.f32.mrf.mxu1 }
 0x458   : > { %v11643_v62 = vadd.f32 %v4233_v52, %v11529_v43 }
 0x459   : > { %v8432_v29 = vpop.f32.mrf.mxu1 }
 0x45a   : > { %v11648_v47 = vadd.f32 %v8432_v29, %v11534_v0 }
 0x45b   : > { %v4243_v49 = vpop.f32.mrf.mxu1 }
 0x45c   : > { %v11651_v17 = vadd.f32 %v4243_v49, %v11539_v23  ;;  %v4512_v23 = vadd.f32 %v11427_v46, %v11560_v14  ;;  %v11673_v49 = vpop.f32.mrf.mxu0  ;;  %v4517_v46 = vadd.f32 %v11439_v18, %v11578_v51  ;;  %v4518_v18 = vadd.f32 %v11453_v58, %v11592_v59 }
 0x45d   : > { %v8435_v22 = vpop.f32.mrf.mxu1 }
 0x45e   : > { %v11656_v13 = vadd.f32 %v8435_v22, %v11545_v5  ;;  %v4515_v5 = vadd.f32 %v11431_v6, %v11568_v21  ;;  %v11683_v14 = vpop.f32.mrf.mxu0  ;;  %v4516_v6 = vadd.f32 %v11443_v37, %v11582_v36  ;;  %v4521_v37 = vadd.f32 %v11457_v38, %v11598_v7  ;;  %v12289_v38 = vld [vmem:[#allocation15_spill] sm:$0xff] }
 0x45f   : > { %v4253_v12 = vpop.f32.mrf.mxu1  ;;  %v4522_v7 = vadd.f32 %v12289_v38, %v11612_v19 }
 0x460   : > { %v11659_v43 = vadd.f32 %v4253_v12, %v11552_v40  ;;  %v11693_v1 = vpop.f32.mrf.mxu0 }
 0x461   : > { %v8538_v0 = vpop.f32.mrf.mxu1 }
 0x462   : > { %v11665_v27 = vadd.f32 %v8538_v0, %v4513_v31  ;;  %v11703_v36 = vpop.f32.mrf.mxu0 }
 0x463   : > { %v4643_v52 = vpop.f32.mrf.mxu1 }
 0x464   : > { %v11669_v29 = vadd.f32 %v4643_v52, %v4512_v23  ;;  %v11713_v59 = vpop.f32.mrf.mxu0 }
 0x465   : > { %v8541_v40 = vpop.f32.mrf.mxu1  ;;  %12288 = vst [vmem:[#allocation13_spill] sm:$0xff] %v11713_v59 }
 0x466   : > { %v11675_v22 = vadd.f32 %v8541_v40, %v4515_v5 }
 0x467   : > { %v4653_v44 = vpop.f32.mrf.mxu1 }
 0x468   : > { %v11679_v12 = vadd.f32 %v4653_v44, %v4514_v4 }
 0x469   : > { %v8544_v31 = vpop.f32.mrf.mxu1 }
 0x46a   : > { %v11685_v0 = vadd.f32 %v8544_v31, %v4517_v46 }
 0x46b   : > { %v4663_v21 = vpop.f32.mrf.mxu1 }
 0x46c   : > { %v11689_v23 = vadd.f32 %v4663_v21, %v4516_v6  ;;  %v12287_v6 = vld [vmem:[#allocation14_spill] sm:$0xff] }
 0x46d   : > { %v8547_v52 = vpop.f32.mrf.mxu1  ;;  %v4523_v58 = vadd.f32 %v12287_v6, %v11608_v60  ;;  %v12292_v60 = vld [vmem:[#allocation17_spill] sm:$0xff] }
 0x46e   : > { %v11695_v5 = vadd.f32 %v8547_v52, %v4519_v24 }
 0x46f   : > { %v4673_v51 = vpop.f32.mrf.mxu1 }
 0x470   : > { %v11699_v40 = vadd.f32 %v4673_v51, %v4518_v18  ;;  %v12290_v51 = vld [vmem:[#allocation16_spill] sm:$0xff] }
 0x471   : > { %v8550_v4 = vpop.f32.mrf.mxu1  ;;  %v4525_v30 = vadd.f32 %v12290_v51, %v11616_v3  ;;  %v12295_v3 = vld [vmem:[#allocation19_spill] sm:$0xff] }
 0x472   : > { %v11705_v44 = vadd.f32 %v8550_v4, %v4521_v37  ;;  %v11723_v37 = vpop.f32.mrf.mxu0 }
 0x473   : > { %v4683_v46 = vpop.f32.mrf.mxu1  ;;  %12291 = vst [vmem:[#allocation14_spill] sm:$0xff] %v11723_v37 }
 0x474   : > { %v11709_v31 = vadd.f32 %v4683_v46, %v4520_v41  ;;  %v4524_v41 = vadd.f32 %v12292_v60, %v11619_v26 }
 0x475   : > { %v8553_v21 = vpop.f32.mrf.mxu1 }
 0x476   : > { %v11715_v24 = vadd.f32 %v8553_v21, %v4523_v58  ;;  %v12293_v58 = vld [vmem:[#allocation18_spill] sm:$0xff]  ;;  %v11733_v21 = vpop.f32.mrf.mxu0 }
 0x477   : > { %v4693_v52 = vpop.f32.mrf.mxu1  ;;  %v4527_v19 = vadd.f32 %v12293_v58, %v11624_v32  ;;  %12294 = vst [vmem:[#allocation15_spill] sm:$0xff] %v11733_v21  ;;  %v4528_v32 = vadd.f32 %v11505_v11, %v11635_v8  ;;  %v4533_v11 = vadd.f32 %v11526_v34, %v11648_v47  ;;  %v4534_v34 = vadd.f32 %v11549_v55, %v11659_v43 }
 0x478   : > { %v11719_v18 = vadd.f32 %v4693_v52, %v4522_v7  ;;  %v4526_v52 = vadd.f32 %v12295_v3, %v11627_v48  ;;  %v11743_v60 = vpop.f32.mrf.mxu0  ;;  %v4531_v48 = vadd.f32 %v11510_v50, %v11640_v56  ;;  %v4532_v50 = vadd.f32 %v11536_v42, %v11651_v17 }
 0x479   : > { %v8556_v4 = vpop.f32.mrf.mxu1  ;;  %12297 = vst [vmem:[#allocation16_spill] sm:$0xff] %v11743_v60 }
 0x47a   : > { %v11725_v35 = vadd.f32 %v8556_v4, %v4525_v30  ;;  %v12296_v4 = vld [vmem:[#allocation20_spill] sm:$0xff] }
 0x47b   : > { %v4703_v46 = vpop.f32.mrf.mxu1  ;;  %v4529_v26 = vadd.f32 %v12296_v4, %v11632_v15  ;;  %v4530_v15 = vadd.f32 %v11519_v39, %v11643_v62  ;;  %v4535_v39 = vadd.f32 %v11541_v61, %v11656_v13 }
 0x47c   : > { %v11729_v6 = vadd.f32 %v4703_v46, %v4524_v41 }
 0x47d   : > { %v8559_v38 = vpop.f32.mrf.mxu1 }
 0x47e   : > { %v11735_v7 = vadd.f32 %v8559_v38, %v4527_v19  ;;  %v11753_v38 = vpop.f32.mrf.mxu0 }
 0x47f   : > { %v4713_v51 = vpop.f32.mrf.mxu1  ;;  %12299 = vst [vmem:[#allocation18_spill] sm:$0xff] %v11753_v38 }
 0x480   : > { %v11739_v30 = vadd.f32 %v4713_v51, %v4526_v52  ;;  %v11763_v8 = vpop.f32.mrf.mxu0 }
 0x481   : > { %v8562_v41 = vpop.f32.mrf.mxu1  ;;  %12302 = vst [vmem:[#allocation21_spill] sm:$0xff] %v11763_v8 }
 0x482   : > { %v11745_v46 = vadd.f32 %v8562_v41, %v4529_v26  ;;  %v11773_v62 = vpop.f32.mrf.mxu0 }
 0x483   : > { %v4723_v58 = vpop.f32.mrf.mxu1  ;;  %12305 = vst [vmem:[#allocation24_spill] sm:$0xff] %v11773_v62 }
 0x484   : > { %v11749_v19 = vadd.f32 %v4723_v58, %v4528_v32 }
 0x485   : > { %v8565_v3 = vpop.f32.mrf.mxu1 }
 0x486   : > { %12298 = vst [vmem:[#allocation17_spill] sm:$0xff] %v11749_v19  ;;  %v11755_v52 = vadd.f32 %v8565_v3, %v4531_v48 }
 0x487   : > { %v4733_v51 = vpop.f32.mrf.mxu1 }
 0x488   : > { %12300 = vst [vmem:[#allocation19_spill] sm:$0xff] %v11755_v52  ;;  %v11759_v4 = vadd.f32 %v4733_v51, %v4530_v15  ;;  %v11781_v15 = vpop.f32.mrf.mxu0 }
 0x489   : > { %v8568_v26 = vpop.f32.mrf.mxu1 }
 0x48a   : > { %12301 = vst [vmem:[#allocation20_spill] sm:$0xff] %v11759_v4  ;;  %v11765_v41 = vadd.f32 %v8568_v26, %v4533_v11  ;;  %v11783_v51 = vpop.f32.mrf.mxu0 }
 0x48b   : > { %v4743_v56 = vpop.f32.mrf.mxu1 }
 0x48c   : > { %12303 = vst [vmem:[#allocation22_spill] sm:$0xff] %v11765_v41  ;;  %v11769_v32 = vadd.f32 %v4743_v56, %v4532_v50  ;;  %v11787_v61 = vpop.f32.mrf.mxu0  ;;  %v5817_v41 = vlaneseq }
 0x48d   : > { %v8571_v58 = vpop.f32.mrf.mxu1 }
 0x48e   : > { %12304 = vst [vmem:[#allocation23_spill] sm:$0xff] %v11769_v32  ;;  %v11775_v48 = vadd.f32 %v8571_v58, %v4535_v39  ;;  %v11793_v56 = vpop.f32.mrf.mxu0  ;;  %v11827_v52 = vshrl.u32 %v5817_v41, 7  ;;  %v5013_v41 = vadd.f32 %v11558_v25, %v11665_v27 }
 0x48f   : > { %v4753_v47 = vpop.f32.mrf.mxu1 }
 0x490   : > { %12306 = vst [vmem:[#allocation25_spill] sm:$0xff] %v11775_v48  ;;  %v11779_v3 = vadd.f32 %v4753_v47, %v4534_v34  ;;  %v11799_v39 = vpop.f32.mrf.mxu0 }
 0x491   : > { %v8674_v42 = vpop.f32.mrf.mxu1 }
 0x492   : > { %12307 = vst [vmem:[#allocation26_spill] sm:$0xff] %v11779_v3  ;;  %v11805_v47 = vpop.f32.mrf.mxu0 }
 0x493   : > { %v5143_v17 = vpop.f32.mrf.mxu1 }
 0x494   : > { %v11811_v8 = vpop.f32.mrf.mxu0 }
 0x495   : > { %v8677_v11 = vpop.f32.mrf.mxu1  ;;  %12311 = vst [vmem:[#allocation30_spill] sm:$0xff] %v11811_v8 }
 0x496   : > { %v11817_v32 = vpop.f32.mrf.mxu0 }
 0x497   : > { %v11785_v26 = vpop.f32.mrf.mxu1  ;;  %12314 = vst [vmem:[#allocation33_spill] sm:$0xff] %v11817_v32 }
 0x498   : > { %v11823_v4 = vpop.f32.mrf.mxu0 }
 0x499   : > { %v11789_v13 = vpop.f32.mrf.mxu1  ;;  %12317 = vst [vmem:[#allocation36_spill] sm:$0xff] %v11823_v4 }
 0x49a   : > { %v11831_v19 = vpop.f32.mrf.mxu0 }
 0x49b   : > { %v11791_v50 = vpop.f32.mrf.mxu1  ;;  %12320 = vst [vmem:[#allocation39_spill] sm:$0xff] %v11831_v19 }
 0x49d   : > { %v11795_v55 = vpop.f32.mrf.mxu1 }
 0x49f   : > { %v11797_v43 = vpop.f32.mrf.mxu1 }
 0x4a1   : > { %v11801_v58 = vpop.f32.mrf.mxu1 }
 0x4a3   : > { %v11803_v34 = vpop.f32.mrf.mxu1 }
 0x4a4   : > { %12308 = vst [vmem:[#allocation27_spill] sm:$0xff] %v11803_v34  ;;  %v5263_v34 = vadd.f32 %v8674_v42, %v5013_v41  ;;  %v11873_v42 = vadd.s32 136, %v11827_v52 }
 0x4a5   : > { %v11807_v62 = vpop.f32.mrf.mxu1 }
 0x4a6   : > { %12309 = vst [vmem:[#allocation28_spill] sm:$0xff] %v11807_v62  ;;  %v11849_v62 = vadd.s32 56, %v11827_v52 }
 0x4a7   : > { %v11809_v3 = vpop.f32.mrf.mxu1 }
 0x4a8   : > { %12310 = vst [vmem:[#allocation29_spill] sm:$0xff] %v11809_v3  ;;  %v5895_v8 = vand.u32 15, %v11849_v62 }
 0x4a9   : > { %v11813_v48 = vpop.f32.mrf.mxu1 }
 0x4aa   : > { %12312 = vst [vmem:[#allocation31_spill] sm:$0xff] %v11813_v48  ;;  %vm11955_vm6 = vcmp.lt.s32.totalorder %v5895_v8, 12 }
 0x4ab   : > { %v11815_v38 = vpop.f32.mrf.mxu1 }
 0x4ac   : > { %12313 = vst [vmem:[#allocation32_spill] sm:$0xff] %v11815_v38  ;;  %v5819_v38 = vadd.s32 8, %v11827_v52 }
 0x4ad   : > { %v11819_v60 = vpop.f32.mrf.mxu1 }
 0x4ae   : > { %12315 = vst [vmem:[#allocation34_spill] sm:$0xff] %v11819_v60  ;;  %v5821_v60 = vadd.s32 24, %v11827_v52 }
 0x4af   : > { %v11821_v21 = vpop.f32.mrf.mxu1 }
 0x4b0   : > { %12316 = vst [vmem:[#allocation35_spill] sm:$0xff] %v11821_v21  ;;  %v11839_v21 = vpop.f32.mrf.mxu0  ;;  %v5867_v19 = vand.u32 15, %v5821_v60  ;;  %v11867_v60 = vadd.s32 104, %v11827_v52 }
 0x4b1   : > { %v11825_v37 = vpop.f32.mrf.mxu1  ;;  %12323 = vst [vmem:[#allocation42_spill] sm:$0xff] %v11839_v21  ;;  %v5012_v21 = vadd.f32 %v11566_v63, %v11669_v29  ;;  %v5015_v29 = vadd.f32 %v11574_v16, %v11675_v22  ;;  %v11893_v16 = vadd.s32 168, %v11827_v52 }
 0x4b2   : > { %12318 = vst [vmem:[#allocation37_spill] sm:$0xff] %v11825_v37  ;;  %v5853_v37 = vand.u32 15, %v5819_v38  ;;  %v11859_v25 = vpop.f32.mrf.mxu0  ;;  %v11870_v38 = vadd.s32 120, %v11827_v52  ;;  %vm11886_vm4 = vcmp.lt.s32.totalorder %v5867_v19, 12 }
 0x4b3   : > { %v11829_v59 = vpop.f32.mrf.mxu1  ;;  %12326 = vst [vmem:[#allocation45_spill] sm:$0xff] %v11859_v25  ;;  %v5262_v63 = vadd.f32 %v5143_v17, %v5012_v21  ;;  %v5265_v22 = vadd.f32 %v8677_v11, %v5015_v29  ;;  %v5513_v17 = vadd.f32 %v11781_v15, %v5263_v34  ;;  %v11907_v21 = vld [vmem:[%s12267_s4] ss:$0 sm:$0xff] }
 0x4b4   : > { %12319 = vst [vmem:[#allocation38_spill] sm:$0xff] %v11829_v59  ;;  %vm11877_vm3 = vcmp.lt.s32.totalorder %v5853_v37, 12  ;;  %v5014_v37 = vadd.f32 %v11584_v57, %v11679_v12  ;;  %v5965_v12 = vand.u32 15, %v11873_v42 }
 0x4b5   : > { %v11833_v48 = vpop.f32.mrf.mxu1  ;;  %v5512_v29 = vadd.f32 %v11783_v51, %v5262_v63  ;;  %v5018_v51 = vadd.f32 %v11621_v10, %v11699_v40 }
 0x4b6   : > { %12321 = vst [vmem:[#allocation40_spill] sm:$0xff] %v11833_v48  ;;  %v5823_v48 = vadd.s32 40, %v11827_v52  ;;  %v5264_v15 = vadd.f32 %v11785_v26, %v5014_v37  ;;  %v5993_v26 = vand.u32 15, %v11893_v16  ;;  %v5515_v37 = vadd.f32 %v11787_v61, %v5265_v22 }
 0x4b7   : > { %v11836_v3 = vpop.f32.mrf.mxu1  ;;  %vm12074_vm11 = vcmp.lt.s32.totalorder %v5965_v12, 12 }
 0x4b8   : > { %12322 = vst [vmem:[#allocation41_spill] sm:$0xff] %v11836_v3  ;;  %v11852_v3 = vadd.s32 72, %v11827_v52  ;;  %v5881_v32 = vand.u32 15, %v5823_v48  ;;  %v5017_v48 = vadd.f32 %v11594_v33, %v11685_v0  ;;  %v5016_v0 = vadd.f32 %v11604_v28, %v11689_v23 }
 0x4b9   : > { %v11841_v4 = vpop.f32.mrf.mxu1  ;;  %v5021_v23 = vadd.f32 %v11629_v2, %v11705_v44  ;;  %v5514_v22 = vadd.f32 %v11793_v56, %v5264_v15  ;;  %v5022_v2 = vadd.f32 %v11653_v53, %v11719_v18  ;;  %v5268_v18 = vadd.f32 %v11797_v43, %v5018_v51 }
 0x4ba   : > { %12324 = vst [vmem:[#allocation43_spill] sm:$0xff] %v11841_v4  ;;  %v11857_v4 = vadd.s32 88, %v11827_v52  ;;  %v5267_v33 = vadd.f32 %v11789_v13, %v5017_v48  ;;  %vm11920_vm5 = vcmp.lt.s32.totalorder %v5881_v32, 12  ;;  %vm12125_vm13 = vcmp.lt.s32.totalorder %v5993_v26, 12 }
 0x4bb   : > { %v11845_v59 = vpop.f32.mrf.mxu1 }
 0x4bc   : > { %12325 = vst [vmem:[#allocation44_spill] sm:$0xff] %v11845_v59 }
 0x4bd   : > { %v11861_v27 = vpop.f32.mrf.mxu1 }
 0x4be   : > { %12327 = vst [vmem:[#allocation46_spill] sm:$0xff] %v11861_v27  ;;  %v11882_v27 = vadd.s32 152, %v11827_v52 }
 0x4bf   : > { %v11884_v59 = vpop.f32.mrf.mxu1 }
 0x4c0   : > { %12330 = vst [vmem:[#allocation47_spill] sm:$0xff] %v11884_v59  ;;  %v11900_v59 = vpop.f32.mrf.mxu0  ;;  %v5979_v19 = vand.u32 15, %v11882_v27 }
 0x4c1   : > { %12333 = vst [vmem:[#allocation48_spill] sm:$0xff] %v11900_v59  ;;  %v8810_v62 = vpop.f32.mrf.mxu1  ;;  %v5019_v59 = vadd.f32 %v11614_v9, %v11695_v5  ;;  %v5266_v9 = vadd.f32 %v11791_v50, %v5016_v0  ;;  %v5020_v5 = vadd.f32 %v11637_v45, %v11709_v31  ;;  %v5023_v50 = vadd.f32 %v11645_v54, %v11715_v24  ;;  %v12360_v54 = vld [vmem:[#allocation32_spill] sm:$0xff] }
 0x4c2   : > { %v5763_v34 = vadd.f32 %v8810_v62, %v5513_v17  ;;  %v11929_v28 = vpop.f32.mrf.mxu0  ;;  %v11937_v17 = vadd.s32 184, %v11827_v52  ;;  %v5517_v31 = vadd.f32 %v11799_v39, %v5267_v33  ;;  %v5025_v39 = vadd.f32 %v11663_v20, %v11725_v35 }
 0x4c3   : > { %v5643_v11 = vpop.f32.mrf.mxu1  ;;  %v5269_v24 = vadd.f32 %v11795_v55, %v5019_v59  ;;  %v5271_v33 = vadd.f32 %v11801_v58, %v5021_v23  ;;  %v5024_v59 = vadd.f32 %v11673_v49, %v11729_v6  ;;  %v11974_v55 = vadd.f32 %v11683_v14, %v11735_v7  ;;  %v12341_v7 = vld [vmem:[#allocation30_spill] sm:$0xff] }
 0x4c4   : > { %v5794_v63 = vadd.f32 %v11907_v21, %v5763_v34  ;;  %v5762_v13 = vadd.f32 %v5643_v11, %v5512_v29  ;;  %v11959_v53 = vpop.f32.mrf.mxu0  ;;  %v5516_v11 = vadd.f32 %v11805_v47, %v5266_v9  ;;  %v11978_v20 = vadd.f32 %v11693_v1, %v11739_v30 }
 0x4c5   : > { %v8813_v32 = vpop.f32.mrf.mxu1  ;;  %v12338_v0 = vand.u32 15, %v11852_v3  ;;  %v11993_v1 = vadd.f32 %v11703_v36, %v11745_v46  ;;  %v5519_v30 = vadd.f32 %v12341_v7, %v5269_v24  ;;  %v12350_v24 = vld [vmem:[#allocation17_spill] sm:$0xff]  ;;  %vm12093_vm12 = vcmp.lt.s32.totalorder %v5979_v19, 12 }
 0x4c6   : > { %v6203_v10 = vsel %vm11877_vm3, %v5794_v63, 0.0  ;;  %v5793_v40 = vadd.f32 %v11907_v21, %v5762_v13  ;;  %v5765_v61 = vadd.f32 %v8813_v32, %v5515_v37  ;;  %v11989_v14 = vpop.f32.mrf.mxu0  ;;  %v12342_v63 = vld [vmem:[#allocation33_spill] sm:$0xff]  ;;  %v12343_v32 = vld [vmem:[#allocation27_spill] sm:$0xff]  ;;  %v6007_v16 = vand.u32 15, %v11937_v17 }
 0x4c7   : > { %6227 = vst [vmem:[%s11949_s8 + $0x8] sm:$0xff] %v6203_v10  ;;  %v6281_v45 = vmul.f32 %v6203_v10, %v6203_v10  ;;  %v5653_v44 = vpop.f32.mrf.mxu1  ;;  %vm11985_vm7 = vcmp.lt.s32.totalorder %v12338_v0, 12  ;;  %v5518_v13 = vadd.f32 %v12342_v63, %v5268_v18  ;;  %v12351_v18 = vld [vmem:[#allocation13_spill] sm:$0xff]  ;;  %v12355_v0 = vld [vmem:[#allocation39_spill] sm:$0xff] }
 0x4c8   : > { %6226 = vst [vmem:[%s11949_s8] sm:$0xff] %v5793_v40  ;;  %v6250_v52 = vadd.f32 %v6203_v10, %v5793_v40  ;;  %v6280_v41 = vmul.f32 %v5793_v40, %v5793_v40  ;;  %v5796_v56 = vadd.f32 %v11907_v21, %v5765_v61  ;;  %v5764_v48 = vadd.f32 %v5653_v44, %v5514_v22  ;;  %v12344_v40 = vld [vmem:[#allocation28_spill] sm:$0xff] }
 0x4c9   : > { %v8816_v62 = vpop.f32.mrf.mxu1  ;;  %v5270_v10 = vadd.f32 %v12343_v32, %v5020_v5  ;;  %v5273_v61 = vadd.f32 %v12344_v40, %v5023_v50  ;;  %v12345_v22 = vld [vmem:[#allocation36_spill] sm:$0xff]  ;;  %v12346_v44 = vand.u32 15, %v11857_v4  ;;  %v12349_v5 = vld [vmem:[#allocation29_spill] sm:$0xff]  ;;  %vm6153_vm14 = vcmp.lt.s32.totalorder %v6007_v16, 12 }
 0x4ca   : > { %v6304_v15 = vadd.f32 %v6281_v45, %v6280_v41  ;;  %v6205_v8 = vsel %vm11886_vm4, %v5796_v56, 0.0  ;;  %v5795_v34 = vadd.f32 %v11907_v21, %v5764_v48  ;;  %v5767_v29 = vadd.f32 %v8816_v62, %v5517_v31  ;;  %v12011_v48 = vpop.f32.mrf.mxu0  ;;  %v12361_v40 = vld [vmem:[#allocation45_spill] sm:$0xff] }
 0x4cb   : > { %6229 = vst [vmem:[%s11949_s8 + $0x18] sm:$0xff] %v6205_v8  ;;  %v5663_v35 = vpop.f32.mrf.mxu1  ;;  %v6283_v6 = vmul.f32 %v6205_v8, %v6205_v8  ;;  %v5521_v45 = vadd.f32 %v12345_v22, %v5271_v33  ;;  %vm12006_vm8 = vcmp.lt.s32.totalorder %v12346_v44, 12  ;;  %v5272_v50 = vadd.f32 %v12349_v5, %v5022_v2  ;;  %v12364_v5 = vld [vmem:[#allocation48_spill] sm:$0xff] }
 0x4cc   : > { %6228 = vst [vmem:[%s11949_s8 + $0x10] sm:$0xff] %v5795_v34  ;;  %v6251_v43 = vadd.f32 %v6250_v52, %v5795_v34  ;;  %v6282_v47 = vmul.f32 %v5795_v34, %v5795_v34  ;;  %v5798_v25 = vadd.f32 %v11907_v21, %v5767_v29  ;;  %v5766_v58 = vadd.f32 %v5663_v35, %v5516_v11  ;;  %v12352_v35 = vld [vmem:[#allocation31_spill] sm:$0xff] }
 0x4cd   : > { %v8819_v51 = vpop.f32.mrf.mxu1  ;;  %v12016_v62 = vadd.f32 %v12351_v18, %v12350_v24  ;;  %v12365_v18 = vand.u32 15, %v11870_v38 }
 0x4ce   : > { %v6305_v37 = vadd.f32 %v6304_v15, %v6282_v47  ;;  %v6207_v3 = vsel %vm11920_vm5, %v5798_v25, 0.0  ;;  %v5797_v9 = vadd.f32 %v11907_v21, %v5766_v58  ;;  %v6252_v23 = vadd.f32 %v6251_v43, %v6205_v8  ;;  %v12353_v47 = vld [vmem:[#allocation19_spill] sm:$0xff]  ;;  %v12354_v25 = vld [vmem:[#allocation14_spill] sm:$0xff] }
 0x4cf   : > { %6231 = vst [vmem:[%s11949_s8 + $0x28] sm:$0xff] %v6207_v3  ;;  %v5769_v36 = vadd.f32 %v8819_v51, %v5519_v30  ;;  %v5673_v46 = vpop.f32.mrf.mxu1  ;;  %v6285_v4 = vmul.f32 %v6207_v3, %v6207_v3  ;;  %v5275_v43 = vadd.f32 %v12352_v35, %v5025_v39  ;;  %v12023_v58 = vadd.f32 %v12354_v25, %v12353_v47  ;;  %v12380_v51 = vld [vmem:[#allocation40_spill] sm:$0xff] }
 0x4d0   : > { %6230 = vst [vmem:[%s11949_s8 + $0x20] sm:$0xff] %v5797_v9  ;;  %v6253_v57 = vadd.f32 %v6252_v23, %v5797_v9  ;;  %v6284_v52 = vmul.f32 %v5797_v9, %v5797_v9  ;;  %v6306_v41 = vadd.f32 %v6305_v37, %v6283_v6  ;;  %v5768_v56 = vadd.f32 %v5673_v46, %v5518_v13  ;;  %v12359_v37 = vld [vmem:[#allocation42_spill] sm:$0xff]  ;;  %v12037_v9 = vpop.f32.mrf.mxu0 }
 0x4d1   : > { %v5800_v11 = vadd.f32 %v11907_v21, %v5769_v36  ;;  %v8822_v15 = vpop.f32.mrf.mxu1  ;;  %v5520_v6 = vadd.f32 %v12355_v0, %v5270_v10  ;;  %v12356_v30 = vand.u32 15, %v11867_v60  ;;  %v5274_v23 = vadd.f32 %v12360_v54, %v5024_v59 }
 0x4d2   : > { %v6307_v8 = vadd.f32 %v6306_v41, %v6284_v52  ;;  %v5799_v34 = vadd.f32 %v11907_v21, %v5768_v56  ;;  %v6254_v29 = vadd.f32 %v6253_v57, %v6207_v3  ;;  %v5771_v33 = vadd.f32 %v8822_v15, %v5521_v45  ;;  %v12362_v57 = vld [vmem:[#allocation20_spill] sm:$0xff]  ;;  %v12363_v52 = vld [vmem:[#allocation15_spill] sm:$0xff] }
 0x4d3   : > { %v6209_v2 = vsel %vm11955_vm6, %v5800_v11, 0.0  ;;  %v5683_v7 = vpop.f32.mrf.mxu1  ;;  %vm12030_vm9 = vcmp.lt.s32.totalorder %v12356_v30, 12  ;;  %v5523_v3 = vadd.f32 %v12359_v37, %v5273_v61  ;;  %v5522_v36 = vadd.f32 %v12361_v40, %v5272_v50  ;;  %v12372_v30 = vld [vmem:[#allocation37_spill] sm:$0xff]  ;;  %v12377_v40 = vld [vmem:[#allocation18_spill] sm:$0xff] }
 0x4d4   : > { %6233 = vst [vmem:[%s11949_s8 + $0x38] sm:$0xff] %v6209_v2  ;;  %6232 = vst [vmem:[%s11949_s8 + $0x30] sm:$0xff] %v5799_v34  ;;  %v6255_v63 = vadd.f32 %v6254_v29, %v5799_v34  ;;  %v6286_v39 = vmul.f32 %v5799_v34, %v5799_v34  ;;  %v6308_v13 = vadd.f32 %v6307_v8, %v6285_v4  ;;  %vm12050_vm10 = vcmp.lt.s32.totalorder %v12365_v18, 12  ;;  %v12368_v4 = vld [vmem:[#allocation34_spill] sm:$0xff]  ;;  %v12058_v34 = vpop.f32.mrf.mxu0 }
 0x4d5   : > { %v5802_v32 = vadd.f32 %v11907_v21, %v5771_v33  ;;  %v5770_v10 = vadd.f32 %v5683_v7, %v5520_v6  ;;  %v8825_v60 = vpop.f32.mrf.mxu1  ;;  %v6287_v46 = vmul.f32 %v6209_v2, %v6209_v2  ;;  %v5030_v41 = vadd.f32 %v12363_v52, %v12362_v57  ;;  %v12369_v29 = vld [vmem:[#allocation22_spill] sm:$0xff]  ;;  %v12370_v33 = vld [vmem:[#allocation16_spill] sm:$0xff] }
 0x4d6   : > { %v6309_v22 = vadd.f32 %v6308_v13, %v6286_v39  ;;  %v6256_v45 = vadd.f32 %v6255_v63, %v6209_v2  ;;  %v5773_v44 = vadd.f32 %v8825_v60, %v5523_v3  ;;  %v5525_v24 = vadd.f32 %v12364_v5, %v5275_v43  ;;  %v12376_v60 = vld [vmem:[#allocation23_spill] sm:$0xff] }
 0x4d7   : > { %v6211_v61 = vsel %vm11985_vm7, %v5802_v32, 0.0  ;;  %v5801_v59 = vadd.f32 %v11907_v21, %v5770_v10  ;;  %v5693_v56 = vpop.f32.mrf.mxu1  ;;  %v5277_v11 = vadd.f32 %v12368_v4, %v11974_v55  ;;  %v5033_v35 = vadd.f32 %v12370_v33, %v12369_v29  ;;  %v12371_v55 = vld [vmem:[#allocation35_spill] sm:$0xff]  ;;  %v12375_v32 = vld [vmem:[#allocation38_spill] sm:$0xff]  ;;  %v12383_v29 = vld [vmem:[#allocation41_spill] sm:$0xff] }
 0x4d8   : > { %6235 = vst [vmem:[%s11949_s8 + $0x48] sm:$0xff] %v6211_v61  ;;  %v6310_v15 = vadd.f32 %v6309_v22, %v6287_v46  ;;  %v5804_v8 = vadd.f32 %v11907_v21, %v5773_v44  ;;  %v5772_v49 = vadd.f32 %v5693_v56, %v5522_v36  ;;  %v5524_v25 = vadd.f32 %v11929_v28, %v5274_v23 }
 0x4d9   : > { %6234 = vst [vmem:[%s11949_s8 + $0x40] sm:$0xff] %v5801_v59  ;;  %v6257_v38 = vadd.f32 %v6256_v45, %v5801_v59  ;;  %v6288_v43 = vmul.f32 %v5801_v59, %v5801_v59  ;;  %v8828_v47 = vpop.f32.mrf.mxu1  ;;  %v5276_v2 = vadd.f32 %v12371_v55, %v11978_v20  ;;  %v5279_v63 = vadd.f32 %v12372_v30, %v11993_v1  ;;  %v5483_v1 = vpop.f32.mrf.mxu0 }
 0x4da   : > { %v6213_v0 = vsel %vm12006_vm8, %v5804_v8, 0.0  ;;  %v5803_v6 = vadd.f32 %v11907_v21, %v5772_v49  ;;  %v5775_v7 = vadd.f32 %v8828_v47, %v5525_v24  ;;  %v6289_v39 = vmul.f32 %v6211_v61, %v6211_v61  ;;  %v12384_v47 = vld [vmem:[#allocation43_spill] sm:$0xff] }
 0x4db   : > { %v6311_v13 = vadd.f32 %v6310_v15, %v6288_v43  ;;  %6237 = vst [vmem:[%s11949_s8 + $0x58] sm:$0xff] %v6213_v0  ;;  %v6258_v37 = vadd.f32 %v6257_v38, %v6211_v61  ;;  %v5703_v3 = vpop.f32.mrf.mxu1  ;;  %v5527_v23 = vadd.f32 %v11959_v53, %v5277_v11  ;;  %v5278_v10 = vadd.f32 %v12375_v32, %v12016_v62  ;;  %v8772_v4 = vpop.f32.mrf.mxu0  ;;  %v12381_v11 = vld [vmem:[#allocation25_spill] sm:$0xff] }
 0x4dc   : > { %6236 = vst [vmem:[%s11949_s8 + $0x50] sm:$0xff] %v5803_v6  ;;  %v6290_v20 = vmul.f32 %v5803_v6, %v5803_v6  ;;  %v5806_v31 = vadd.f32 %v11907_v21, %v5775_v7  ;;  %v5774_v54 = vadd.f32 %v5703_v3, %v5524_v25  ;;  %v5032_v36 = vadd.f32 %v12377_v40, %v12376_v60  ;;  %v12382_v15 = vld [vmem:[#allocation21_spill] sm:$0xff] }
 0x4dd   : > { %v6259_v42 = vadd.f32 %v6258_v37, %v5803_v6  ;;  %v6312_v12 = vadd.f32 %v6311_v13, %v6289_v39  ;;  %v8831_v46 = vpop.f32.mrf.mxu1  ;;  %v5526_v57 = vadd.f32 %v11989_v14, %v5276_v2  ;;  %v6291_v53 = vmul.f32 %v6213_v0, %v6213_v0  ;;  %v5493_v50 = vpop.f32.mrf.mxu0  ;;  %v12386_v13 = vld [vmem:[#allocation26_spill] sm:$0xff]  ;;  %v12387_v37 = vld [vmem:[#allocation24_spill] sm:$0xff] }
 0x4de   : > { %v6215_v22 = vsel %vm12030_vm9, %v5806_v31, 0.0  ;;  %v5805_v45 = vadd.f32 %v11907_v21, %v5774_v54  ;;  %v5777_v44 = vadd.f32 %v8831_v46, %v5527_v23  ;;  %v5529_v59 = vadd.f32 %v12011_v48, %v5279_v63  ;;  %v12385_v63 = vld [vmem:[#allocation44_spill] sm:$0xff] }
 0x4df   : > { %v6313_v52 = vadd.f32 %v6312_v12, %v6290_v20  ;;  %6239 = vst [vmem:[%s11949_s8 + $0x68] sm:$0xff] %v6215_v22  ;;  %v6260_v61 = vadd.f32 %v6259_v42, %v6213_v0  ;;  %v5713_v62 = vpop.f32.mrf.mxu1  ;;  %v5281_v5 = vadd.f32 %v12380_v51, %v12023_v58  ;;  %v5035_v48 = vadd.f32 %v12382_v15, %v12381_v11  ;;  %v12388_v12 = vld [vmem:[#allocation46_spill] sm:$0xff]  ;;  %v8775_v28 = vpop.f32.mrf.mxu0 }
 0x4e0   : > { %6238 = vst [vmem:[%s11949_s8 + $0x60] sm:$0xff] %v5805_v45  ;;  %v6292_v24 = vmul.f32 %v5805_v45, %v5805_v45  ;;  %v5808_v14 = vadd.f32 %v11907_v21, %v5777_v44  ;;  %v5776_v18 = vadd.f32 %v5713_v62, %v5526_v57  ;;  %v5528_v49 = vadd.f32 %v12037_v9, %v5278_v10  ;;  %v12391_v62 = vld [vmem:[#allocation47_spill] sm:$0xff] }
 0x4e1   : > { %v6261_v8 = vadd.f32 %v6260_v61, %v5805_v45  ;;  %v6314_v27 = vadd.f32 %v6313_v52, %v6291_v53  ;;  %v8834_v19 = vpop.f32.mrf.mxu1  ;;  %v5280_v33 = vadd.f32 %v12383_v29, %v5030_v41  ;;  %v5283_v25 = vadd.f32 %v12384_v47, %v5033_v35  ;;  %v5503_v56 = vpop.f32.mrf.mxu0 }
 0x4e2   : > { %v6217_v58 = vsel %vm12050_vm10, %v5808_v14, 0.0  ;;  %v5807_v38 = vadd.f32 %v11907_v21, %v5776_v18  ;;  %v5779_v43 = vadd.f32 %v8834_v19, %v5529_v59  ;;  %v6293_v55 = vmul.f32 %v6215_v22, %v6215_v22 }
 0x4e3   : > { %v6315_v2 = vadd.f32 %v6314_v27, %v6292_v24  ;;  %6241 = vst [vmem:[%s11949_s8 + $0x78] sm:$0xff] %v6217_v58  ;;  %v6262_v0 = vadd.f32 %v6261_v8, %v6215_v22  ;;  %v5723_v6 = vpop.f32.mrf.mxu1  ;;  %v5531_v41 = vadd.f32 %v12058_v34, %v5281_v5  ;;  %v5282_v39 = vadd.f32 %v12385_v63, %v5032_v36 }
 0x4e4   : > { %6240 = vst [vmem:[%s11949_s8 + $0x70] sm:$0xff] %v5807_v38  ;;  %v6294_v7 = vmul.f32 %v5807_v38, %v5807_v38  ;;  %v5810_v9 = vadd.f32 %v11907_v21, %v5779_v43  ;;  %v5778_v30 = vadd.f32 %v5723_v6, %v5528_v49  ;;  %v5034_v35 = vadd.f32 %v12387_v37, %v12386_v13 }
 0x4e5   : > { %v6263_v3 = vadd.f32 %v6262_v0, %v5807_v38  ;;  %v6316_v20 = vadd.f32 %v6315_v2, %v6293_v55  ;;  %v8837_v31 = vpop.f32.mrf.mxu1  ;;  %v5530_v10 = vadd.f32 %v5483_v1, %v5280_v33  ;;  %v6295_v60 = vmul.f32 %v6217_v58, %v6217_v58 }
 0x4e6   : > { %v6219_v54 = vsel %vm12074_vm11, %v5810_v9, 0.0  ;;  %v5809_v23 = vadd.f32 %v11907_v21, %v5778_v30  ;;  %v5781_v32 = vadd.f32 %v8837_v31, %v5531_v41  ;;  %v5533_v36 = vadd.f32 %v8772_v4, %v5283_v25 }
 0x4e7   : > { %v6317_v40 = vadd.f32 %v6316_v20, %v6294_v7  ;;  %6243 = vst [vmem:[%s11949_s8 + $0x88] sm:$0xff] %v6219_v54  ;;  %v6264_v34 = vadd.f32 %v6263_v3, %v6217_v58  ;;  %v5733_v42 = vpop.f32.mrf.mxu1  ;;  %v5285_v46 = vadd.f32 %v12388_v12, %v5035_v48  ;;  %v5532_v61 = vadd.f32 %v5493_v50, %v5282_v39 }
 0x4e8   : > { %6242 = vst [vmem:[%s11949_s8 + $0x80] sm:$0xff] %v5809_v23  ;;  %v6296_v22 = vmul.f32 %v5809_v23, %v5809_v23  ;;  %v5812_v45 = vadd.f32 %v11907_v21, %v5781_v32  ;;  %v5780_v44 = vadd.f32 %v5733_v42, %v5530_v10  ;;  %v5284_v59 = vadd.f32 %v12391_v62, %v5034_v35 }
 0x4e9   : > { %v6265_v57 = vadd.f32 %v6264_v34, %v5809_v23  ;;  %v6318_v53 = vadd.f32 %v6317_v40, %v6295_v60  ;;  %v8840_v52 = vpop.f32.mrf.mxu1  ;;  %v6297_v14 = vmul.f32 %v6219_v54, %v6219_v54  ;;  %v5535_v8 = vadd.f32 %v8775_v28, %v5285_v46 }
 0x4ea   : > { %v6221_v51 = vsel %vm12093_vm12, %v5812_v45, 0.0  ;;  %v5811_v5 = vadd.f32 %v11907_v21, %v5780_v44  ;;  %v5783_v24 = vadd.f32 %v8840_v52, %v5533_v36  ;;  %v5534_v58 = vadd.f32 %v5503_v56, %v5284_v59 }
 0x4eb   : > { %v6319_v18 = vadd.f32 %v6318_v53, %v6296_v22  ;;  %6245 = vst [vmem:[%s11949_s8 + $0x98] sm:$0xff] %v6221_v51  ;;  %v6266_v4 = vadd.f32 %v6265_v57, %v6219_v54  ;;  %v5743_v11 = vpop.f32.mrf.mxu1  ;;  %v6299_v38 = vmul.f32 %v6221_v51, %v6221_v51 }
 0x4ec   : > { %6244 = vst [vmem:[%s11949_s8 + $0x90] sm:$0xff] %v5811_v5  ;;  %v6298_v26 = vmul.f32 %v5811_v5, %v5811_v5  ;;  %v5814_v15 = vadd.f32 %v11907_v21, %v5783_v24  ;;  %v5782_v48 = vadd.f32 %v5743_v11, %v5532_v61 }
 0x4ed   : > { %v6267_v27 = vadd.f32 %v6266_v4, %v5811_v5  ;;  %v6320_v19 = vadd.f32 %v6319_v18, %v6297_v14  ;;  %v8843_v49 = vpop.f32.mrf.mxu1 }
 0x4ee   : > { %v6223_v29 = vsel %vm12125_vm13, %v5814_v15, 0.0  ;;  %v5813_v33 = vadd.f32 %v11907_v21, %v5782_v48  ;;  %v5785_v17 = vadd.f32 %v8843_v49, %v5535_v8 }
 0x4ef   : > { %v6321_v43 = vadd.f32 %v6320_v19, %v6298_v26  ;;  %6247 = vst [vmem:[%s11949_s8 + $0xa8] sm:$0xff] %v6223_v29  ;;  %v6268_v47 = vadd.f32 %v6267_v27, %v6221_v51  ;;  %v5753_v25 = vpop.f32.mrf.mxu1  ;;  %v6301_v41 = vmul.f32 %v6223_v29, %v6223_v29 }
 0x4f0   : > { %6246 = vst [vmem:[%s11949_s8 + $0xa0] sm:$0xff] %v5813_v33  ;;  %v6300_v55 = vmul.f32 %v5813_v33, %v5813_v33  ;;  %v5816_v2 = vadd.f32 %v11907_v21, %v5785_v17  ;;  %v5784_v0 = vadd.f32 %v5753_v25, %v5534_v58 }
 0x4f1   : > { %v6269_v6 = vadd.f32 %v6268_v47, %v5813_v33  ;;  %v6322_v7 = vadd.f32 %v6321_v43, %v6299_v38 }
 0x4f2   : > { %v6225_v9 = vsel %vm6153_vm14, %v5816_v2, 0.0  ;;  %v5815_v30 = vadd.f32 %v11907_v21, %v5784_v0 }
 0x4f3   : > { %v6323_v50 = vadd.f32 %v6322_v7, %v6300_v55  ;;  %6249 = vst [vmem:[%s11949_s8 + $0xb8] sm:$0xff] %v6225_v9  ;;  %v6270_v63 = vadd.f32 %v6269_v6, %v6223_v29 }
 0x4f4   : > { %6248 = vst [vmem:[%s11949_s8 + $0xb0] sm:$0xff] %v5815_v30  ;;  %v6302_v39 = vmul.f32 %v5815_v30, %v5815_v30 }
 0x4f5   : > { %v6271_v13 = vadd.f32 %v6270_v63, %v5815_v30  ;;  %v6324_v37 = vadd.f32 %v6323_v50, %v6301_v41 }
 0x4f6   : > { %8954 = shalt.err (!%p8951_p0)
}
 0x4f7   : > { %s8955_s23 = scalar_lea.hbm %s12148_s17, 3072  ;;  %s8959_s15 = scalar_lea.hbm %s12268_s5, 6144 }
 0x4f8   : > { %p8956_p1 = scmp.ne.s32.totalorder %s12148_s17, %s8955_s23  ;;  %p8960_p4 = scmp.lt.s32.totalorder %s12148_s17, %s12268_s5 }
 0x4f9   : > { %p8961_p7 = scmp.lt.s32.totalorder %s8959_s15, %s8955_s23 }
 0x4fa   : > { %p8957_p2 = pnand %p8956_p1, %p9153_p5 }
 0x4fb   : > { %p8962_p8 = por %p8961_p7, %p8960_p4 }
 0x4fc   : > { %p8958_p3 = pneg %p8957_p2 }
 0x4fe   : > { %p8963_p6 = pnand %p8962_p8, %p8958_p3 }
 0x500   : > { %8966 = shalt.err (!%p8963_p6)
}
 0x501   : > { %s9069_s9 = smov 128   ;;  %s9070_s21 = smov 8   ;;  %v6303_v21 = vmul.f32 %v6225_v9, %v6225_v9  ;;  %v6272_v35 = vadd.f32 %v6271_v13, %v6225_v9  ;;  %v6325_v3 = vadd.f32 %v6324_v37, %v6302_v39 }
 0x502   : > { %8853 = dma.vmem_to_hbm [thread:$0]  (%p9153_p5), %s12151_s14, 3072, %s12148_s17, %s6335_s18, %s9069_s9, %s9069_s9, %s9070_s21  }
 0x503   : > { %v6273_v20 = vrot.slane %v6272_v35, 4  ;;  %v6326_v31 = vadd.f32 %v6325_v3, %v6303_v21  ;;  %s6339_s22 = sand.u32 1, %s9134_s28   ;;  %s6797_s23 = sshll.u32 %s9134_s28, 4 }
 0x504   : > { %s296_s8 = scalar_lea.vmem [#allocation7], %s11864_s20  ;;  %s12272_s14 = scalar_lea.vmem [#allocation9], %s11864_s20 }
 0x505   : > { %v6274_v54 = vadd.f32 %v6273_v20, %v6272_v35  ;;  %v6327_v23 = vrot.slane %v6326_v31, 4  ;;  %s6372_s13 = sshll.u32 %s296_s8, 4  ;;  %s6385_s17 = sshll.u32 %s12272_s14, 4  ;;  %s12189_s13 = int_to_ptr.vmem [resolvable:$true] %s6372_s13  ;;  %s12196_s17 = int_to_ptr.vmem [resolvable:$true] %s6385_s17 }
 0x506   : > { %s12187_s16 = scalar_lea.hbm %s12269_s6, %s6797_s23  ;;  %s12194_s9 = scalar_lea.hbm %s12270_s7, %s6797_s23 }
 0x507   : > { %v6275_v32 = vrot.slane %v6274_v54, 2  ;;  %v6328_v10 = vadd.f32 %v6327_v23, %v6326_v31  ;;  %s12198_s21 = scalar_lea.sflag [#allocation8], %s6339_s22  ;;  %s8967_s18 = scalar_lea.vmem %s12189_s13, 16 }
 0x508   : > { %p8968_p9 = scmp.ne.s32.totalorder %s12189_s13, %s8967_s18  ;;  %s9071_s15 = smov [#allocation7]  }
 0x509   : > { %v6329_v60 = vrot.slane %v6328_v10, 2  ;;  %v6276_v40 = vadd.f32 %v6275_v32, %v6274_v54  ;;  %s8971_s29 = sshll.u32 %s9071_s15, 4  ;;  %s8972_s29 = int_to_ptr.vmem [resolvable:$false] %s8971_s29 }
 0x50a   : > { %p8969_p10 = pnand %p8968_p9, %p9153_p5  ;;  %s8973_s14 = scalar_lea.vmem %s8972_s29, 32 }
 0x50b   : > { %v6277_v34 = vrot.slane %v6276_v40, 1  ;;  %v6330_v42 = vadd.f32 %v6329_v60, %v6328_v10  ;;  %p8974_p12 = scmp.lt.s32.totalorder %s12189_s13, %s8972_s29  ;;  %p8975_p13 = scmp.lt.s32.totalorder %s8973_s14, %s8967_s18 }
 0x50c   : > { %p8970_p11 = pneg %p8969_p10 }
 0x50d   : > { %v6278_v36 = vadd.f32 %v6277_v34, %v6276_v40  ;;  %v6331_v12 = vrot.slane %v6330_v42, 1  ;;  %p8976_p0 = por %p8975_p13, %p8974_p12 }
 0x50f   : > { %6279 = vst [vmem:[%s296_s8] sm:$0x1] %v6278_v36  ;;  %v6332_v46 = vadd.f32 %v6331_v12, %v6330_v42  ;;  %p8977_p1 = pnand %p8976_p0, %p8970_p11 }
 0x511   : > { %8980 = shalt.err (!%p8977_p1)
}
 0x512   : > { %s8981_s22 = scalar_lea.hbm %s12187_s16, 16  ;;  %s8985_s28 = scalar_lea.hbm %s12269_s6, 32 }
 0x513   : > { %p8982_p2 = scmp.ne.s32.totalorder %s12187_s16, %s8981_s22  ;;  %p8986_p7 = scmp.lt.s32.totalorder %s12187_s16, %s12269_s6 }
 0x514   : > { %p8987_p8 = scmp.lt.s32.totalorder %s8985_s28, %s8981_s22 }
 0x515   : > { %p8983_p3 = pnand %p8982_p2, %p9153_p5 }
 0x516   : > { %p8988_p6 = por %p8987_p8, %p8986_p7 }
 0x517   : > { %p8984_p4 = pneg %p8983_p3 }
 0x519   : > { %p8989_p9 = pnand %p8988_p6, %p8984_p4 }
 0x51b   : > { %8992 = shalt.err (!%p8989_p9)
}
 0x51c   : > { %8854 = dma.vmem_to_hbm [thread:$0]  (%p9153_p5), %s12189_s13, 16, %s12187_s16, %s12198_s21  }
 0x51d   : > { %s12392_s29 = scalar_lea.vmem [#allocation9], %s11864_s20  ;;  %s8993_s14 = scalar_lea.vmem %s12196_s17, 16 }
 0x51e   : > { %6333 = vst [vmem:[%s12392_s29] sm:$0x1] %v6332_v46  ;;  %p8994_p10 = scmp.ne.s32.totalorder %s12196_s17, %s8993_s14  ;;  %s9072_s18 = smov [#allocation9]  }
 0x51f   : > { %s8997_s22 = sshll.u32 %s9072_s18, 4  ;;  %s8998_s22 = int_to_ptr.vmem [resolvable:$false] %s8997_s22 }
 0x520   : > { %p8995_p11 = pnand %p8994_p10, %p9153_p5  ;;  %s8999_s23 = scalar_lea.vmem %s8998_s22, 32 }
 0x521   : > { %p9000_p13 = scmp.lt.s32.totalorder %s12196_s17, %s8998_s22  ;;  %p9001_p0 = scmp.lt.s32.totalorder %s8999_s23, %s8993_s14 }
 0x522   : > { %p8996_p12 = pneg %p8995_p11 }
 0x523   : > { %p9002_p1 = por %p9001_p0, %p9000_p13 }
 0x525   : > { %p9003_p2 = pnand %p9002_p1, %p8996_p12 }
 0x527   : > { %9006 = shalt.err (!%p9003_p2)
}
 0x528   : > { %s9007_s20 = scalar_lea.hbm %s12194_s9, 16  ;;  %s9011_s8 = scalar_lea.hbm %s12270_s7, 32 }
 0x529   : > { %p9008_p3 = scmp.ne.s32.totalorder %s12194_s9, %s9007_s20  ;;  %p9012_p8 = scmp.lt.s32.totalorder %s12194_s9, %s12270_s7 }
 0x52a   : > { %p9013_p6 = scmp.lt.s32.totalorder %s9011_s8, %s9007_s20 }
 0x52b   : > { %p9009_p4 = pnand %p9008_p3, %p9153_p5 }
 0x52c   : > { %p9014_p9 = por %p9013_p6, %p9012_p8 }
 0x52d   : > { %p9010_p7 = pneg %p9009_p4 }
 0x52f   : > { %p9015_p10 = pnand %p9014_p9, %p9010_p7 }
 0x531   : > { %9018 = shalt.err (!%p9015_p10)
}
 0x532   : > { %8855 = dma.vmem_to_hbm [thread:$0]  (%p9153_p5), %s12196_s17, 16, %s12194_s9, %s12198_s21  }
 0x533 PF: > { %p8875_p11 = scmp.ge.s32.totalorder %s9061_s27, 2  ;;  %s6397_s15 = sand.u32 1, %s9049_s24  }
 0x534   : > { %p12393_p12 = scmp.ne.s32.totalorder %s12274_s12, 0  ;;  %s6398_s29 = scalar_lea.sflag [#allocation5], %s6397_s15 }
 0x536   : > { %p8864_p13 = pnand %p8875_p11, %p12393_p12 }
 0x538   : > { %p8865_p0 = pneg %p8864_p13 }
 0x53a   : > { %9040 = dma.done.wait (%p8865_p0), %s6398_s29, 3072  }
 0x53b   : > { %9042 = vsyncadd (%p8865_p0), %s6398_s29, 4294964224  ;;  %s12394_s14 = sadd.s32 4294967294, %s9061_s27  }
 0x53c   : > { %s6406_s18 = sand.u32 1, %s12394_s14  }
 0x53d   : > { %s6407_s11 = scalar_lea.sflag [#allocation8], %s6406_s18 }
 0x53e   : > { %9044 = dma.done.wait (%p8865_p0), %s6407_s11, 32  }
 0x53f   : > { %9046 = vsyncadd (%p8865_p0), %s6407_s11, 4294967264  ;;  %p22_p5 = scmp.ge.s32.totalorder %s9138_s30, 4   ;;  %s12395_s24 = smov %s9053_s25 }
 0x540   : > { %s12396_s25 = smov %s9057_s26  ;;  %s12397_s26 = smov %s9151_s10 }
 0x541   : > { %s12398_s27 = smov %s9138_s30  ;;  %24 = sbr.rel (!%p22_p5) target bundleno = 6 (0x6), region = 128 }
 0x546   :  { %6419 = vsyncpa [#allocation4], 1 }
 0x547   :  { %6421 = vsyncpa [#allocation4 + $0x1], 1 }
 0x548   :  { %6422 = vsyncpa [#allocation5], 1 }
 0x549   :  { %6424 = vsyncpa [#allocation5 + $0x1], 1 }
 0x54a   :  { %6425 = vsyncpa [#allocation8], 1 }
 0x54b   :  { %6427 = vsyncpa [#allocation8 + $0x1], 1 }

</bundles_post_ra>
